<compile_context>
chip_gen: v7x
topology: tpu7x:2x2x1
jax: 0.10.0
libtpu: 0.0.40
codegen_flags: <defaults>
</compile_context>

<pallas_src>
import jax
import jax.numpy as jnp
from jax.experimental import pallas as pl
from jax.experimental.pallas import tpu as pltpu


# ----------------------------------------------------------------------------
# Fused kernel: wavefront 4-layer LSTM + collapsed linear head, all in VMEM.
# ----------------------------------------------------------------------------
def make_fused_kernel(num_layers, B, T, H):
    def kernel(x_ref, wih0_ref, whh0_ref, b0_ref, *refs):
        # refs = [wcat_1, b_1, ..., wcat_{L-1}, b_{L-1}, W_head, b_head, out_ref]
        n_upper = 2 * (num_layers - 1)
        upper = refs[:n_upper]
        w_head_ref, b_head_ref = refs[n_upper], refs[n_upper + 1]
        out_ref = refs[n_upper + 2]

        # ---- layer 0: hoisted input projection over all timesteps (one matmul) ----
        # x_ref is time-major: row t*B + b.
        xw0 = (jnp.dot(x_ref[...], wih0_ref[...],
                       preferred_element_type=jnp.float32)
               + b0_ref[...])                                   # (T*B, 4H)

        whh0 = whh0_ref[...]                                    # (H, 4H)
        wcats = [upper[2 * i][...] for i in range(num_layers - 1)]      # (2H, 4H)
        biases = [upper[2 * i + 1][...] for i in range(num_layers - 1)]  # (1, 4H)

        h = [jnp.zeros((B, H), jnp.float32) for _ in range(num_layers)]
        c = [jnp.zeros((B, H), jnp.float32) for _ in range(num_layers)]

        def lstm_cell(gates, c_prev):
            # One sigmoid over the full 4H (=128-lane) gates row covers i, f, o;
            # only the g quadrant needs tanh.
            sg = jax.nn.sigmoid(gates)
            i_g = sg[:, 0 * H:1 * H]
            f_g = sg[:, 1 * H:2 * H]
            o_g = sg[:, 3 * H:4 * H]
            g_g = jnp.tanh(gates[:, 2 * H:3 * H])
            c_new = f_g * c_prev + i_g * g_g
            h_new = o_g * jnp.tanh(c_new)
            return h_new, c_new

        # ---- time-major wavefront: cell(l,t) depends only on (l-1,t) and (l,t-1) ----
        for t in range(T):
            gates0 = (xw0[t * B:(t + 1) * B, :]
                      + jnp.dot(h[0], whh0, preferred_element_type=jnp.float32))
            h[0], c[0] = lstm_cell(gates0, c[0])
            for l in range(1, num_layers):
                inp = jnp.concatenate([h[l - 1], h[l]], axis=-1)        # (B, 2H)
                gates = (jnp.dot(inp, wcats[l - 1],
                                 preferred_element_type=jnp.float32)
                         + biases[l - 1])                               # (B, 4H)
                h[l], c[l] = lstm_cell(gates, c[l])

        # ---- collapsed linear head on the last layer's last-timestep hidden ----
        out_ref[...] = (jnp.dot(h[num_layers - 1], w_head_ref[...],
                                preferred_element_type=jnp.float32)
                        + b_head_ref[...])                              # (B, 1)

    return kernel


# ----------------------------------------------------------------------------
# Parameter packing (layout plumbing + exact linear-head collapse, no compute
# that belongs inside the kernel).
# ----------------------------------------------------------------------------
def pack_params(lstm_params, head_params):
    wih0_t, whh0_t, b0 = lstm_params[0]
    packed = [wih0_t, whh0_t, b0]
    for wih_t, whh_t, b in lstm_params[1:]:
        packed.append(jnp.concatenate([wih_t, whh_t], axis=0))   # (2H, 4H)
        packed.append(b)                                          # (1, 4H)
    w1, b1, w2, b2, w3, b3 = head_params
    w_head = w1 @ w2 @ w3                                         # (H, 1) -- exact (head is purely linear)
    b_head = b1 @ w2 @ w3 + b2 @ w3 + b3                          # (1, 1)
    packed.extend([w_head, b_head])
    return tuple(packed)


# ----------------------------------------------------------------------------
# Full forward pass: exactly one pallas_call; only a tiny transpose/reshape of
# the ~1 KB input in the wrapper (fused into the input DMA).
# ----------------------------------------------------------------------------
@jax.jit
def conv_perf_predictor(features, packed_params):
    B, T, E = features.shape
    num_layers = (len(packed_params) - 5) // 2 + 1
    H = packed_params[1].shape[0]                    # whh0^T is (H, 4H)

    x_tm = jnp.transpose(features, (1, 0, 2)).reshape(T * B, E)   # time-major rows t*B+b

    vmem = pl.BlockSpec(memory_space=pltpu.MemorySpace.VMEM)
    return pl.pallas_call(
        make_fused_kernel(num_layers, B, T, H),
        out_shape=jax.ShapeDtypeStruct((B, 1), jnp.float32),
        in_specs=[vmem] * (1 + len(packed_params)),
        out_specs=vmem,
    )(x_tm, *packed_params)


# ----------------------------------------------------------------------------
# Deterministic parameter init (PyTorch-style uniform ranges)
# ----------------------------------------------------------------------------
def init_params(key, embedding_dim, hidden_dim, num_layers):
    lstm_params = []
    k_lstm = 1.0 / jnp.sqrt(hidden_dim)
    for layer in range(num_layers):
        din = embedding_dim if layer == 0 else hidden_dim
        key, k1, k2, k3, k4 = jax.random.split(key, 5)
        # PyTorch stores W_ih: (4H, din), W_hh: (4H, H); we pass transposes.
        w_ih = jax.random.uniform(k1, (4 * hidden_dim, din), jnp.float32, -k_lstm, k_lstm)
        w_hh = jax.random.uniform(k2, (4 * hidden_dim, hidden_dim), jnp.float32, -k_lstm, k_lstm)
        b_ih = jax.random.uniform(k3, (4 * hidden_dim,), jnp.float32, -k_lstm, k_lstm)
        b_hh = jax.random.uniform(k4, (4 * hidden_dim,), jnp.float32, -k_lstm, k_lstm)
        lstm_params.append((w_ih.T, w_hh.T, (b_ih + b_hh)[None, :]))

    def linear(key, fan_in, fan_out):
        k = 1.0 / jnp.sqrt(fan_in)
        k1, k2 = jax.random.split(key)
        w = jax.random.uniform(k1, (fan_out, fan_in), jnp.float32, -k, k)
        b = jax.random.uniform(k2, (fan_out,), jnp.float32, -k, k)
        return w.T, b[None, :]

    key, kh1, kh2, kh3 = jax.random.split(key, 4)
    w1, b1 = linear(kh1, hidden_dim, 32)
    w2, b2 = linear(kh2, 32, 16)
    w3, b3 = linear(kh3, 16, 1)
    head_params = (w1, b1, w2, b2, w3, b3)
    return lstm_params, head_params


def reference_forward(features, lstm_params, head_params):
    """Pure-JAX reference (unfused math, full 3-matmul head) for correctness."""
    x = jnp.transpose(features, (1, 0, 2))  # (T, B, E)
    for wih_t, whh_t, b in lstm_params:
        T, B, _ = x.shape
        H = whh_t.shape[0]
        h = jnp.zeros((B, H), jnp.float32)
        c = jnp.zeros((B, H), jnp.float32)
        outs = []
        for t in range(T):
            gates = x[t] @ wih_t + h @ whh_t + b
            i = jax.nn.sigmoid(gates[:, 0 * H:1 * H])
            f = jax.nn.sigmoid(gates[:, 1 * H:2 * H])
            g = jnp.tanh(gates[:, 2 * H:3 * H])
            o = jax.nn.sigmoid(gates[:, 3 * H:4 * H])
            c = f * c + i * g
            h = o * jnp.tanh(c)
            outs.append(h)
        x = jnp.stack(outs, axis=0)
    h_last = x[-1]
    w1, b1, w2, b2, w3, b3 = head_params
    return ((h_last @ w1 + b1) @ w2 + b2) @ w3 + b3


if __name__ == "__main__":
    B, T, E, H = 2, 8, 16, 32
    NUM_LAYERS = 4

    key = jax.random.PRNGKey(0)
    key, kx, kp = jax.random.split(key, 3)
    features = jax.random.normal(kx, (B, T, E), jnp.float32)

    lstm_params, head_params = init_params(kp, E, H, NUM_LAYERS)
    packed = pack_params(lstm_params, head_params)

    out = conv_perf_predictor(features, packed)
    out = jax.block_until_ready(out)

    ref = reference_forward(features, lstm_params, head_params)
    assert out.shape == (B, 1), out.shape
    # Tolerance slightly looser than fp32 ulp: fused [Wih||Whh] contraction and
    # the exact head collapse reassociate a few fp32 sums vs. the reference.
    assert jnp.allclose(out, ref, atol=1e-4, rtol=1e-4), (out, ref)

    print("KERNEL_OK")
</pallas_src>

<mosaic_0001>
module attributes {stable_mosaic.version = 11 : i64} {
  func.func @kernel(%arg0: memref<16x16xf32, #tpu.memory_space<vmem>>, %arg1: memref<16x128xf32, #tpu.memory_space<vmem>>, %arg2: memref<32x128xf32, #tpu.memory_space<vmem>>, %arg3: memref<1x128xf32, #tpu.memory_space<vmem>>, %arg4: memref<64x128xf32, #tpu.memory_space<vmem>>, %arg5: memref<1x128xf32, #tpu.memory_space<vmem>>, %arg6: memref<64x128xf32, #tpu.memory_space<vmem>>, %arg7: memref<1x128xf32, #tpu.memory_space<vmem>>, %arg8: memref<64x128xf32, #tpu.memory_space<vmem>>, %arg9: memref<1x128xf32, #tpu.memory_space<vmem>>, %arg10: memref<32x1xf32, #tpu.memory_space<vmem>>, %arg11: memref<1x1xf32, #tpu.memory_space<vmem>>, %arg12: memref<2x1xf32, #tpu.memory_space<vmem>>) attributes {dimension_semantics = [], scalar_prefetch = 0 : i64, scratch_operands = 0 : i64, tpu.core_type = #tpu.core_type<tc>} {
    %c0 = arith.constant 0 : index
    %c0_0 = arith.constant 0 : index
    %0 = vector.load %arg0[%c0, %c0_0] : memref<16x16xf32, #tpu.memory_space<vmem>>, vector<16x16xf32>
    %c0_1 = arith.constant 0 : index
    %c0_2 = arith.constant 0 : index
    %1 = vector.load %arg1[%c0_1, %c0_2] : memref<16x128xf32, #tpu.memory_space<vmem>>, vector<16x128xf32>
    %cst = arith.constant dense<0.000000e+00> : vector<16x128xf32>
    %2 = tpu.matmul %0, %1, %cst {dimension_numbers = #tpu.dot_dimension_numbers<[1], [0], [0], [1], [0, 0, 1, 1], [], []>} : vector<16x16xf32>, vector<16x128xf32>, vector<16x128xf32> -> vector<16x128xf32>
    %c0_3 = arith.constant 0 : index
    %c0_4 = arith.constant 0 : index
    %3 = vector.load %arg3[%c0_3, %c0_4] : memref<1x128xf32, #tpu.memory_space<vmem>>, vector<1x128xf32>
    %4 = vector.broadcast %3 : vector<1x128xf32> to vector<16x128xf32>
    %5 = arith.addf %2, %4 : vector<16x128xf32>
    %c0_5 = arith.constant 0 : index
    %c0_6 = arith.constant 0 : index
    %6 = vector.load %arg2[%c0_5, %c0_6] : memref<32x128xf32, #tpu.memory_space<vmem>>, vector<32x128xf32>
    %c0_7 = arith.constant 0 : index
    %c0_8 = arith.constant 0 : index
    %7 = vector.load %arg4[%c0_7, %c0_8] : memref<64x128xf32, #tpu.memory_space<vmem>>, vector<64x128xf32>
    %c0_9 = arith.constant 0 : index
    %c0_10 = arith.constant 0 : index
    %8 = vector.load %arg6[%c0_9, %c0_10] : memref<64x128xf32, #tpu.memory_space<vmem>>, vector<64x128xf32>
    %c0_11 = arith.constant 0 : index
    %c0_12 = arith.constant 0 : index
    %9 = vector.load %arg8[%c0_11, %c0_12] : memref<64x128xf32, #tpu.memory_space<vmem>>, vector<64x128xf32>
    %c0_13 = arith.constant 0 : index
    %c0_14 = arith.constant 0 : index
    %10 = vector.load %arg5[%c0_13, %c0_14] : memref<1x128xf32, #tpu.memory_space<vmem>>, vector<1x128xf32>
    %c0_15 = arith.constant 0 : index
    %c0_16 = arith.constant 0 : index
    %11 = vector.load %arg7[%c0_15, %c0_16] : memref<1x128xf32, #tpu.memory_space<vmem>>, vector<1x128xf32>
    %c0_17 = arith.constant 0 : index
    %c0_18 = arith.constant 0 : index
    %12 = vector.load %arg9[%c0_17, %c0_18] : memref<1x128xf32, #tpu.memory_space<vmem>>, vector<1x128xf32>
    %cst_19 = arith.constant 0.000000e+00 : f32
    %13 = vector.broadcast %cst_19 : f32 to vector<2x32xf32>
    %cst_20 = arith.constant 0.000000e+00 : f32
    %14 = vector.broadcast %cst_20 : f32 to vector<2x32xf32>
    %cst_21 = arith.constant 0.000000e+00 : f32
    %15 = vector.broadcast %cst_21 : f32 to vector<2x32xf32>
    %cst_22 = arith.constant 0.000000e+00 : f32
    %16 = vector.broadcast %cst_22 : f32 to vector<2x32xf32>
    %cst_23 = arith.constant 0.000000e+00 : f32
    %17 = vector.broadcast %cst_23 : f32 to vector<2x32xf32>
    %cst_24 = arith.constant 0.000000e+00 : f32
    %18 = vector.broadcast %cst_24 : f32 to vector<2x32xf32>
    %cst_25 = arith.constant 0.000000e+00 : f32
    %19 = vector.broadcast %cst_25 : f32 to vector<2x32xf32>
    %cst_26 = arith.constant 0.000000e+00 : f32
    %20 = vector.broadcast %cst_26 : f32 to vector<2x32xf32>
    %21 = vector.extract_strided_slice %5 {offsets = [0, 0], sizes = [2, 128], strides = [1, 1]} : vector<16x128xf32> to vector<2x128xf32>
    %cst_27 = arith.constant dense<0.000000e+00> : vector<2x128xf32>
    %22 = tpu.matmul %13, %6, %cst_27 {dimension_numbers = #tpu.dot_dimension_numbers<[1], [0], [0], [1], [0, 0, 1, 1], [], []>} : vector<2x32xf32>, vector<32x128xf32>, vector<2x128xf32> -> vector<2x128xf32>
    %23 = arith.addf %21, %22 : vector<2x128xf32>
    %24 = arith.negf %23 : vector<2x128xf32>
    %25 = math.exp %24 : vector<2x128xf32>
    %cst_28 = arith.constant 1.000000e+00 : f32
    %26 = vector.broadcast %cst_28 : f32 to vector<2x128xf32>
    %27 = arith.addf %26, %25 : vector<2x128xf32>
    %28 = arith.divf %26, %27 : vector<2x128xf32>
    %29 = vector.extract_strided_slice %28 {offsets = [0, 0], sizes = [2, 32], strides = [1, 1]} : vector<2x128xf32> to vector<2x32xf32>
    %30 = vector.extract_strided_slice %28 {offsets = [0, 32], sizes = [2, 32], strides = [1, 1]} : vector<2x128xf32> to vector<2x32xf32>
    %31 = vector.extract_strided_slice %28 {offsets = [0, 96], sizes = [2, 32], strides = [1, 1]} : vector<2x128xf32> to vector<2x32xf32>
    %32 = vector.extract_strided_slice %23 {offsets = [0, 64], sizes = [2, 32], strides = [1, 1]} : vector<2x128xf32> to vector<2x32xf32>
    %33 = math.tanh %32 : vector<2x32xf32>
    %34 = arith.mulf %30, %17 : vector<2x32xf32>
    %35 = arith.mulf %29, %33 : vector<2x32xf32>
    %36 = arith.addf %34, %35 : vector<2x32xf32>
    %37 = math.tanh %36 : vector<2x32xf32>
    %38 = arith.mulf %31, %37 : vector<2x32xf32>
    %39 = tpu.concatenate %38, %14 in 1 : vector<2x32xf32>, vector<2x32xf32> -> vector<2x64xf32>
    %cst_29 = arith.constant dense<0.000000e+00> : vector<2x128xf32>
    %40 = tpu.matmul %39, %7, %cst_29 {dimension_numbers = #tpu.dot_dimension_numbers<[1], [0], [0], [1], [0, 0, 1, 1], [], []>} : vector<2x64xf32>, vector<64x128xf32>, vector<2x128xf32> -> vector<2x128xf32>
    %41 = vector.broadcast %10 : vector<1x128xf32> to vector<2x128xf32>
    %42 = arith.addf %40, %41 : vector<2x128xf32>
    %43 = arith.negf %42 : vector<2x128xf32>
    %44 = math.exp %43 : vector<2x128xf32>
    %cst_30 = arith.constant 1.000000e+00 : f32
    %45 = vector.broadcast %cst_30 : f32 to vector<2x128xf32>
    %46 = arith.addf %45, %44 : vector<2x128xf32>
    %47 = arith.divf %45, %46 : vector<2x128xf32>
    %48 = vector.extract_strided_slice %47 {offsets = [0, 0], sizes = [2, 32], strides = [1, 1]} : vector<2x128xf32> to vector<2x32xf32>
    %49 = vector.extract_strided_slice %47 {offsets = [0, 32], sizes = [2, 32], strides = [1, 1]} : vector<2x128xf32> to vector<2x32xf32>
    %50 = vector.extract_strided_slice %47 {offsets = [0, 96], sizes = [2, 32], strides = [1, 1]} : vector<2x128xf32> to vector<2x32xf32>
    %51 = vector.extract_strided_slice %42 {offsets = [0, 64], sizes = [2, 32], strides = [1, 1]} : vector<2x128xf32> to vector<2x32xf32>
    %52 = math.tanh %51 : vector<2x32xf32>
    %53 = arith.mulf %49, %18 : vector<2x32xf32>
    %54 = arith.mulf %48, %52 : vector<2x32xf32>
    %55 = arith.addf %53, %54 : vector<2x32xf32>
    %56 = math.tanh %55 : vector<2x32xf32>
    %57 = arith.mulf %50, %56 : vector<2x32xf32>
    %58 = tpu.concatenate %57, %15 in 1 : vector<2x32xf32>, vector<2x32xf32> -> vector<2x64xf32>
    %cst_31 = arith.constant dense<0.000000e+00> : vector<2x128xf32>
    %59 = tpu.matmul %58, %8, %cst_31 {dimension_numbers = #tpu.dot_dimension_numbers<[1], [0], [0], [1], [0, 0, 1, 1], [], []>} : vector<2x64xf32>, vector<64x128xf32>, vector<2x128xf32> -> vector<2x128xf32>
    %60 = vector.broadcast %11 : vector<1x128xf32> to vector<2x128xf32>
    %61 = arith.addf %59, %60 : vector<2x128xf32>
    %62 = arith.negf %61 : vector<2x128xf32>
    %63 = math.exp %62 : vector<2x128xf32>
    %cst_32 = arith.constant 1.000000e+00 : f32
    %64 = vector.broadcast %cst_32 : f32 to vector<2x128xf32>
    %65 = arith.addf %64, %63 : vector<2x128xf32>
    %66 = arith.divf %64, %65 : vector<2x128xf32>
    %67 = vector.extract_strided_slice %66 {offsets = [0, 0], sizes = [2, 32], strides = [1, 1]} : vector<2x128xf32> to vector<2x32xf32>
    %68 = vector.extract_strided_slice %66 {offsets = [0, 32], sizes = [2, 32], strides = [1, 1]} : vector<2x128xf32> to vector<2x32xf32>
    %69 = vector.extract_strided_slice %66 {offsets = [0, 96], sizes = [2, 32], strides = [1, 1]} : vector<2x128xf32> to vector<2x32xf32>
    %70 = vector.extract_strided_slice %61 {offsets = [0, 64], sizes = [2, 32], strides = [1, 1]} : vector<2x128xf32> to vector<2x32xf32>
    %71 = math.tanh %70 : vector<2x32xf32>
    %72 = arith.mulf %68, %19 : vector<2x32xf32>
    %73 = arith.mulf %67, %71 : vector<2x32xf32>
    %74 = arith.addf %72, %73 : vector<2x32xf32>
    %75 = math.tanh %74 : vector<2x32xf32>
    %76 = arith.mulf %69, %75 : vector<2x32xf32>
    %77 = tpu.concatenate %76, %16 in 1 : vector<2x32xf32>, vector<2x32xf32> -> vector<2x64xf32>
    %cst_33 = arith.constant dense<0.000000e+00> : vector<2x128xf32>
    %78 = tpu.matmul %77, %9, %cst_33 {dimension_numbers = #tpu.dot_dimension_numbers<[1], [0], [0], [1], [0, 0, 1, 1], [], []>} : vector<2x64xf32>, vector<64x128xf32>, vector<2x128xf32> -> vector<2x128xf32>
    %79 = vector.broadcast %12 : vector<1x128xf32> to vector<2x128xf32>
    %80 = arith.addf %78, %79 : vector<2x128xf32>
    %81 = arith.negf %80 : vector<2x128xf32>
    %82 = math.exp %81 : vector<2x128xf32>
    %cst_34 = arith.constant 1.000000e+00 : f32
    %83 = vector.broadcast %cst_34 : f32 to vector<2x128xf32>
    %84 = arith.addf %83, %82 : vector<2x128xf32>
    %85 = arith.divf %83, %84 : vector<2x128xf32>
    %86 = vector.extract_strided_slice %85 {offsets = [0, 0], sizes = [2, 32], strides = [1, 1]} : vector<2x128xf32> to vector<2x32xf32>
    %87 = vector.extract_strided_slice %85 {offsets = [0, 32], sizes = [2, 32], strides = [1, 1]} : vector<2x128xf32> to vector<2x32xf32>
    %88 = vector.extract_strided_slice %85 {offsets = [0, 96], sizes = [2, 32], strides = [1, 1]} : vector<2x128xf32> to vector<2x32xf32>
    %89 = vector.extract_strided_slice %80 {offsets = [0, 64], sizes = [2, 32], strides = [1, 1]} : vector<2x128xf32> to vector<2x32xf32>
    %90 = math.tanh %89 : vector<2x32xf32>
    %91 = arith.mulf %87, %20 : vector<2x32xf32>
    %92 = arith.mulf %86, %90 : vector<2x32xf32>
    %93 = arith.addf %91, %92 : vector<2x32xf32>
    %94 = math.tanh %93 : vector<2x32xf32>
    %95 = arith.mulf %88, %94 : vector<2x32xf32>
    %96 = vector.extract_strided_slice %5 {offsets = [2, 0], sizes = [2, 128], strides = [1, 1]} : vector<16x128xf32> to vector<2x128xf32>
    %cst_35 = arith.constant dense<0.000000e+00> : vector<2x128xf32>
    %97 = tpu.matmul %38, %6, %cst_35 {dimension_numbers = #tpu.dot_dimension_numbers<[1], [0], [0], [1], [0, 0, 1, 1], [], []>} : vector<2x32xf32>, vector<32x128xf32>, vector<2x128xf32> -> vector<2x128xf32>
    %98 = arith.addf %96, %97 : vector<2x128xf32>
    %99 = arith.negf %98 : vector<2x128xf32>
    %100 = math.exp %99 : vector<2x128xf32>
    %cst_36 = arith.constant 1.000000e+00 : f32
    %101 = vector.broadcast %cst_36 : f32 to vector<2x128xf32>
    %102 = arith.addf %101, %100 : vector<2x128xf32>
    %103 = arith.divf %101, %102 : vector<2x128xf32>
    %104 = vector.extract_strided_slice %103 {offsets = [0, 0], sizes = [2, 32], strides = [1, 1]} : vector<2x128xf32> to vector<2x32xf32>
    %105 = vector.extract_strided_slice %103 {offsets = [0, 32], sizes = [2, 32], strides = [1, 1]} : vector<2x128xf32> to vector<2x32xf32>
    %106 = vector.extract_strided_slice %103 {offsets = [0, 96], sizes = [2, 32], strides = [1, 1]} : vector<2x128xf32> to vector<2x32xf32>
    %107 = vector.extract_strided_slice %98 {offsets = [0, 64], sizes = [2, 32], strides = [1, 1]} : vector<2x128xf32> to vector<2x32xf32>
    %108 = math.tanh %107 : vector<2x32xf32>
    %109 = arith.mulf %105, %36 : vector<2x32xf32>
    %110 = arith.mulf %104, %108 : vector<2x32xf32>
    %111 = arith.addf %109, %110 : vector<2x32xf32>
    %112 = math.tanh %111 : vector<2x32xf32>
    %113 = arith.mulf %106, %112 : vector<2x32xf32>
    %114 = tpu.concatenate %113, %57 in 1 : vector<2x32xf32>, vector<2x32xf32> -> vector<2x64xf32>
    %cst_37 = arith.constant dense<0.000000e+00> : vector<2x128xf32>
    %115 = tpu.matmul %114, %7, %cst_37 {dimension_numbers = #tpu.dot_dimension_numbers<[1], [0], [0], [1], [0, 0, 1, 1], [], []>} : vector<2x64xf32>, vector<64x128xf32>, vector<2x128xf32> -> vector<2x128xf32>
    %116 = vector.broadcast %10 : vector<1x128xf32> to vector<2x128xf32>
    %117 = arith.addf %115, %116 : vector<2x128xf32>
    %118 = arith.negf %117 : vector<2x128xf32>
    %119 = math.exp %118 : vector<2x128xf32>
    %cst_38 = arith.constant 1.000000e+00 : f32
    %120 = vector.broadcast %cst_38 : f32 to vector<2x128xf32>
    %121 = arith.addf %120, %119 : vector<2x128xf32>
    %122 = arith.divf %120, %121 : vector<2x128xf32>
    %123 = vector.extract_strided_slice %122 {offsets = [0, 0], sizes = [2, 32], strides = [1, 1]} : vector<2x128xf32> to vector<2x32xf32>
    %124 = vector.extract_strided_slice %122 {offsets = [0, 32], sizes = [2, 32], strides = [1, 1]} : vector<2x128xf32> to vector<2x32xf32>
    %125 = vector.extract_strided_slice %122 {offsets = [0, 96], sizes = [2, 32], strides = [1, 1]} : vector<2x128xf32> to vector<2x32xf32>
    %126 = vector.extract_strided_slice %117 {offsets = [0, 64], sizes = [2, 32], strides = [1, 1]} : vector<2x128xf32> to vector<2x32xf32>
    %127 = math.tanh %126 : vector<2x32xf32>
    %128 = arith.mulf %124, %55 : vector<2x32xf32>
    %129 = arith.mulf %123, %127 : vector<2x32xf32>
    %130 = arith.addf %128, %129 : vector<2x32xf32>
    %131 = math.tanh %130 : vector<2x32xf32>
    %132 = arith.mulf %125, %131 : vector<2x32xf32>
    %133 = tpu.concatenate %132, %76 in 1 : vector<2x32xf32>, vector<2x32xf32> -> vector<2x64xf32>
    %cst_39 = arith.constant dense<0.000000e+00> : vector<2x128xf32>
    %134 = tpu.matmul %133, %8, %cst_39 {dimension_numbers = #tpu.dot_dimension_numbers<[1], [0], [0], [1], [0, 0, 1, 1], [], []>} : vector<2x64xf32>, vector<64x128xf32>, vector<2x128xf32> -> vector<2x128xf32>
    %135 = vector.broadcast %11 : vector<1x128xf32> to vector<2x128xf32>
    %136 = arith.addf %134, %135 : vector<2x128xf32>
    %137 = arith.negf %136 : vector<2x128xf32>
    %138 = math.exp %137 : vector<2x128xf32>
    %cst_40 = arith.constant 1.000000e+00 : f32
    %139 = vector.broadcast %cst_40 : f32 to vector<2x128xf32>
    %140 = arith.addf %139, %138 : vector<2x128xf32>
    %141 = arith.divf %139, %140 : vector<2x128xf32>
    %142 = vector.extract_strided_slice %141 {offsets = [0, 0], sizes = [2, 32], strides = [1, 1]} : vector<2x128xf32> to vector<2x32xf32>
    %143 = vector.extract_strided_slice %141 {offsets = [0, 32], sizes = [2, 32], strides = [1, 1]} : vector<2x128xf32> to vector<2x32xf32>
    %144 = vector.extract_strided_slice %141 {offsets = [0, 96], sizes = [2, 32], strides = [1, 1]} : vector<2x128xf32> to vector<2x32xf32>
    %145 = vector.extract_strided_slice %136 {offsets = [0, 64], sizes = [2, 32], strides = [1, 1]} : vector<2x128xf32> to vector<2x32xf32>
    %146 = math.tanh %145 : vector<2x32xf32>
    %147 = arith.mulf %143, %74 : vector<2x32xf32>
    %148 = arith.mulf %142, %146 : vector<2x32xf32>
    %149 = arith.addf %147, %148 : vector<2x32xf32>
    %150 = math.tanh %149 : vector<2x32xf32>
    %151 = arith.mulf %144, %150 : vector<2x32xf32>
    %152 = tpu.concatenate %151, %95 in 1 : vector<2x32xf32>, vector<2x32xf32> -> vector<2x64xf32>
    %cst_41 = arith.constant dense<0.000000e+00> : vector<2x128xf32>
    %153 = tpu.matmul %152, %9, %cst_41 {dimension_numbers = #tpu.dot_dimension_numbers<[1], [0], [0], [1], [0, 0, 1, 1], [], []>} : vector<2x64xf32>, vector<64x128xf32>, vector<2x128xf32> -> vector<2x128xf32>
    %154 = vector.broadcast %12 : vector<1x128xf32> to vector<2x128xf32>
    %155 = arith.addf %153, %154 : vector<2x128xf32>
    %156 = arith.negf %155 : vector<2x128xf32>
    %157 = math.exp %156 : vector<2x128xf32>
    %cst_42 = arith.constant 1.000000e+00 : f32
    %158 = vector.broadcast %cst_42 : f32 to vector<2x128xf32>
    %159 = arith.addf %158, %157 : vector<2x128xf32>
    %160 = arith.divf %158, %159 : vector<2x128xf32>
    %161 = vector.extract_strided_slice %160 {offsets = [0, 0], sizes = [2, 32], strides = [1, 1]} : vector<2x128xf32> to vector<2x32xf32>
    %162 = vector.extract_strided_slice %160 {offsets = [0, 32], sizes = [2, 32], strides = [1, 1]} : vector<2x128xf32> to vector<2x32xf32>
    %163 = vector.extract_strided_slice %160 {offsets = [0, 96], sizes = [2, 32], strides = [1, 1]} : vector<2x128xf32> to vector<2x32xf32>
    %164 = vector.extract_strided_slice %155 {offsets = [0, 64], sizes = [2, 32], strides = [1, 1]} : vector<2x128xf32> to vector<2x32xf32>
    %165 = math.tanh %164 : vector<2x32xf32>
    %166 = arith.mulf %162, %93 : vector<2x32xf32>
    %167 = arith.mulf %161, %165 : vector<2x32xf32>
    %168 = arith.addf %166, %167 : vector<2x32xf32>
    %169 = math.tanh %168 : vector<2x32xf32>
    %170 = arith.mulf %163, %169 : vector<2x32xf32>
    %171 = vector.extract_strided_slice %5 {offsets = [4, 0], sizes = [2, 128], strides = [1, 1]} : vector<16x128xf32> to vector<2x128xf32>
    %cst_43 = arith.constant dense<0.000000e+00> : vector<2x128xf32>
    %172 = tpu.matmul %113, %6, %cst_43 {dimension_numbers = #tpu.dot_dimension_numbers<[1], [0], [0], [1], [0, 0, 1, 1], [], []>} : vector<2x32xf32>, vector<32x128xf32>, vector<2x128xf32> -> vector<2x128xf32>
    %173 = arith.addf %171, %172 : vector<2x128xf32>
    %174 = arith.negf %173 : vector<2x128xf32>
    %175 = math.exp %174 : vector<2x128xf32>
    %cst_44 = arith.constant 1.000000e+00 : f32
    %176 = vector.broadcast %cst_44 : f32 to vector<2x128xf32>
    %177 = arith.addf %176, %175 : vector<2x128xf32>
    %178 = arith.divf %176, %177 : vector<2x128xf32>
    %179 = vector.extract_strided_slice %178 {offsets = [0, 0], sizes = [2, 32], strides = [1, 1]} : vector<2x128xf32> to vector<2x32xf32>
    %180 = vector.extract_strided_slice %178 {offsets = [0, 32], sizes = [2, 32], strides = [1, 1]} : vector<2x128xf32> to vector<2x32xf32>
    %181 = vector.extract_strided_slice %178 {offsets = [0, 96], sizes = [2, 32], strides = [1, 1]} : vector<2x128xf32> to vector<2x32xf32>
    %182 = vector.extract_strided_slice %173 {offsets = [0, 64], sizes = [2, 32], strides = [1, 1]} : vector<2x128xf32> to vector<2x32xf32>
    %183 = math.tanh %182 : vector<2x32xf32>
    %184 = arith.mulf %180, %111 : vector<2x32xf32>
    %185 = arith.mulf %179, %183 : vector<2x32xf32>
    %186 = arith.addf %184, %185 : vector<2x32xf32>
    %187 = math.tanh %186 : vector<2x32xf32>
    %188 = arith.mulf %181, %187 : vector<2x32xf32>
    %189 = tpu.concatenate %188, %132 in 1 : vector<2x32xf32>, vector<2x32xf32> -> vector<2x64xf32>
    %cst_45 = arith.constant dense<0.000000e+00> : vector<2x128xf32>
    %190 = tpu.matmul %189, %7, %cst_45 {dimension_numbers = #tpu.dot_dimension_numbers<[1], [0], [0], [1], [0, 0, 1, 1], [], []>} : vector<2x64xf32>, vector<64x128xf32>, vector<2x128xf32> -> vector<2x128xf32>
    %191 = vector.broadcast %10 : vector<1x128xf32> to vector<2x128xf32>
    %192 = arith.addf %190, %191 : vector<2x128xf32>
    %193 = arith.negf %192 : vector<2x128xf32>
    %194 = math.exp %193 : vector<2x128xf32>
    %cst_46 = arith.constant 1.000000e+00 : f32
    %195 = vector.broadcast %cst_46 : f32 to vector<2x128xf32>
    %196 = arith.addf %195, %194 : vector<2x128xf32>
    %197 = arith.divf %195, %196 : vector<2x128xf32>
    %198 = vector.extract_strided_slice %197 {offsets = [0, 0], sizes = [2, 32], strides = [1, 1]} : vector<2x128xf32> to vector<2x32xf32>
    %199 = vector.extract_strided_slice %197 {offsets = [0, 32], sizes = [2, 32], strides = [1, 1]} : vector<2x128xf32> to vector<2x32xf32>
    %200 = vector.extract_strided_slice %197 {offsets = [0, 96], sizes = [2, 32], strides = [1, 1]} : vector<2x128xf32> to vector<2x32xf32>
    %201 = vector.extract_strided_slice %192 {offsets = [0, 64], sizes = [2, 32], strides = [1, 1]} : vector<2x128xf32> to vector<2x32xf32>
    %202 = math.tanh %201 : vector<2x32xf32>
    %203 = arith.mulf %199, %130 : vector<2x32xf32>
    %204 = arith.mulf %198, %202 : vector<2x32xf32>
    %205 = arith.addf %203, %204 : vector<2x32xf32>
    %206 = math.tanh %205 : vector<2x32xf32>
    %207 = arith.mulf %200, %206 : vector<2x32xf32>
    %208 = tpu.concatenate %207, %151 in 1 : vector<2x32xf32>, vector<2x32xf32> -> vector<2x64xf32>
    %cst_47 = arith.constant dense<0.000000e+00> : vector<2x128xf32>
    %209 = tpu.matmul %208, %8, %cst_47 {dimension_numbers = #tpu.dot_dimension_numbers<[1], [0], [0], [1], [0, 0, 1, 1], [], []>} : vector<2x64xf32>, vector<64x128xf32>, vector<2x128xf32> -> vector<2x128xf32>
    %210 = vector.broadcast %11 : vector<1x128xf32> to vector<2x128xf32>
    %211 = arith.addf %209, %210 : vector<2x128xf32>
    %212 = arith.negf %211 : vector<2x128xf32>
    %213 = math.exp %212 : vector<2x128xf32>
    %cst_48 = arith.constant 1.000000e+00 : f32
    %214 = vector.broadcast %cst_48 : f32 to vector<2x128xf32>
    %215 = arith.addf %214, %213 : vector<2x128xf32>
    %216 = arith.divf %214, %215 : vector<2x128xf32>
    %217 = vector.extract_strided_slice %216 {offsets = [0, 0], sizes = [2, 32], strides = [1, 1]} : vector<2x128xf32> to vector<2x32xf32>
    %218 = vector.extract_strided_slice %216 {offsets = [0, 32], sizes = [2, 32], strides = [1, 1]} : vector<2x128xf32> to vector<2x32xf32>
    %219 = vector.extract_strided_slice %216 {offsets = [0, 96], sizes = [2, 32], strides = [1, 1]} : vector<2x128xf32> to vector<2x32xf32>
    %220 = vector.extract_strided_slice %211 {offsets = [0, 64], sizes = [2, 32], strides = [1, 1]} : vector<2x128xf32> to vector<2x32xf32>
    %221 = math.tanh %220 : vector<2x32xf32>
    %222 = arith.mulf %218, %149 : vector<2x32xf32>
    %223 = arith.mulf %217, %221 : vector<2x32xf32>
    %224 = arith.addf %222, %223 : vector<2x32xf32>
    %225 = math.tanh %224 : vector<2x32xf32>
    %226 = arith.mulf %219, %225 : vector<2x32xf32>
    %227 = tpu.concatenate %226, %170 in 1 : vector<2x32xf32>, vector<2x32xf32> -> vector<2x64xf32>
    %cst_49 = arith.constant dense<0.000000e+00> : vector<2x128xf32>
    %228 = tpu.matmul %227, %9, %cst_49 {dimension_numbers = #tpu.dot_dimension_numbers<[1], [0], [0], [1], [0, 0, 1, 1], [], []>} : vector<2x64xf32>, vector<64x128xf32>, vector<2x128xf32> -> vector<2x128xf32>
    %229 = vector.broadcast %12 : vector<1x128xf32> to vector<2x128xf32>
    %230 = arith.addf %228, %229 : vector<2x128xf32>
    %231 = arith.negf %230 : vector<2x128xf32>
    %232 = math.exp %231 : vector<2x128xf32>
    %cst_50 = arith.constant 1.000000e+00 : f32
    %233 = vector.broadcast %cst_50 : f32 to vector<2x128xf32>
    %234 = arith.addf %233, %232 : vector<2x128xf32>
    %235 = arith.divf %233, %234 : vector<2x128xf32>
    %236 = vector.extract_strided_slice %235 {offsets = [0, 0], sizes = [2, 32], strides = [1, 1]} : vector<2x128xf32> to vector<2x32xf32>
    %237 = vector.extract_strided_slice %235 {offsets = [0, 32], sizes = [2, 32], strides = [1, 1]} : vector<2x128xf32> to vector<2x32xf32>
    %238 = vector.extract_strided_slice %235 {offsets = [0, 96], sizes = [2, 32], strides = [1, 1]} : vector<2x128xf32> to vector<2x32xf32>
    %239 = vector.extract_strided_slice %230 {offsets = [0, 64], sizes = [2, 32], strides = [1, 1]} : vector<2x128xf32> to vector<2x32xf32>
    %240 = math.tanh %239 : vector<2x32xf32>
    %241 = arith.mulf %237, %168 : vector<2x32xf32>
    %242 = arith.mulf %236, %240 : vector<2x32xf32>
    %243 = arith.addf %241, %242 : vector<2x32xf32>
    %244 = math.tanh %243 : vector<2x32xf32>
    %245 = arith.mulf %238, %244 : vector<2x32xf32>
    %246 = vector.extract_strided_slice %5 {offsets = [6, 0], sizes = [2, 128], strides = [1, 1]} : vector<16x128xf32> to vector<2x128xf32>
    %cst_51 = arith.constant dense<0.000000e+00> : vector<2x128xf32>
    %247 = tpu.matmul %188, %6, %cst_51 {dimension_numbers = #tpu.dot_dimension_numbers<[1], [0], [0], [1], [0, 0, 1, 1], [], []>} : vector<2x32xf32>, vector<32x128xf32>, vector<2x128xf32> -> vector<2x128xf32>
    %248 = arith.addf %246, %247 : vector<2x128xf32>
    %249 = arith.negf %248 : vector<2x128xf32>
    %250 = math.exp %249 : vector<2x128xf32>
    %cst_52 = arith.constant 1.000000e+00 : f32
    %251 = vector.broadcast %cst_52 : f32 to vector<2x128xf32>
    %252 = arith.addf %251, %250 : vector<2x128xf32>
    %253 = arith.divf %251, %252 : vector<2x128xf32>
    %254 = vector.extract_strided_slice %253 {offsets = [0, 0], sizes = [2, 32], strides = [1, 1]} : vector<2x128xf32> to vector<2x32xf32>
    %255 = vector.extract_strided_slice %253 {offsets = [0, 32], sizes = [2, 32], strides = [1, 1]} : vector<2x128xf32> to vector<2x32xf32>
    %256 = vector.extract_strided_slice %253 {offsets = [0, 96], sizes = [2, 32], strides = [1, 1]} : vector<2x128xf32> to vector<2x32xf32>
    %257 = vector.extract_strided_slice %248 {offsets = [0, 64], sizes = [2, 32], strides = [1, 1]} : vector<2x128xf32> to vector<2x32xf32>
    %258 = math.tanh %257 : vector<2x32xf32>
    %259 = arith.mulf %255, %186 : vector<2x32xf32>
    %260 = arith.mulf %254, %258 : vector<2x32xf32>
    %261 = arith.addf %259, %260 : vector<2x32xf32>
    %262 = math.tanh %261 : vector<2x32xf32>
    %263 = arith.mulf %256, %262 : vector<2x32xf32>
    %264 = tpu.concatenate %263, %207 in 1 : vector<2x32xf32>, vector<2x32xf32> -> vector<2x64xf32>
    %cst_53 = arith.constant dense<0.000000e+00> : vector<2x128xf32>
    %265 = tpu.matmul %264, %7, %cst_53 {dimension_numbers = #tpu.dot_dimension_numbers<[1], [0], [0], [1], [0, 0, 1, 1], [], []>} : vector<2x64xf32>, vector<64x128xf32>, vector<2x128xf32> -> vector<2x128xf32>
    %266 = vector.broadcast %10 : vector<1x128xf32> to vector<2x128xf32>
    %267 = arith.addf %265, %266 : vector<2x128xf32>
    %268 = arith.negf %267 : vector<2x128xf32>
    %269 = math.exp %268 : vector<2x128xf32>
    %cst_54 = arith.constant 1.000000e+00 : f32
    %270 = vector.broadcast %cst_54 : f32 to vector<2x128xf32>
    %271 = arith.addf %270, %269 : vector<2x128xf32>
    %272 = arith.divf %270, %271 : vector<2x128xf32>
    %273 = vector.extract_strided_slice %272 {offsets = [0, 0], sizes = [2, 32], strides = [1, 1]} : vector<2x128xf32> to vector<2x32xf32>
    %274 = vector.extract_strided_slice %272 {offsets = [0, 32], sizes = [2, 32], strides = [1, 1]} : vector<2x128xf32> to vector<2x32xf32>
    %275 = vector.extract_strided_slice %272 {offsets = [0, 96], sizes = [2, 32], strides = [1, 1]} : vector<2x128xf32> to vector<2x32xf32>
    %276 = vector.extract_strided_slice %267 {offsets = [0, 64], sizes = [2, 32], strides = [1, 1]} : vector<2x128xf32> to vector<2x32xf32>
    %277 = math.tanh %276 : vector<2x32xf32>
    %278 = arith.mulf %274, %205 : vector<2x32xf32>
    %279 = arith.mulf %273, %277 : vector<2x32xf32>
    %280 = arith.addf %278, %279 : vector<2x32xf32>
    %281 = math.tanh %280 : vector<2x32xf32>
    %282 = arith.mulf %275, %281 : vector<2x32xf32>
    %283 = tpu.concatenate %282, %226 in 1 : vector<2x32xf32>, vector<2x32xf32> -> vector<2x64xf32>
    %cst_55 = arith.constant dense<0.000000e+00> : vector<2x128xf32>
    %284 = tpu.matmul %283, %8, %cst_55 {dimension_numbers = #tpu.dot_dimension_numbers<[1], [0], [0], [1], [0, 0, 1, 1], [], []>} : vector<2x64xf32>, vector<64x128xf32>, vector<2x128xf32> -> vector<2x128xf32>
    %285 = vector.broadcast %11 : vector<1x128xf32> to vector<2x128xf32>
    %286 = arith.addf %284, %285 : vector<2x128xf32>
    %287 = arith.negf %286 : vector<2x128xf32>
    %288 = math.exp %287 : vector<2x128xf32>
    %cst_56 = arith.constant 1.000000e+00 : f32
    %289 = vector.broadcast %cst_56 : f32 to vector<2x128xf32>
    %290 = arith.addf %289, %288 : vector<2x128xf32>
    %291 = arith.divf %289, %290 : vector<2x128xf32>
    %292 = vector.extract_strided_slice %291 {offsets = [0, 0], sizes = [2, 32], strides = [1, 1]} : vector<2x128xf32> to vector<2x32xf32>
    %293 = vector.extract_strided_slice %291 {offsets = [0, 32], sizes = [2, 32], strides = [1, 1]} : vector<2x128xf32> to vector<2x32xf32>
    %294 = vector.extract_strided_slice %291 {offsets = [0, 96], sizes = [2, 32], strides = [1, 1]} : vector<2x128xf32> to vector<2x32xf32>
    %295 = vector.extract_strided_slice %286 {offsets = [0, 64], sizes = [2, 32], strides = [1, 1]} : vector<2x128xf32> to vector<2x32xf32>
    %296 = math.tanh %295 : vector<2x32xf32>
    %297 = arith.mulf %293, %224 : vector<2x32xf32>
    %298 = arith.mulf %292, %296 : vector<2x32xf32>
    %299 = arith.addf %297, %298 : vector<2x32xf32>
    %300 = math.tanh %299 : vector<2x32xf32>
    %301 = arith.mulf %294, %300 : vector<2x32xf32>
    %302 = tpu.concatenate %301, %245 in 1 : vector<2x32xf32>, vector<2x32xf32> -> vector<2x64xf32>
    %cst_57 = arith.constant dense<0.000000e+00> : vector<2x128xf32>
    %303 = tpu.matmul %302, %9, %cst_57 {dimension_numbers = #tpu.dot_dimension_numbers<[1], [0], [0], [1], [0, 0, 1, 1], [], []>} : vector<2x64xf32>, vector<64x128xf32>, vector<2x128xf32> -> vector<2x128xf32>
    %304 = vector.broadcast %12 : vector<1x128xf32> to vector<2x128xf32>
    %305 = arith.addf %303, %304 : vector<2x128xf32>
    %306 = arith.negf %305 : vector<2x128xf32>
    %307 = math.exp %306 : vector<2x128xf32>
    %cst_58 = arith.constant 1.000000e+00 : f32
    %308 = vector.broadcast %cst_58 : f32 to vector<2x128xf32>
    %309 = arith.addf %308, %307 : vector<2x128xf32>
    %310 = arith.divf %308, %309 : vector<2x128xf32>
    %311 = vector.extract_strided_slice %310 {offsets = [0, 0], sizes = [2, 32], strides = [1, 1]} : vector<2x128xf32> to vector<2x32xf32>
    %312 = vector.extract_strided_slice %310 {offsets = [0, 32], sizes = [2, 32], strides = [1, 1]} : vector<2x128xf32> to vector<2x32xf32>
    %313 = vector.extract_strided_slice %310 {offsets = [0, 96], sizes = [2, 32], strides = [1, 1]} : vector<2x128xf32> to vector<2x32xf32>
    %314 = vector.extract_strided_slice %305 {offsets = [0, 64], sizes = [2, 32], strides = [1, 1]} : vector<2x128xf32> to vector<2x32xf32>
    %315 = math.tanh %314 : vector<2x32xf32>
    %316 = arith.mulf %312, %243 : vector<2x32xf32>
    %317 = arith.mulf %311, %315 : vector<2x32xf32>
    %318 = arith.addf %316, %317 : vector<2x32xf32>
    %319 = math.tanh %318 : vector<2x32xf32>
    %320 = arith.mulf %313, %319 : vector<2x32xf32>
    %321 = vector.extract_strided_slice %5 {offsets = [8, 0], sizes = [2, 128], strides = [1, 1]} : vector<16x128xf32> to vector<2x128xf32>
    %cst_59 = arith.constant dense<0.000000e+00> : vector<2x128xf32>
    %322 = tpu.matmul %263, %6, %cst_59 {dimension_numbers = #tpu.dot_dimension_numbers<[1], [0], [0], [1], [0, 0, 1, 1], [], []>} : vector<2x32xf32>, vector<32x128xf32>, vector<2x128xf32> -> vector<2x128xf32>
    %323 = arith.addf %321, %322 : vector<2x128xf32>
    %324 = arith.negf %323 : vector<2x128xf32>
    %325 = math.exp %324 : vector<2x128xf32>
    %cst_60 = arith.constant 1.000000e+00 : f32
    %326 = vector.broadcast %cst_60 : f32 to vector<2x128xf32>
    %327 = arith.addf %326, %325 : vector<2x128xf32>
    %328 = arith.divf %326, %327 : vector<2x128xf32>
    %329 = vector.extract_strided_slice %328 {offsets = [0, 0], sizes = [2, 32], strides = [1, 1]} : vector<2x128xf32> to vector<2x32xf32>
    %330 = vector.extract_strided_slice %328 {offsets = [0, 32], sizes = [2, 32], strides = [1, 1]} : vector<2x128xf32> to vector<2x32xf32>
    %331 = vector.extract_strided_slice %328 {offsets = [0, 96], sizes = [2, 32], strides = [1, 1]} : vector<2x128xf32> to vector<2x32xf32>
    %332 = vector.extract_strided_slice %323 {offsets = [0, 64], sizes = [2, 32], strides = [1, 1]} : vector<2x128xf32> to vector<2x32xf32>
    %333 = math.tanh %332 : vector<2x32xf32>
    %334 = arith.mulf %330, %261 : vector<2x32xf32>
    %335 = arith.mulf %329, %333 : vector<2x32xf32>
    %336 = arith.addf %334, %335 : vector<2x32xf32>
    %337 = math.tanh %336 : vector<2x32xf32>
    %338 = arith.mulf %331, %337 : vector<2x32xf32>
    %339 = tpu.concatenate %338, %282 in 1 : vector<2x32xf32>, vector<2x32xf32> -> vector<2x64xf32>
    %cst_61 = arith.constant dense<0.000000e+00> : vector<2x128xf32>
    %340 = tpu.matmul %339, %7, %cst_61 {dimension_numbers = #tpu.dot_dimension_numbers<[1], [0], [0], [1], [0, 0, 1, 1], [], []>} : vector<2x64xf32>, vector<64x128xf32>, vector<2x128xf32> -> vector<2x128xf32>
    %341 = vector.broadcast %10 : vector<1x128xf32> to vector<2x128xf32>
    %342 = arith.addf %340, %341 : vector<2x128xf32>
    %343 = arith.negf %342 : vector<2x128xf32>
    %344 = math.exp %343 : vector<2x128xf32>
    %cst_62 = arith.constant 1.000000e+00 : f32
    %345 = vector.broadcast %cst_62 : f32 to vector<2x128xf32>
    %346 = arith.addf %345, %344 : vector<2x128xf32>
    %347 = arith.divf %345, %346 : vector<2x128xf32>
    %348 = vector.extract_strided_slice %347 {offsets = [0, 0], sizes = [2, 32], strides = [1, 1]} : vector<2x128xf32> to vector<2x32xf32>
    %349 = vector.extract_strided_slice %347 {offsets = [0, 32], sizes = [2, 32], strides = [1, 1]} : vector<2x128xf32> to vector<2x32xf32>
    %350 = vector.extract_strided_slice %347 {offsets = [0, 96], sizes = [2, 32], strides = [1, 1]} : vector<2x128xf32> to vector<2x32xf32>
    %351 = vector.extract_strided_slice %342 {offsets = [0, 64], sizes = [2, 32], strides = [1, 1]} : vector<2x128xf32> to vector<2x32xf32>
    %352 = math.tanh %351 : vector<2x32xf32>
    %353 = arith.mulf %349, %280 : vector<2x32xf32>
    %354 = arith.mulf %348, %352 : vector<2x32xf32>
    %355 = arith.addf %353, %354 : vector<2x32xf32>
    %356 = math.tanh %355 : vector<2x32xf32>
    %357 = arith.mulf %350, %356 : vector<2x32xf32>
    %358 = tpu.concatenate %357, %301 in 1 : vector<2x32xf32>, vector<2x32xf32> -> vector<2x64xf32>
    %cst_63 = arith.constant dense<0.000000e+00> : vector<2x128xf32>
    %359 = tpu.matmul %358, %8, %cst_63 {dimension_numbers = #tpu.dot_dimension_numbers<[1], [0], [0], [1], [0, 0, 1, 1], [], []>} : vector<2x64xf32>, vector<64x128xf32>, vector<2x128xf32> -> vector<2x128xf32>
    %360 = vector.broadcast %11 : vector<1x128xf32> to vector<2x128xf32>
    %361 = arith.addf %359, %360 : vector<2x128xf32>
    %362 = arith.negf %361 : vector<2x128xf32>
    %363 = math.exp %362 : vector<2x128xf32>
    %cst_64 = arith.constant 1.000000e+00 : f32
    %364 = vector.broadcast %cst_64 : f32 to vector<2x128xf32>
    %365 = arith.addf %364, %363 : vector<2x128xf32>
    %366 = arith.divf %364, %365 : vector<2x128xf32>
    %367 = vector.extract_strided_slice %366 {offsets = [0, 0], sizes = [2, 32], strides = [1, 1]} : vector<2x128xf32> to vector<2x32xf32>
    %368 = vector.extract_strided_slice %366 {offsets = [0, 32], sizes = [2, 32], strides = [1, 1]} : vector<2x128xf32> to vector<2x32xf32>
    %369 = vector.extract_strided_slice %366 {offsets = [0, 96], sizes = [2, 32], strides = [1, 1]} : vector<2x128xf32> to vector<2x32xf32>
    %370 = vector.extract_strided_slice %361 {offsets = [0, 64], sizes = [2, 32], strides = [1, 1]} : vector<2x128xf32> to vector<2x32xf32>
    %371 = math.tanh %370 : vector<2x32xf32>
    %372 = arith.mulf %368, %299 : vector<2x32xf32>
    %373 = arith.mulf %367, %371 : vector<2x32xf32>
    %374 = arith.addf %372, %373 : vector<2x32xf32>
    %375 = math.tanh %374 : vector<2x32xf32>
    %376 = arith.mulf %369, %375 : vector<2x32xf32>
    %377 = tpu.concatenate %376, %320 in 1 : vector<2x32xf32>, vector<2x32xf32> -> vector<2x64xf32>
    %cst_65 = arith.constant dense<0.000000e+00> : vector<2x128xf32>
    %378 = tpu.matmul %377, %9, %cst_65 {dimension_numbers = #tpu.dot_dimension_numbers<[1], [0], [0], [1], [0, 0, 1, 1], [], []>} : vector<2x64xf32>, vector<64x128xf32>, vector<2x128xf32> -> vector<2x128xf32>
    %379 = vector.broadcast %12 : vector<1x128xf32> to vector<2x128xf32>
    %380 = arith.addf %378, %379 : vector<2x128xf32>
    %381 = arith.negf %380 : vector<2x128xf32>
    %382 = math.exp %381 : vector<2x128xf32>
    %cst_66 = arith.constant 1.000000e+00 : f32
    %383 = vector.broadcast %cst_66 : f32 to vector<2x128xf32>
    %384 = arith.addf %383, %382 : vector<2x128xf32>
    %385 = arith.divf %383, %384 : vector<2x128xf32>
    %386 = vector.extract_strided_slice %385 {offsets = [0, 0], sizes = [2, 32], strides = [1, 1]} : vector<2x128xf32> to vector<2x32xf32>
    %387 = vector.extract_strided_slice %385 {offsets = [0, 32], sizes = [2, 32], strides = [1, 1]} : vector<2x128xf32> to vector<2x32xf32>
    %388 = vector.extract_strided_slice %385 {offsets = [0, 96], sizes = [2, 32], strides = [1, 1]} : vector<2x128xf32> to vector<2x32xf32>
    %389 = vector.extract_strided_slice %380 {offsets = [0, 64], sizes = [2, 32], strides = [1, 1]} : vector<2x128xf32> to vector<2x32xf32>
    %390 = math.tanh %389 : vector<2x32xf32>
    %391 = arith.mulf %387, %318 : vector<2x32xf32>
    %392 = arith.mulf %386, %390 : vector<2x32xf32>
    %393 = arith.addf %391, %392 : vector<2x32xf32>
    %394 = math.tanh %393 : vector<2x32xf32>
    %395 = arith.mulf %388, %394 : vector<2x32xf32>
    %396 = vector.extract_strided_slice %5 {offsets = [10, 0], sizes = [2, 128], strides = [1, 1]} : vector<16x128xf32> to vector<2x128xf32>
    %cst_67 = arith.constant dense<0.000000e+00> : vector<2x128xf32>
    %397 = tpu.matmul %338, %6, %cst_67 {dimension_numbers = #tpu.dot_dimension_numbers<[1], [0], [0], [1], [0, 0, 1, 1], [], []>} : vector<2x32xf32>, vector<32x128xf32>, vector<2x128xf32> -> vector<2x128xf32>
    %398 = arith.addf %396, %397 : vector<2x128xf32>
    %399 = arith.negf %398 : vector<2x128xf32>
    %400 = math.exp %399 : vector<2x128xf32>
    %cst_68 = arith.constant 1.000000e+00 : f32
    %401 = vector.broadcast %cst_68 : f32 to vector<2x128xf32>
    %402 = arith.addf %401, %400 : vector<2x128xf32>
    %403 = arith.divf %401, %402 : vector<2x128xf32>
    %404 = vector.extract_strided_slice %403 {offsets = [0, 0], sizes = [2, 32], strides = [1, 1]} : vector<2x128xf32> to vector<2x32xf32>
    %405 = vector.extract_strided_slice %403 {offsets = [0, 32], sizes = [2, 32], strides = [1, 1]} : vector<2x128xf32> to vector<2x32xf32>
    %406 = vector.extract_strided_slice %403 {offsets = [0, 96], sizes = [2, 32], strides = [1, 1]} : vector<2x128xf32> to vector<2x32xf32>
    %407 = vector.extract_strided_slice %398 {offsets = [0, 64], sizes = [2, 32], strides = [1, 1]} : vector<2x128xf32> to vector<2x32xf32>
    %408 = math.tanh %407 : vector<2x32xf32>
    %409 = arith.mulf %405, %336 : vector<2x32xf32>
    %410 = arith.mulf %404, %408 : vector<2x32xf32>
    %411 = arith.addf %409, %410 : vector<2x32xf32>
    %412 = math.tanh %411 : vector<2x32xf32>
    %413 = arith.mulf %406, %412 : vector<2x32xf32>
    %414 = tpu.concatenate %413, %357 in 1 : vector<2x32xf32>, vector<2x32xf32> -> vector<2x64xf32>
    %cst_69 = arith.constant dense<0.000000e+00> : vector<2x128xf32>
    %415 = tpu.matmul %414, %7, %cst_69 {dimension_numbers = #tpu.dot_dimension_numbers<[1], [0], [0], [1], [0, 0, 1, 1], [], []>} : vector<2x64xf32>, vector<64x128xf32>, vector<2x128xf32> -> vector<2x128xf32>
    %416 = vector.broadcast %10 : vector<1x128xf32> to vector<2x128xf32>
    %417 = arith.addf %415, %416 : vector<2x128xf32>
    %418 = arith.negf %417 : vector<2x128xf32>
    %419 = math.exp %418 : vector<2x128xf32>
    %cst_70 = arith.constant 1.000000e+00 : f32
    %420 = vector.broadcast %cst_70 : f32 to vector<2x128xf32>
    %421 = arith.addf %420, %419 : vector<2x128xf32>
    %422 = arith.divf %420, %421 : vector<2x128xf32>
    %423 = vector.extract_strided_slice %422 {offsets = [0, 0], sizes = [2, 32], strides = [1, 1]} : vector<2x128xf32> to vector<2x32xf32>
    %424 = vector.extract_strided_slice %422 {offsets = [0, 32], sizes = [2, 32], strides = [1, 1]} : vector<2x128xf32> to vector<2x32xf32>
    %425 = vector.extract_strided_slice %422 {offsets = [0, 96], sizes = [2, 32], strides = [1, 1]} : vector<2x128xf32> to vector<2x32xf32>
    %426 = vector.extract_strided_slice %417 {offsets = [0, 64], sizes = [2, 32], strides = [1, 1]} : vector<2x128xf32> to vector<2x32xf32>
    %427 = math.tanh %426 : vector<2x32xf32>
    %428 = arith.mulf %424, %355 : vector<2x32xf32>
    %429 = arith.mulf %423, %427 : vector<2x32xf32>
    %430 = arith.addf %428, %429 : vector<2x32xf32>
    %431 = math.tanh %430 : vector<2x32xf32>
    %432 = arith.mulf %425, %431 : vector<2x32xf32>
    %433 = tpu.concatenate %432, %376 in 1 : vector<2x32xf32>, vector<2x32xf32> -> vector<2x64xf32>
    %cst_71 = arith.constant dense<0.000000e+00> : vector<2x128xf32>
    %434 = tpu.matmul %433, %8, %cst_71 {dimension_numbers = #tpu.dot_dimension_numbers<[1], [0], [0], [1], [0, 0, 1, 1], [], []>} : vector<2x64xf32>, vector<64x128xf32>, vector<2x128xf32> -> vector<2x128xf32>
    %435 = vector.broadcast %11 : vector<1x128xf32> to vector<2x128xf32>
    %436 = arith.addf %434, %435 : vector<2x128xf32>
    %437 = arith.negf %436 : vector<2x128xf32>
    %438 = math.exp %437 : vector<2x128xf32>
    %cst_72 = arith.constant 1.000000e+00 : f32
    %439 = vector.broadcast %cst_72 : f32 to vector<2x128xf32>
    %440 = arith.addf %439, %438 : vector<2x128xf32>
    %441 = arith.divf %439, %440 : vector<2x128xf32>
    %442 = vector.extract_strided_slice %441 {offsets = [0, 0], sizes = [2, 32], strides = [1, 1]} : vector<2x128xf32> to vector<2x32xf32>
    %443 = vector.extract_strided_slice %441 {offsets = [0, 32], sizes = [2, 32], strides = [1, 1]} : vector<2x128xf32> to vector<2x32xf32>
    %444 = vector.extract_strided_slice %441 {offsets = [0, 96], sizes = [2, 32], strides = [1, 1]} : vector<2x128xf32> to vector<2x32xf32>
    %445 = vector.extract_strided_slice %436 {offsets = [0, 64], sizes = [2, 32], strides = [1, 1]} : vector<2x128xf32> to vector<2x32xf32>
    %446 = math.tanh %445 : vector<2x32xf32>
    %447 = arith.mulf %443, %374 : vector<2x32xf32>
    %448 = arith.mulf %442, %446 : vector<2x32xf32>
    %449 = arith.addf %447, %448 : vector<2x32xf32>
    %450 = math.tanh %449 : vector<2x32xf32>
    %451 = arith.mulf %444, %450 : vector<2x32xf32>
    %452 = tpu.concatenate %451, %395 in 1 : vector<2x32xf32>, vector<2x32xf32> -> vector<2x64xf32>
    %cst_73 = arith.constant dense<0.000000e+00> : vector<2x128xf32>
    %453 = tpu.matmul %452, %9, %cst_73 {dimension_numbers = #tpu.dot_dimension_numbers<[1], [0], [0], [1], [0, 0, 1, 1], [], []>} : vector<2x64xf32>, vector<64x128xf32>, vector<2x128xf32> -> vector<2x128xf32>
    %454 = vector.broadcast %12 : vector<1x128xf32> to vector<2x128xf32>
    %455 = arith.addf %453, %454 : vector<2x128xf32>
    %456 = arith.negf %455 : vector<2x128xf32>
    %457 = math.exp %456 : vector<2x128xf32>
    %cst_74 = arith.constant 1.000000e+00 : f32
    %458 = vector.broadcast %cst_74 : f32 to vector<2x128xf32>
    %459 = arith.addf %458, %457 : vector<2x128xf32>
    %460 = arith.divf %458, %459 : vector<2x128xf32>
    %461 = vector.extract_strided_slice %460 {offsets = [0, 0], sizes = [2, 32], strides = [1, 1]} : vector<2x128xf32> to vector<2x32xf32>
    %462 = vector.extract_strided_slice %460 {offsets = [0, 32], sizes = [2, 32], strides = [1, 1]} : vector<2x128xf32> to vector<2x32xf32>
    %463 = vector.extract_strided_slice %460 {offsets = [0, 96], sizes = [2, 32], strides = [1, 1]} : vector<2x128xf32> to vector<2x32xf32>
    %464 = vector.extract_strided_slice %455 {offsets = [0, 64], sizes = [2, 32], strides = [1, 1]} : vector<2x128xf32> to vector<2x32xf32>
    %465 = math.tanh %464 : vector<2x32xf32>
    %466 = arith.mulf %462, %393 : vector<2x32xf32>
    %467 = arith.mulf %461, %465 : vector<2x32xf32>
    %468 = arith.addf %466, %467 : vector<2x32xf32>
    %469 = math.tanh %468 : vector<2x32xf32>
    %470 = arith.mulf %463, %469 : vector<2x32xf32>
    %471 = vector.extract_strided_slice %5 {offsets = [12, 0], sizes = [2, 128], strides = [1, 1]} : vector<16x128xf32> to vector<2x128xf32>
    %cst_75 = arith.constant dense<0.000000e+00> : vector<2x128xf32>
    %472 = tpu.matmul %413, %6, %cst_75 {dimension_numbers = #tpu.dot_dimension_numbers<[1], [0], [0], [1], [0, 0, 1, 1], [], []>} : vector<2x32xf32>, vector<32x128xf32>, vector<2x128xf32> -> vector<2x128xf32>
    %473 = arith.addf %471, %472 : vector<2x128xf32>
    %474 = arith.negf %473 : vector<2x128xf32>
    %475 = math.exp %474 : vector<2x128xf32>
    %cst_76 = arith.constant 1.000000e+00 : f32
    %476 = vector.broadcast %cst_76 : f32 to vector<2x128xf32>
    %477 = arith.addf %476, %475 : vector<2x128xf32>
    %478 = arith.divf %476, %477 : vector<2x128xf32>
    %479 = vector.extract_strided_slice %478 {offsets = [0, 0], sizes = [2, 32], strides = [1, 1]} : vector<2x128xf32> to vector<2x32xf32>
    %480 = vector.extract_strided_slice %478 {offsets = [0, 32], sizes = [2, 32], strides = [1, 1]} : vector<2x128xf32> to vector<2x32xf32>
    %481 = vector.extract_strided_slice %478 {offsets = [0, 96], sizes = [2, 32], strides = [1, 1]} : vector<2x128xf32> to vector<2x32xf32>
    %482 = vector.extract_strided_slice %473 {offsets = [0, 64], sizes = [2, 32], strides = [1, 1]} : vector<2x128xf32> to vector<2x32xf32>
    %483 = math.tanh %482 : vector<2x32xf32>
    %484 = arith.mulf %480, %411 : vector<2x32xf32>
    %485 = arith.mulf %479, %483 : vector<2x32xf32>
    %486 = arith.addf %484, %485 : vector<2x32xf32>
    %487 = math.tanh %486 : vector<2x32xf32>
    %488 = arith.mulf %481, %487 : vector<2x32xf32>
    %489 = tpu.concatenate %488, %432 in 1 : vector<2x32xf32>, vector<2x32xf32> -> vector<2x64xf32>
    %cst_77 = arith.constant dense<0.000000e+00> : vector<2x128xf32>
    %490 = tpu.matmul %489, %7, %cst_77 {dimension_numbers = #tpu.dot_dimension_numbers<[1], [0], [0], [1], [0, 0, 1, 1], [], []>} : vector<2x64xf32>, vector<64x128xf32>, vector<2x128xf32> -> vector<2x128xf32>
    %491 = vector.broadcast %10 : vector<1x128xf32> to vector<2x128xf32>
    %492 = arith.addf %490, %491 : vector<2x128xf32>
    %493 = arith.negf %492 : vector<2x128xf32>
    %494 = math.exp %493 : vector<2x128xf32>
    %cst_78 = arith.constant 1.000000e+00 : f32
    %495 = vector.broadcast %cst_78 : f32 to vector<2x128xf32>
    %496 = arith.addf %495, %494 : vector<2x128xf32>
    %497 = arith.divf %495, %496 : vector<2x128xf32>
    %498 = vector.extract_strided_slice %497 {offsets = [0, 0], sizes = [2, 32], strides = [1, 1]} : vector<2x128xf32> to vector<2x32xf32>
    %499 = vector.extract_strided_slice %497 {offsets = [0, 32], sizes = [2, 32], strides = [1, 1]} : vector<2x128xf32> to vector<2x32xf32>
    %500 = vector.extract_strided_slice %497 {offsets = [0, 96], sizes = [2, 32], strides = [1, 1]} : vector<2x128xf32> to vector<2x32xf32>
    %501 = vector.extract_strided_slice %492 {offsets = [0, 64], sizes = [2, 32], strides = [1, 1]} : vector<2x128xf32> to vector<2x32xf32>
    %502 = math.tanh %501 : vector<2x32xf32>
    %503 = arith.mulf %499, %430 : vector<2x32xf32>
    %504 = arith.mulf %498, %502 : vector<2x32xf32>
    %505 = arith.addf %503, %504 : vector<2x32xf32>
    %506 = math.tanh %505 : vector<2x32xf32>
    %507 = arith.mulf %500, %506 : vector<2x32xf32>
    %508 = tpu.concatenate %507, %451 in 1 : vector<2x32xf32>, vector<2x32xf32> -> vector<2x64xf32>
    %cst_79 = arith.constant dense<0.000000e+00> : vector<2x128xf32>
    %509 = tpu.matmul %508, %8, %cst_79 {dimension_numbers = #tpu.dot_dimension_numbers<[1], [0], [0], [1], [0, 0, 1, 1], [], []>} : vector<2x64xf32>, vector<64x128xf32>, vector<2x128xf32> -> vector<2x128xf32>
    %510 = vector.broadcast %11 : vector<1x128xf32> to vector<2x128xf32>
    %511 = arith.addf %509, %510 : vector<2x128xf32>
    %512 = arith.negf %511 : vector<2x128xf32>
    %513 = math.exp %512 : vector<2x128xf32>
    %cst_80 = arith.constant 1.000000e+00 : f32
    %514 = vector.broadcast %cst_80 : f32 to vector<2x128xf32>
    %515 = arith.addf %514, %513 : vector<2x128xf32>
    %516 = arith.divf %514, %515 : vector<2x128xf32>
    %517 = vector.extract_strided_slice %516 {offsets = [0, 0], sizes = [2, 32], strides = [1, 1]} : vector<2x128xf32> to vector<2x32xf32>
    %518 = vector.extract_strided_slice %516 {offsets = [0, 32], sizes = [2, 32], strides = [1, 1]} : vector<2x128xf32> to vector<2x32xf32>
    %519 = vector.extract_strided_slice %516 {offsets = [0, 96], sizes = [2, 32], strides = [1, 1]} : vector<2x128xf32> to vector<2x32xf32>
    %520 = vector.extract_strided_slice %511 {offsets = [0, 64], sizes = [2, 32], strides = [1, 1]} : vector<2x128xf32> to vector<2x32xf32>
    %521 = math.tanh %520 : vector<2x32xf32>
    %522 = arith.mulf %518, %449 : vector<2x32xf32>
    %523 = arith.mulf %517, %521 : vector<2x32xf32>
    %524 = arith.addf %522, %523 : vector<2x32xf32>
    %525 = math.tanh %524 : vector<2x32xf32>
    %526 = arith.mulf %519, %525 : vector<2x32xf32>
    %527 = tpu.concatenate %526, %470 in 1 : vector<2x32xf32>, vector<2x32xf32> -> vector<2x64xf32>
    %cst_81 = arith.constant dense<0.000000e+00> : vector<2x128xf32>
    %528 = tpu.matmul %527, %9, %cst_81 {dimension_numbers = #tpu.dot_dimension_numbers<[1], [0], [0], [1], [0, 0, 1, 1], [], []>} : vector<2x64xf32>, vector<64x128xf32>, vector<2x128xf32> -> vector<2x128xf32>
    %529 = vector.broadcast %12 : vector<1x128xf32> to vector<2x128xf32>
    %530 = arith.addf %528, %529 : vector<2x128xf32>
    %531 = arith.negf %530 : vector<2x128xf32>
    %532 = math.exp %531 : vector<2x128xf32>
    %cst_82 = arith.constant 1.000000e+00 : f32
    %533 = vector.broadcast %cst_82 : f32 to vector<2x128xf32>
    %534 = arith.addf %533, %532 : vector<2x128xf32>
    %535 = arith.divf %533, %534 : vector<2x128xf32>
    %536 = vector.extract_strided_slice %535 {offsets = [0, 0], sizes = [2, 32], strides = [1, 1]} : vector<2x128xf32> to vector<2x32xf32>
    %537 = vector.extract_strided_slice %535 {offsets = [0, 32], sizes = [2, 32], strides = [1, 1]} : vector<2x128xf32> to vector<2x32xf32>
    %538 = vector.extract_strided_slice %535 {offsets = [0, 96], sizes = [2, 32], strides = [1, 1]} : vector<2x128xf32> to vector<2x32xf32>
    %539 = vector.extract_strided_slice %530 {offsets = [0, 64], sizes = [2, 32], strides = [1, 1]} : vector<2x128xf32> to vector<2x32xf32>
    %540 = math.tanh %539 : vector<2x32xf32>
    %541 = arith.mulf %537, %468 : vector<2x32xf32>
    %542 = arith.mulf %536, %540 : vector<2x32xf32>
    %543 = arith.addf %541, %542 : vector<2x32xf32>
    %544 = math.tanh %543 : vector<2x32xf32>
    %545 = arith.mulf %538, %544 : vector<2x32xf32>
    %546 = vector.extract_strided_slice %5 {offsets = [14, 0], sizes = [2, 128], strides = [1, 1]} : vector<16x128xf32> to vector<2x128xf32>
    %cst_83 = arith.constant dense<0.000000e+00> : vector<2x128xf32>
    %547 = tpu.matmul %488, %6, %cst_83 {dimension_numbers = #tpu.dot_dimension_numbers<[1], [0], [0], [1], [0, 0, 1, 1], [], []>} : vector<2x32xf32>, vector<32x128xf32>, vector<2x128xf32> -> vector<2x128xf32>
    %548 = arith.addf %546, %547 : vector<2x128xf32>
    %549 = arith.negf %548 : vector<2x128xf32>
    %550 = math.exp %549 : vector<2x128xf32>
    %cst_84 = arith.constant 1.000000e+00 : f32
    %551 = vector.broadcast %cst_84 : f32 to vector<2x128xf32>
    %552 = arith.addf %551, %550 : vector<2x128xf32>
    %553 = arith.divf %551, %552 : vector<2x128xf32>
    %554 = vector.extract_strided_slice %553 {offsets = [0, 0], sizes = [2, 32], strides = [1, 1]} : vector<2x128xf32> to vector<2x32xf32>
    %555 = vector.extract_strided_slice %553 {offsets = [0, 32], sizes = [2, 32], strides = [1, 1]} : vector<2x128xf32> to vector<2x32xf32>
    %556 = vector.extract_strided_slice %553 {offsets = [0, 96], sizes = [2, 32], strides = [1, 1]} : vector<2x128xf32> to vector<2x32xf32>
    %557 = vector.extract_strided_slice %548 {offsets = [0, 64], sizes = [2, 32], strides = [1, 1]} : vector<2x128xf32> to vector<2x32xf32>
    %558 = math.tanh %557 : vector<2x32xf32>
    %559 = arith.mulf %555, %486 : vector<2x32xf32>
    %560 = arith.mulf %554, %558 : vector<2x32xf32>
    %561 = arith.addf %559, %560 : vector<2x32xf32>
    %562 = math.tanh %561 : vector<2x32xf32>
    %563 = arith.mulf %556, %562 : vector<2x32xf32>
    %564 = tpu.concatenate %563, %507 in 1 : vector<2x32xf32>, vector<2x32xf32> -> vector<2x64xf32>
    %cst_85 = arith.constant dense<0.000000e+00> : vector<2x128xf32>
    %565 = tpu.matmul %564, %7, %cst_85 {dimension_numbers = #tpu.dot_dimension_numbers<[1], [0], [0], [1], [0, 0, 1, 1], [], []>} : vector<2x64xf32>, vector<64x128xf32>, vector<2x128xf32> -> vector<2x128xf32>
    %566 = vector.broadcast %10 : vector<1x128xf32> to vector<2x128xf32>
    %567 = arith.addf %565, %566 : vector<2x128xf32>
    %568 = arith.negf %567 : vector<2x128xf32>
    %569 = math.exp %568 : vector<2x128xf32>
    %cst_86 = arith.constant 1.000000e+00 : f32
    %570 = vector.broadcast %cst_86 : f32 to vector<2x128xf32>
    %571 = arith.addf %570, %569 : vector<2x128xf32>
    %572 = arith.divf %570, %571 : vector<2x128xf32>
    %573 = vector.extract_strided_slice %572 {offsets = [0, 0], sizes = [2, 32], strides = [1, 1]} : vector<2x128xf32> to vector<2x32xf32>
    %574 = vector.extract_strided_slice %572 {offsets = [0, 32], sizes = [2, 32], strides = [1, 1]} : vector<2x128xf32> to vector<2x32xf32>
    %575 = vector.extract_strided_slice %572 {offsets = [0, 96], sizes = [2, 32], strides = [1, 1]} : vector<2x128xf32> to vector<2x32xf32>
    %576 = vector.extract_strided_slice %567 {offsets = [0, 64], sizes = [2, 32], strides = [1, 1]} : vector<2x128xf32> to vector<2x32xf32>
    %577 = math.tanh %576 : vector<2x32xf32>
    %578 = arith.mulf %574, %505 : vector<2x32xf32>
    %579 = arith.mulf %573, %577 : vector<2x32xf32>
    %580 = arith.addf %578, %579 : vector<2x32xf32>
    %581 = math.tanh %580 : vector<2x32xf32>
    %582 = arith.mulf %575, %581 : vector<2x32xf32>
    %583 = tpu.concatenate %582, %526 in 1 : vector<2x32xf32>, vector<2x32xf32> -> vector<2x64xf32>
    %cst_87 = arith.constant dense<0.000000e+00> : vector<2x128xf32>
    %584 = tpu.matmul %583, %8, %cst_87 {dimension_numbers = #tpu.dot_dimension_numbers<[1], [0], [0], [1], [0, 0, 1, 1], [], []>} : vector<2x64xf32>, vector<64x128xf32>, vector<2x128xf32> -> vector<2x128xf32>
    %585 = vector.broadcast %11 : vector<1x128xf32> to vector<2x128xf32>
    %586 = arith.addf %584, %585 : vector<2x128xf32>
    %587 = arith.negf %586 : vector<2x128xf32>
    %588 = math.exp %587 : vector<2x128xf32>
    %cst_88 = arith.constant 1.000000e+00 : f32
    %589 = vector.broadcast %cst_88 : f32 to vector<2x128xf32>
    %590 = arith.addf %589, %588 : vector<2x128xf32>
    %591 = arith.divf %589, %590 : vector<2x128xf32>
    %592 = vector.extract_strided_slice %591 {offsets = [0, 0], sizes = [2, 32], strides = [1, 1]} : vector<2x128xf32> to vector<2x32xf32>
    %593 = vector.extract_strided_slice %591 {offsets = [0, 32], sizes = [2, 32], strides = [1, 1]} : vector<2x128xf32> to vector<2x32xf32>
    %594 = vector.extract_strided_slice %591 {offsets = [0, 96], sizes = [2, 32], strides = [1, 1]} : vector<2x128xf32> to vector<2x32xf32>
    %595 = vector.extract_strided_slice %586 {offsets = [0, 64], sizes = [2, 32], strides = [1, 1]} : vector<2x128xf32> to vector<2x32xf32>
    %596 = math.tanh %595 : vector<2x32xf32>
    %597 = arith.mulf %593, %524 : vector<2x32xf32>
    %598 = arith.mulf %592, %596 : vector<2x32xf32>
    %599 = arith.addf %597, %598 : vector<2x32xf32>
    %600 = math.tanh %599 : vector<2x32xf32>
    %601 = arith.mulf %594, %600 : vector<2x32xf32>
    %602 = tpu.concatenate %601, %545 in 1 : vector<2x32xf32>, vector<2x32xf32> -> vector<2x64xf32>
    %cst_89 = arith.constant dense<0.000000e+00> : vector<2x128xf32>
    %603 = tpu.matmul %602, %9, %cst_89 {dimension_numbers = #tpu.dot_dimension_numbers<[1], [0], [0], [1], [0, 0, 1, 1], [], []>} : vector<2x64xf32>, vector<64x128xf32>, vector<2x128xf32> -> vector<2x128xf32>
    %604 = vector.broadcast %12 : vector<1x128xf32> to vector<2x128xf32>
    %605 = arith.addf %603, %604 : vector<2x128xf32>
    %606 = arith.negf %605 : vector<2x128xf32>
    %607 = math.exp %606 : vector<2x128xf32>
    %cst_90 = arith.constant 1.000000e+00 : f32
    %608 = vector.broadcast %cst_90 : f32 to vector<2x128xf32>
    %609 = arith.addf %608, %607 : vector<2x128xf32>
    %610 = arith.divf %608, %609 : vector<2x128xf32>
    %611 = vector.extract_strided_slice %610 {offsets = [0, 0], sizes = [2, 32], strides = [1, 1]} : vector<2x128xf32> to vector<2x32xf32>
    %612 = vector.extract_strided_slice %610 {offsets = [0, 32], sizes = [2, 32], strides = [1, 1]} : vector<2x128xf32> to vector<2x32xf32>
    %613 = vector.extract_strided_slice %610 {offsets = [0, 96], sizes = [2, 32], strides = [1, 1]} : vector<2x128xf32> to vector<2x32xf32>
    %614 = vector.extract_strided_slice %605 {offsets = [0, 64], sizes = [2, 32], strides = [1, 1]} : vector<2x128xf32> to vector<2x32xf32>
    %615 = math.tanh %614 : vector<2x32xf32>
    %616 = arith.mulf %612, %543 : vector<2x32xf32>
    %617 = arith.mulf %611, %615 : vector<2x32xf32>
    %618 = arith.addf %616, %617 : vector<2x32xf32>
    %619 = math.tanh %618 : vector<2x32xf32>
    %620 = arith.mulf %613, %619 : vector<2x32xf32>
    %c0_91 = arith.constant 0 : index
    %c0_92 = arith.constant 0 : index
    %621 = vector.load %arg10[%c0_91, %c0_92] : memref<32x1xf32, #tpu.memory_space<vmem>>, vector<32x1xf32>
    %cst_93 = arith.constant dense<0.000000e+00> : vector<2x1xf32>
    %622 = tpu.matmul %620, %621, %cst_93 {dimension_numbers = #tpu.dot_dimension_numbers<[1], [0], [0], [1], [0, 0, 1, 1], [], []>} : vector<2x32xf32>, vector<32x1xf32>, vector<2x1xf32> -> vector<2x1xf32>
    %c0_94 = arith.constant 0 : index
    %c0_95 = arith.constant 0 : index
    %623 = vector.load %arg11[%c0_94, %c0_95] : memref<1x1xf32, #tpu.memory_space<vmem>>, vector<1x1xf32>
    %624 = vector.broadcast %623 : vector<1x1xf32> to vector<2x1xf32>
    %625 = arith.addf %622, %624 : vector<2x1xf32>
    %c0_96 = arith.constant 0 : index
    %c0_97 = arith.constant 0 : index
    %626 = vector.load %arg12[%c0_96, %c0_97] : memref<2x1xf32, #tpu.memory_space<vmem>>, vector<2x1xf32>
    tpu.vector_store %arg12[%c0_96, %c0_97], %625 {strides = array<i32>} : memref<2x1xf32, #tpu.memory_space<vmem>>, vector<2x1xf32>,
    return
  }
}

</mosaic_0001>

<bundles_post_ra>
// kernel: conv_perf_predictor.1
= control target key start
LH: loop header
LB: loop body
LE: loop exit
PB: predicated region body
PF: predicated region fallthrough
CT: control target
= control target key end

     0   :  { %s6194_s0 = inlined_call_operand.vmem [shape: f32[16,16], index: 0, kind: input, shape index: {}]   ;;  %s6195_s1 = inlined_call_operand.vmem [shape: f32[16,128], index: 1, kind: input, shape index: {}]   ;;  %s6196_s2 = inlined_call_operand.hbm [shape: f32[32,128], index: 2, kind: input, shape index: {}]   ;;  %s6197_s3 = inlined_call_operand.vmem [shape: f32[1,128], index: 3, kind: input, shape index: {}]   ;;  %s6198_s4 = inlined_call_operand.vmem [shape: f32[64,128], index: 4, kind: input, shape index: {}]   ;;  %s6199_s5 = inlined_call_operand.vmem [shape: f32[1,128], index: 5, kind: input, shape index: {}]   ;;  %s6200_s6 = inlined_call_operand.hbm [shape: f32[64,128], index: 6, kind: input, shape index: {}]   ;;  %s6201_s7 = inlined_call_operand.vmem [shape: f32[1,128], index: 7, kind: input, shape index: {}]   ;;  %s6202_s8 = inlined_call_operand.hbm [shape: f32[64,128], index: 8, kind: input, shape index: {}]   ;;  %s6203_s9 = inlined_call_operand.vmem [shape: f32[1,128], index: 9, kind: input, shape index: {}]   ;;  %s6204_s10 = inlined_call_operand.vmem [shape: f32[32,1], index: 10, kind: input, shape index: {}]   ;;  %s6205_s11 = inlined_call_operand.<no memory space> [shape: f32[1,1], index: 11, kind: input, shape index: {}]   ;;  %s6206_s12 = inlined_call_operand.vmem [shape: f32[2,1], index: 12, kind: output, shape index: {}]  }
   0x1   :  { %v17_v0 = vstv %s6205_s11 }
   0x2   :  { %18 = vst [vmem:[#allocation2] sm:$0x1] %v17_v0 }
   0x3   :  { %19 = vsyncpa [#allocation4], 0 }
   0x4   :  { %20 = vsyncpa [#allocation6], 0  ;;  %s5266_s23 = smov [#allocation5]   ;;  %s5267_s25 = smov [#allocation3]  }
   0x5   :  { %s48_s24 = sshll.u32 %s5266_s23, 4  ;;  %s30_s26 = sshll.u32 %s5267_s25, 4  ;;  %s49_s24 = int_to_ptr.vmem [resolvable:$true] %s48_s24  ;;  %s5344_s26 = int_to_ptr.vmem [resolvable:$true] %s30_s26 }
   0x6   :  { %s5196_s29 = scalar_lea.hbm %s6200_s6, 1024 }
   0x7   :  { %p5197_p0 = scmp.ne.s32.totalorder %s6200_s6, %s5196_s29  ;;  %p5200_p1 = scmp.lt.u32.totalorder %s5196_s29, %s6200_s6 }
   0x9   :  { %p5202_p2 = pnand %p5200_p1, %p5197_p0 }
   0xb   :  { %5205 = shalt.err (!%p5202_p2)
}
   0xc   :  { %s5206_s15 = scalar_lea.vmem %s49_s24, 1024  ;;  %p5211_p4 = scmp.lt.s32.totalorder %s49_s24, %s49_s24 }
   0xd   :  { %p5207_p3 = scmp.ne.s32.totalorder %s49_s24, %s5206_s15  ;;  %p5212_p5 = scmp.lt.s32.totalorder %s5206_s15, %s5206_s15 }
   0xf   :  { %p5213_p6 = por %p5212_p5, %p5211_p4 }
  0x11   :  { %p5214_p7 = pnand %p5213_p6, %p5207_p3 }
  0x13   :  { %5217 = shalt.err (!%p5214_p7)
}
  0x14   :  { %s5268_s16 = smov 128   ;;  %s5269_s17 = smov 8  }
  0x15   :  { %54 = dma.hbm_to_vmem [thread:$0]  %s6200_s6, 1024, %s49_s24, [#allocation6], %s5268_s16, %s5268_s16, %s5269_s17  }
  0x16   :  { %s5218_s22 = scalar_lea.hbm %s6196_s2, 512 }
  0x17   :  { %p5219_p8 = scmp.ne.s32.totalorder %s6196_s2, %s5218_s22  ;;  %p5222_p9 = scmp.lt.u32.totalorder %s5218_s22, %s6196_s2 }
  0x19   :  { %p5224_p10 = pnand %p5222_p9, %p5219_p8 }
  0x1b   :  { %5227 = shalt.err (!%p5224_p10)
}
  0x1c   :  { %s5228_s29 = scalar_lea.vmem %s5344_s26, 512  ;;  %p5233_p12 = scmp.lt.s32.totalorder %s5344_s26, %s5344_s26 }
  0x1d   :  { %p5229_p11 = scmp.ne.s32.totalorder %s5344_s26, %s5228_s29  ;;  %p5234_p13 = scmp.lt.s32.totalorder %s5228_s29, %s5228_s29 }
  0x1f   :  { %p5235_p0 = por %p5234_p13, %p5233_p12 }
  0x21   :  { %p5236_p1 = pnand %p5235_p0, %p5229_p11 }
  0x23   :  { %5239 = shalt.err (!%p5236_p1)
}
  0x24   :  { %36 = dma.hbm_to_vmem [thread:$0]  %s6196_s2, 512, %s5344_s26, [#allocation4], %s5268_s16, %s5268_s16, %s5269_s17  }
  0x25   :  { %s5270_s30 = smov [#allocation7]   ;;  %s5240_s15 = scalar_lea.hbm %s6202_s8, 1024 }
  0x26   :  { %s62_s13 = sshll.u32 %s5270_s30, 4  ;;  %p5241_p2 = scmp.ne.s32.totalorder %s6202_s8, %s5240_s15  ;;  %s63_s13 = int_to_ptr.vmem [resolvable:$true] %s62_s13 }
  0x27   :  { %p5244_p3 = scmp.lt.u32.totalorder %s5240_s15, %s6202_s8 }
  0x29   :  { %p5246_p4 = pnand %p5244_p3, %p5241_p2 }
  0x2b   :  { %5249 = shalt.err (!%p5246_p4)
}
  0x2c   :  { %s5250_s22 = scalar_lea.vmem %s63_s13, 1024  ;;  %p5255_p6 = scmp.lt.s32.totalorder %s63_s13, %s63_s13 }
  0x2d   :  { %p5251_p5 = scmp.ne.s32.totalorder %s63_s13, %s5250_s22  ;;  %p5256_p7 = scmp.lt.s32.totalorder %s5250_s22, %s5250_s22 }
  0x2f   :  { %p5257_p8 = por %p5256_p7, %p5255_p6 }
  0x31   :  { %p5258_p9 = pnand %p5257_p8, %p5251_p5 }
  0x33   :  { %5261 = shalt.err (!%p5258_p9)
}
  0x34   :  { %68 = dma.hbm_to_vmem [thread:$0]  %s6202_s8, 1024, %s63_s13, [#allocation6], %s5268_s16, %s5268_s16, %s5269_s17  }
  0x35   :  { %5262 = dma.done.wait [#allocation4], 512  }
  0x36   :  { %5263 = vsyncadd [#allocation4], 4294966784 }
  0x37   :  { %5264 = dma.done.wait [#allocation6], 2048  }
  0x38   :  { %5265 = vsyncadd [#allocation6], 4294965248  ;;  %v5271_v1 = vmov 0.0|0.0   ;;  %vm5272_vm0 = vmmov 0   ;;  %v5273_v2 = vmov 0.0   ;;  %vm95_vm1 = vcmask 130048  }
  0x39   :  { %4585 = vmatprep.subr.bf16.mxu1 %v5271_v1  ;;  %4034 = vmatprep.mubr.msk.f32.mxu1 %vm5272_vm0, %v5273_v2  ;;  %v86_v3 = vld [vmem:[%s6195_s1] sm:$0xff]  ;;  %v87_v4 = vld [vmem:[%s6195_s1 + $0x8] sm:$0xff]  ;;  %v179_v10 = vld [vmem:[#allocation3 + $0x10] sm:$0xff]  ;;  %s5274_s6 = smov 64   ;;  %vm208_vm2 = vcmask 261120   ;;  %vm318_vm3 = vcmask 523264  }
  0x3a   :  { %v177_v5 = vld [vmem:[#allocation3] sm:$0xff]  ;;  %v4581_v6 = vpack.c.bf16 %v87_v4, %v86_v3  ;;  %v178_v7 = vld [vmem:[#allocation3 + $0x8] sm:$0xff]  ;;  %v180_v11 = vld [vmem:[#allocation3 + $0x18] sm:$0xff]  ;;  %vm3675_vm4 = vcmask 1024  }
  0x3b   :  { %v84_v8 = vld [vmem:[%s6194_s0] sm:$0xff]  ;;  %v5408_v9 = vpack.c.bf16 %v178_v7, %v177_v5  ;;  %v85_v12 = vld [vmem:[%s6194_s0 + $0x8] sm:$0xff]  ;;  %v5415_v13 = vpack.c.bf16 %v180_v11, %v179_v10  ;;  %v183_v34 = vld [vmem:[%s6198_s4 + $0x10] sm:$0xff] }
  0x3c   :  { %4023 = vmatprep.mubr.msk.f32.mxu0 %vm95_vm1, %v84_v8  ;;  %4582 = vmatprep.subr.bf16.mxu0 %v4581_v6  ;;  %v3683_v14 = vld [vmem:[%s6197_s3] ss:$0 sm:$0xff]  ;;  %s5275_s3 = smov 32   ;;  %v182_v33 = vld [vmem:[%s6198_s4 + $0x8] sm:$0xff]  ;;  %v184_v36 = vld [vmem:[%s6198_s4 + $0x18] sm:$0xff] }
  0x3d   :  { %4587 = vmatpush3.bf16.msra.mxu1 %v5408_v9  ;;  %4584 = vmatpush3.bf16.msra.mxu0 %v4581_v6  ;;  %v181_v32 = vld [vmem:[%s6198_s4] sm:$0xff]  ;;  %v5455_v37 = vpack.c.bf16 %v184_v36, %v183_v34  ;;  %v186_v39 = vld [vmem:[%s6198_s4 + $0x28] sm:$0xff]  ;;  %v187_v41 = vld [vmem:[%s6198_s4 + $0x30] sm:$0xff] }
  0x3e   :  { %4588 = vmatprep.subr.bf16.mxu1 %v5271_v1  ;;  %4591 = vmatprep.subr.bf16.mxu0 %v5271_v1  ;;  %v5449_v35 = vpack.c.bf16 %v182_v33, %v181_v32  ;;  %v185_v38 = vld [vmem:[%s6198_s4 + $0x20] sm:$0xff]  ;;  %v188_v42 = vld [vmem:[%s6198_s4 + $0x38] sm:$0xff]  ;;  %v190_v0 = vld [vmem:[#allocation5 + $0x8] sm:$0xff] }
  0x3f   :  { %v5465_v40 = vpack.c.bf16 %v186_v39, %v185_v38  ;;  %v5476_v44 = vpack.c.bf16 %v188_v42, %v187_v41  ;;  %v5489_v49 = vld [vmem:[%s6199_s5] ss:$0 sm:$0xff]  ;;  %v189_v63 = vld [vmem:[#allocation5] sm:$0xff]  ;;  %v191_v3 = vld [vmem:[#allocation5 + $0x10] sm:$0xff] }
  0x40   :  { %4024 = vmatmul.mubr.msk.f32.vlgmr.msra.gmra.mrb[0].mxu0 %vm95_vm1, %v85_v12  ;;  %v5497_v4 = vpack.c.bf16 %v190_v0, %v189_v63  ;;  %v192_v5 = vld [vmem:[#allocation5 + $0x18] sm:$0xff]  ;;  %v193_v7 = vld [vmem:[#allocation5 + $0x20] sm:$0xff]  ;;  %v194_v8 = vld [vmem:[#allocation5 + $0x28] sm:$0xff] }
  0x41   :  { %4590 = vmatpush3.bf16.msra.mxu1 %v5415_v13  ;;  %4053 = vmatprep.mubr.msk.f32.mxu0 %vm5272_vm0, %v5273_v2  ;;  %v5500_v6 = vpack.c.bf16 %v192_v5, %v191_v3  ;;  %v5504_v10 = vpack.c.bf16 %v194_v8, %v193_v7  ;;  %v195_v11 = vld [vmem:[#allocation5 + $0x30] sm:$0xff]  ;;  %v196_v12 = vld [vmem:[#allocation5 + $0x38] sm:$0xff] }
  0x42   :  { %4603 = vmatprep.subr.bf16.mxu1 %v5271_v1  ;;  %4593 = vmatpush3.bf16.msra.mxu0 %v5449_v35 }
  0x43   :  { %4594 = vmatprep.subr.bf16.mxu0 %v5271_v1 }
  0x44   :  { %4035 = vmatmul.mubr.f32.vlgmr.msra.gmra.mrb[0].mxu1 %v5273_v2 }
  0x45   :  { %4072 = vmatprep.mubr.msk.f32.mxu1 %vm5272_vm0, %v5273_v2  ;;  %4605 = vmatpush3.bf16.msra.mxu1 %v5497_v4 }
  0x46   :  { %4596 = vmatpush3.bf16.msra.mxu0 %v5455_v37  ;;  %4606 = vmatprep.subr.bf16.mxu1 %v5271_v1 }
  0x47   :  { %4597 = vmatprep.subr.bf16.mxu0 %v5271_v1 }
  0x49   :  { %4608 = vmatpush3.bf16.msra.mxu1 %v5500_v6 }
  0x4a   :  { %4599 = vmatpush3.bf16.msra.mxu0 %v5465_v40  ;;  %4609 = vmatprep.subr.bf16.mxu1 %v5271_v1 }
  0x4b   :  { %4600 = vmatprep.subr.bf16.mxu0 %v5271_v1 }
  0x4d   :  { %4611 = vmatpush3.bf16.msra.mxu1 %v5504_v10 }
  0x4e   :  { %4602 = vmatpush3.bf16.msra.mxu0 %v5476_v44  ;;  %4612 = vmatprep.subr.bf16.mxu1 %v5271_v1 }
  0x4f   :  { %4615 = vmatprep.subr.bf16.mxu0 %v5271_v1 }
 0x113   :  { %v4025_v15 = vpop.f32.mrb[0].mxu0 }
 0x114   :  { %v5430_v16 = vadd.f32 %v4025_v15, %v3683_v14  ;;  %v168_v17 = vpop.f32.mrb[1].mxu0  ;;  %v5509_v15 = vpack.c.bf16 %v196_v12, %v195_v11  ;;  %v197_v11 = vld [vmem:[#allocation7] sm:$0xff]  ;;  %v198_v12 = vld [vmem:[#allocation7 + $0x8] sm:$0xff] }
 0x115   :  { %v5432_v18 = vadd.f32 %v3683_v14, %v168_v17 }
 0x116   :  { %4614 = vmatpush3.bf16.msra.mxu1 %v5509_v15 }
 0x117   :  { %v278_v19 = vpop.f32.mrb[0].mxu1  ;;  %4627 = vmatprep.subr.bf16.mxu1 %v5271_v1 }
 0x118   :  { %v282_v20 = vadd.f32 %v278_v19, %v5432_v18  ;;  %v4036_v21 = vpop.f32.mrb[1].mxu1 }
 0x11a   :  { %4937 = vtanh.f32 %v282_v20  ;;  %v3686_v23 = vmul.f32 -1.442695, %v282_v20 }
 0x11c   :  { %4939 = vpow2.f32 %v3686_v23 }
 0x124   :  { %v4938_v22 = vpop.eup %4937 }
 0x125   :  { %292 = vrot.lane.b32.xlu0 %v4938_v22, %s5274_s6 }
 0x126   :  { %v4940_v24 = vpop.eup %4939 }
 0x127   :  { %v286_v25 = vadd.f32 1.0, %v4940_v24 }
 0x129   :  { %4941 = vrcp.f32 %v286_v25 }
 0x133   :  { %v4942_v26 = vpop.eup %4941 }
 0x134   :  { %v290_v29 = vmul.f32 0.0, %v4942_v26 }
 0x197   :  { %v293_v27 = vpop.permute.xlu0 %292 }
 0x198   :  { %v295_v28 = vmul.f32 %v4942_v26, %v293_v27 }
 0x19a   :  { %297 = vrot.lane.b32.xlu0 %v295_v28, %s5275_s3 }
 0x20c   :  { %v298_v30 = vpop.permute.xlu0 %297 }
 0x20d   :  { %v5437_v31 = vadd.f32 %v298_v30, %v290_v29 }
 0x20f   :  { %4943 = vtanh.f32 %v5437_v31  ;;  %v716_v38 = vrot.slane %v5437_v31, 6 }
 0x219   :  { %v4944_v43 = vpop.eup %4943 }
 0x21a   :  { %303 = vrot.lane.b32.xlu1 %v4944_v43, %s5274_s6 }
 0x28c   :  { %v304_v45 = vpop.permute.xlu1 %303 }
 0x28d   :  { %v306_v46 = vmul.f32 %v4942_v26, %v304_v45 }
 0x28f   :  { %308 = vrot.lane.b32.xlu1 %v306_v46, %s5275_s3  ;;  %v5546_v46 = vld [vmem:[%s6201_s7] ss:$0 sm:$0xff] }
 0x301   :  { %v309_v47 = vpop.permute.xlu1 %308 }
 0x302   :  { %v311_v48 = vsel %vm208_vm2, %v309_v47, 0.0 }
 0x303   :  { %4054 = vmatmul.mubr.msk.f32.vlgmr.msra.gmra.mrb[2].mxu0 %vm318_vm3, %v311_v48 }
 0x304   :  { %4091 = vmatprep.mubr.msk.f32.mxu0 %vm5272_vm0, %v5273_v2 }
 0x3d6   :  { %v388_v50 = vpop.f32.mrb[2].mxu0 }
 0x3d7   :  { %v389_v51 = vadd.f32 %v5489_v49, %v388_v50  ;;  %v4055_v52 = vpop.f32.mrb[3].mxu0 }
 0x3d9   :  { %4945 = vtanh.f32 %v389_v51  ;;  %v3689_v54 = vmul.f32 -1.442695, %v389_v51 }
 0x3db   :  { %4947 = vpow2.f32 %v3689_v54 }
 0x3e3   :  { %v4946_v53 = vpop.eup %4945 }
 0x3e4   :  { %401 = vrot.lane.b32.xlu0 %v4946_v53, %s5274_s6 }
 0x3e5   :  { %v4948_v55 = vpop.eup %4947 }
 0x3e6   :  { %v395_v56 = vadd.f32 1.0, %v4948_v55 }
 0x3e8   :  { %4949 = vrcp.f32 %v395_v56 }
 0x3f2   :  { %v4950_v57 = vpop.eup %4949 }
 0x3f3   :  { %v399_v60 = vmul.f32 0.0, %v4950_v57 }
 0x456   :  { %v402_v58 = vpop.permute.xlu0 %401 }
 0x457   :  { %v404_v59 = vmul.f32 %v4950_v57, %v402_v58 }
 0x459   :  { %406 = vrot.lane.b32.xlu1 %v404_v59, %s5275_s3 }
 0x4cb   :  { %v407_v61 = vpop.permute.xlu1 %406 }
 0x4cc   :  { %v5494_v62 = vadd.f32 %v407_v61, %v399_v60 }
 0x4ce   :  { %4951 = vtanh.f32 %v5494_v62 }
 0x4d8   :  { %v4952_v14 = vpop.eup %4951 }
 0x4d9   :  { %412 = vrot.lane.b32.xlu0 %v4952_v14, %s5274_s6  ;;  %v199_v14 = vld [vmem:[#allocation7 + $0x10] sm:$0xff] }
 0x54b   :  { %v413_v17 = vpop.permute.xlu0 %412 }
 0x54c   :  { %v415_v19 = vmul.f32 %v4950_v57, %v413_v17  ;;  %v5564_v17 = vpack.c.bf16 %v198_v12, %v197_v11 }
 0x54e   :  { %417 = vrot.lane.b32.xlu1 %v415_v19, %s5275_s3  ;;  %v739_v45 = vrot.slane %v415_v19, 6  ;;  %v200_v19 = vld [vmem:[#allocation7 + $0x18] sm:$0xff]  ;;  %4617 = vmatpush3.bf16.msra.mxu0 %v5564_v17 }
 0x54f   :  { %4618 = vmatprep.subr.bf16.mxu0 %v5271_v1 }
 0x5c0   :  { %v418_v20 = vpop.permute.xlu1 %417 }
 0x5c1   :  { %v420_v21 = vsel %vm208_vm2, %v418_v20, 0.0  ;;  %v5567_v20 = vpack.c.bf16 %v200_v19, %v199_v14 }
 0x5c2   :  { %4073 = vmatmul.mubr.msk.f32.vlgmr.msra.gmra.mrb[2].mxu1 %vm318_vm3, %v420_v21  ;;  %v201_v21 = vld [vmem:[#allocation7 + $0x20] sm:$0xff] }
 0x5c3   :  { %4629 = vmatpush3.bf16.msra.mxu1 %v5408_v9  ;;  %4102 = vmatprep.mubr.msk.f32.mxu1 %vm5272_vm0, %v5273_v2 }
 0x5c4   :  { %4630 = vmatprep.subr.bf16.mxu1 %v5271_v1  ;;  %4620 = vmatpush3.bf16.msra.mxu0 %v5567_v20 }
 0x5c5   :  { %4621 = vmatprep.subr.bf16.mxu0 %v5271_v1 }
 0x5c7   :  { %4632 = vmatpush3.bf16.msra.mxu1 %v5415_v13 }
 0x5c8   :  { %4633 = vmatprep.subr.bf16.mxu1 %v5271_v1 }
 0x5ca   :  { %4103 = vmatmul.mubr.msk.f32.vlgmr.msra.gmra.mrb[4].mxu1 %vm208_vm2, %v309_v47 }
 0x5cb   :  { %4635 = vmatpush3.bf16.msra.mxu1 %v5449_v35  ;;  %4121 = vmatprep.mubr.msk.f32.mxu1 %vm5272_vm0, %v5273_v2 }
 0x5cc   :  { %4636 = vmatprep.subr.bf16.mxu1 %v5271_v1 }
 0x5cf   :  { %4638 = vmatpush3.bf16.msra.mxu1 %v5455_v37 }
 0x5d0   :  { %4639 = vmatprep.subr.bf16.mxu1 %v5271_v1 }
 0x5d3   :  { %4641 = vmatpush3.bf16.msra.mxu1 %v5465_v40 }
 0x5d4   :  { %4642 = vmatprep.subr.bf16.mxu1 %v5271_v1 }
 0x5d7   :  { %4644 = vmatpush3.bf16.msra.mxu1 %v5476_v44 }
 0x5d8   :  { %4657 = vmatprep.subr.bf16.mxu1 %v5271_v1 }
 0x695   :  { %v496_v22 = vpop.f32.mrb[2].mxu1 }
 0x696   :  { %v4074_v23 = vpop.f32.mrb[3].mxu1  ;;  %v497_v47 = vadd.f32 %v5546_v46, %v496_v22  ;;  %v202_v22 = vld [vmem:[#allocation7 + $0x28] sm:$0xff] }
 0x697   :  { %v5573_v23 = vpack.c.bf16 %v202_v22, %v201_v21 }
 0x698   :  { %v3692_v51 = vmul.f32 -1.442695, %v497_v47 }
 0x699   :  { %4623 = vmatpush3.bf16.msra.mxu0 %v5573_v23 }
 0x69a   :  { %4624 = vmatprep.subr.bf16.mxu0 %v5271_v1 }
 0x69d   :  { %v700_v24 = vpop.f32.mrb[4].mxu1 }
 0x69e   :  { %v705_v25 = vrot.slane %v700_v24, 6  ;;  %v4104_v26 = vpop.f32.mrb[5].mxu1  ;;  %v203_v24 = vld [vmem:[#allocation7 + $0x30] sm:$0xff] }
 0x6a0   :  { %v707_v27 = vadd.f32 %v705_v25, %v5432_v18  ;;  %v204_v25 = vld [vmem:[#allocation7 + $0x38] sm:$0xff] }
 0x6a2   :  { %4953 = vtanh.f32 %v707_v27  ;;  %v3697_v29 = vmul.f32 -1.442695, %v707_v27  ;;  %v5580_v27 = vpack.c.bf16 %v204_v25, %v203_v24 }
 0x6a4   :  { %4955 = vpow2.f32 %v3697_v29  ;;  %4626 = vmatpush3.bf16.msra.mxu0 %v5580_v27 }
 0x6a5   :  { %4645 = vmatprep.subr.bf16.mxu0 %v5271_v1 }
 0x6ac   :  { %v4954_v28 = vpop.eup %4953 }
 0x6ad   :  { %720 = vrot.lane.b32.xlu0 %v4954_v28, %s5274_s6 }
 0x6ae   :  { %v4956_v30 = vpop.eup %4955 }
 0x6af   :  { %v711_v32 = vadd.f32 1.0, %v4956_v30 }
 0x6b1   :  { %4957 = vrcp.f32 %v711_v32 }
 0x6bb   :  { %v4958_v33 = vpop.eup %4957 }
 0x6bc   :  { %v718_v39 = vmul.f32 %v4958_v33, %v716_v38 }
 0x71f   :  { %v721_v34 = vpop.permute.xlu0 %720 }
 0x720   :  { %v723_v36 = vmul.f32 %v4958_v33, %v721_v34 }
 0x722   :  { %725 = vrot.lane.b32.xlu1 %v723_v36, %s5275_s3 }
 0x794   :  { %v726_v41 = vpop.permute.xlu1 %725 }
 0x795   :  { %v5538_v42 = vadd.f32 %v726_v41, %v718_v39 }
 0x797   :  { %4959 = vtanh.f32 %v5538_v42  ;;  %v1140_v19 = vrot.slane %v5538_v42, 6  ;;  %v5645_v42 = vld [vmem:[%s6203_s9] ss:$0 sm:$0xff] }
 0x798   :  { %4961 = vtanh.f32 %v497_v47 }
 0x799   :  { %4963 = vpow2.f32 %v3692_v51 }
 0x7a1   :  { %v4960_v43 = vpop.eup %4959 }
 0x7a2   :  { %731 = vrot.lane.b32.xlu0 %v4960_v43, %s5274_s6  ;;  %v4962_v50 = vpop.eup %4961 }
 0x7a3   :  { %v4964_v52 = vpop.eup %4963 }
 0x7a4   :  { %v503_v53 = vadd.f32 1.0, %v4964_v52 }
 0x7a6   :  { %740 = vrot.lane.b32.xlu0 %v739_v45, %s5274_s6  ;;  %4965 = vrcp.f32 %v503_v53 }
 0x7b0   :  { %v4966_v58 = vpop.eup %4965 }
 0x7b1   :  { %v507_v61 = vmul.f32 0.0, %v4966_v58 }
 0x814   :  { %v732_v31 = vpop.permute.xlu0 %731 }
 0x815   :  { %v5549_v48 = vmul.f32 %v4958_v33, %v732_v31 }
 0x817   :  { %736 = vrot.lane.b32.xlu1 %v5549_v48, %s5275_s3 }
 0x818   :  { %v741_v54 = vpop.permute.xlu0 %740 }
 0x81b   :  { %509 = vrot.lane.b32.xlu1 %v4962_v50, %s5274_s6 }
 0x889   :  { %v737_v55 = vpop.permute.xlu1 %736 }
 0x88a   :  { %v743_v56 = vsel %vm208_vm2, %v737_v55, %v741_v54  ;;  %v1053_v54 = vrot.slane %v5549_v48, 2 }
 0x88b   :  { %v745_v57 = vrot.slane %v743_v56, 2 }
 0x88d   :  { %v510_v59 = vpop.permute.xlu1 %509  ;;  %4122 = vmatmul.mubr.msk.f32.vlgmr.msra.gmra.mrb[6].mxu1 %vm318_vm3, %v745_v57 }
 0x88e   :  { %v512_v60 = vmul.f32 %v4966_v58, %v510_v59  ;;  %4159 = vmatprep.mubr.msk.f32.mxu1 %vm5272_vm0, %v5273_v2  ;;  %4659 = vmatpush3.bf16.msra.mxu1 %v5564_v17 }
 0x88f   :  { %4660 = vmatprep.subr.bf16.mxu1 %v5271_v1 }
 0x890   :  { %514 = vrot.lane.b32.xlu1 %v512_v60, %s5275_s3 }
 0x892   :  { %4662 = vmatpush3.bf16.msra.mxu1 %v5567_v20 }
 0x893   :  { %4663 = vmatprep.subr.bf16.mxu1 %v5271_v1 }
 0x896   :  { %4665 = vmatpush3.bf16.msra.mxu1 %v5573_v23 }
 0x897   :  { %4666 = vmatprep.subr.bf16.mxu1 %v5271_v1 }
 0x89a   :  { %4668 = vmatpush3.bf16.msra.mxu1 %v5580_v27 }
 0x89b   :  { %4687 = vmatprep.subr.bf16.mxu1 %v5271_v1 }
 0x902   :  { %v515_v63 = vpop.permute.xlu1 %514 }
 0x903   :  { %v5559_v0 = vadd.f32 %v515_v63, %v507_v61 }
 0x905   :  { %4967 = vtanh.f32 %v5559_v0 }
 0x90f   :  { %v4968_v3 = vpop.eup %4967 }
 0x910   :  { %520 = vrot.lane.b32.xlu1 %v4968_v3, %s5274_s6 }
 0x960   :  { %v814_v5 = vpop.f32.mrb[6].mxu1 }
 0x961   :  { %v815_v7 = vadd.f32 %v5489_v49, %v814_v5  ;;  %v4123_v8 = vpop.f32.mrb[7].mxu1 }
 0x963   :  { %4969 = vtanh.f32 %v815_v7  ;;  %v3699_v30 = vmul.f32 -1.442695, %v815_v7 }
 0x965   :  { %4971 = vpow2.f32 %v3699_v30 }
 0x96d   :  { %v4970_v26 = vpop.eup %4969 }
 0x96e   :  { %827 = vrot.lane.b32.xlu0 %v4970_v26, %s5274_s6 }
 0x96f   :  { %v4972_v32 = vpop.eup %4971 }
 0x970   :  { %v821_v33 = vadd.f32 1.0, %v4972_v32 }
 0x972   :  { %4973 = vrcp.f32 %v821_v33 }
 0x97c   :  { %v4974_v34 = vpop.eup %4973 }
 0x97d   :  { %v825_v43 = vmul.f32 %v4974_v34, %v5494_v62 }
 0x982   :  { %v521_v28 = vpop.permute.xlu1 %520 }
 0x983   :  { %v523_v29 = vmul.f32 %v4966_v58, %v521_v28 }
 0x985   :  { %525 = vrot.lane.b32.xlu1 %v523_v29, %s5275_s3 }
 0x989   :  { %846 = vrot.lane.b32.xlu1 %v523_v29, %s5274_s6 }
 0x9e0   :  { %v828_v36 = vpop.permute.xlu0 %827 }
 0x9e1   :  { %v830_v38 = vmul.f32 %v4974_v34, %v828_v36 }
 0x9e3   :  { %832 = vrot.lane.b32.xlu0 %v830_v38, %s5275_s3 }
 0x9f7   :  { %v526_v39 = vpop.permute.xlu1 %525 }
 0x9f8   :  { %v528_v41 = vsel %vm208_vm2, %v526_v39, 0.0 }
 0x9f9   :  { %4092 = vmatmul.mubr.msk.f32.vlgmr.msra.gmra.mrb[4].mxu0 %vm318_vm3, %v528_v41 }
 0x9fa   :  { %4647 = vmatpush3.bf16.msra.mxu0 %v5497_v4  ;;  %4140 = vmatprep.mubr.msk.f32.mxu0 %vm5272_vm0, %v5273_v2 }
 0x9fb   :  { %4648 = vmatprep.subr.bf16.mxu0 %v5271_v1  ;;  %v847_v55 = vpop.permute.xlu1 %846 }
 0x9fe   :  { %4650 = vmatpush3.bf16.msra.mxu0 %v5500_v6 }
 0x9ff   :  { %4651 = vmatprep.subr.bf16.mxu0 %v5271_v1 }
 0xa02   :  { %4653 = vmatpush3.bf16.msra.mxu0 %v5504_v10 }
 0xa03   :  { %4654 = vmatprep.subr.bf16.mxu0 %v5271_v1 }
 0xa06   :  { %4656 = vmatpush3.bf16.msra.mxu0 %v5509_v15 }
 0xa07   :  { %4669 = vmatprep.subr.bf16.mxu0 %v5271_v1 }
 0xa55   :  { %v833_v45 = vpop.permute.xlu0 %832 }
 0xa56   :  { %v5605_v47 = vadd.f32 %v833_v45, %v825_v43 }
 0xa58   :  { %4975 = vtanh.f32 %v5605_v47 }
 0xa62   :  { %v4976_v31 = vpop.eup %4975 }
 0xa63   :  { %838 = vrot.lane.b32.xlu0 %v4976_v31, %s5274_s6 }
 0xacc   :  { %v604_v50 = vpop.f32.mrb[4].mxu0 }
 0xacd   :  { %v4093_v51 = vpop.f32.mrb[5].mxu0  ;;  %v605_v30 = vadd.f32 %v5645_v42, %v604_v50 }
 0xacf   :  { %v3695_v36 = vmul.f32 -1.442695, %v605_v30 }
 0xad5   :  { %v839_v52 = vpop.permute.xlu0 %838 }
 0xad6   :  { %v841_v53 = vmul.f32 %v4974_v34, %v839_v52 }
 0xad8   :  { %843 = vrot.lane.b32.xlu0 %v841_v53, %s5275_s3  ;;  %v1163_v28 = vrot.slane %v841_v53, 4 }
 0xadc   :  { %1054 = vrot.lane.b32.xlu0 %v1053_v54, %s5275_s3 }
 0xb4a   :  { %v844_v62 = vpop.permute.xlu0 %843 }
 0xb4b   :  { %v849_v56 = vsel %vm208_vm2, %v844_v62, %v847_v55 }
 0xb4c   :  { %4141 = vmatmul.mubr.msk.f32.vlgmr.msra.gmra.mrb[6].mxu0 %vm318_vm3, %v849_v56 }
 0xb4d   :  { %4671 = vmatpush3.bf16.msra.mxu0 %v5408_v9  ;;  %4170 = vmatprep.mubr.msk.f32.mxu0 %vm5272_vm0, %v5273_v2 }
 0xb4e   :  { %4672 = vmatprep.subr.bf16.mxu0 %v5271_v1  ;;  %v1055_v48 = vpop.permute.xlu0 %1054 }
 0xb51   :  { %4674 = vmatpush3.bf16.msra.mxu0 %v5415_v13 }
 0xb52   :  { %4675 = vmatprep.subr.bf16.mxu0 %v5271_v1 }
 0xb54   :  { %4171 = vmatmul.mubr.msk.f32.vlgmr.msra.gmra.mrb[8].mxu0 %vm208_vm2, %v1055_v48 }
 0xb55   :  { %4677 = vmatpush3.bf16.msra.mxu0 %v5449_v35  ;;  %4189 = vmatprep.mubr.msk.f32.mxu0 %vm5272_vm0, %v5273_v2 }
 0xb56   :  { %4678 = vmatprep.subr.bf16.mxu0 %v5271_v1 }
 0xb59   :  { %4680 = vmatpush3.bf16.msra.mxu0 %v5455_v37 }
 0xb5a   :  { %4681 = vmatprep.subr.bf16.mxu0 %v5271_v1 }
 0xb5d   :  { %4683 = vmatpush3.bf16.msra.mxu0 %v5465_v40 }
 0xb5e   :  { %4684 = vmatprep.subr.bf16.mxu0 %v5271_v1 }
 0xb61   :  { %4686 = vmatpush3.bf16.msra.mxu0 %v5476_v44 }
 0xb62   :  { %4699 = vmatprep.subr.bf16.mxu0 %v5271_v1 }
 0xc1f   :  { %v919_v57 = vpop.f32.mrb[6].mxu0 }
 0xc20   :  { %v4142_v58 = vpop.f32.mrb[7].mxu0  ;;  %v920_v25 = vadd.f32 %v5546_v46, %v919_v57 }
 0xc22   :  { %v3701_v53 = vmul.f32 -1.442695, %v920_v25 }
 0xc27   :  { %v1124_v59 = vpop.f32.mrb[8].mxu0 }
 0xc28   :  { %v1129_v60 = vrot.slane %v1124_v59, 4  ;;  %v4172_v61 = vpop.f32.mrb[9].mxu0 }
 0xc2a   :  { %v1131_v63 = vadd.f32 %v1129_v60, %v5432_v18 }
 0xc2c   :  { %4977 = vtanh.f32 %v1131_v63  ;;  %v3705_v5 = vmul.f32 -1.442695, %v1131_v63 }
 0xc2e   :  { %4979 = vpow2.f32 %v3705_v5 }
 0xc36   :  { %v4978_v3 = vpop.eup %4977 }
 0xc37   :  { %1144 = vrot.lane.b32.xlu1 %v4978_v3, %s5274_s6 }
 0xc38   :  { %v4980_v7 = vpop.eup %4979 }
 0xc39   :  { %v1135_v8 = vadd.f32 1.0, %v4980_v7 }
 0xc3b   :  { %4981 = vrcp.f32 %v1135_v8 }
 0xc45   :  { %v4982_v11 = vpop.eup %4981 }
 0xc46   :  { %v1142_v21 = vmul.f32 %v4982_v11, %v1140_v19 }
 0xca9   :  { %v1145_v12 = vpop.permute.xlu1 %1144 }
 0xcaa   :  { %v1147_v14 = vmul.f32 %v4982_v11, %v1145_v12 }
 0xcac   :  { %1149 = vrot.lane.b32.xlu0 %v1147_v14, %s5275_s3 }
 0xd1e   :  { %v1150_v22 = vpop.permute.xlu0 %1149 }
 0xd1f   :  { %v5635_v24 = vadd.f32 %v1150_v22, %v1142_v21 }
 0xd21   :  { %4983 = vtanh.f32 %v5635_v24 }
 0xd22   :  { %4985 = vtanh.f32 %v920_v25 }
 0xd23   :  { %4987 = vtanh.f32 %v605_v30 }
 0xd24   :  { %4989 = vpow2.f32 %v3695_v36 }
 0xd2b   :  { %v4984_v26 = vpop.eup %4983 }
 0xd2c   :  { %1155 = vrot.lane.b32.xlu1 %v4984_v26, %s5274_s6  ;;  %v4986_v29 = vpop.eup %4985 }
 0xd2d   :  { %v4988_v34 = vpop.eup %4987 }
 0xd2e   :  { %v4990_v38 = vpop.eup %4989 }
 0xd2f   :  { %v611_v39 = vadd.f32 1.0, %v4990_v38 }
 0xd30   :  { %1164 = vrot.lane.b32.xlu1 %v1163_v28, %s5274_s6 }
 0xd31   :  { %4991 = vrcp.f32 %v611_v39 }
 0xd32   :  { %4993 = vpow2.f32 %v3701_v53 }
 0xd34   :  { %932 = vrot.lane.b32.xlu1 %v4986_v29, %s5274_s6 }
 0xd3b   :  { %v4992_v50 = vpop.eup %4991 }
 0xd3c   :  { %v4994_v54 = vpop.eup %4993  ;;  %v615_v59 = vmul.f32 0.0, %v4992_v50 }
 0xd3d   :  { %v926_v56 = vadd.f32 1.0, %v4994_v54 }
 0xd9e   :  { %v1156_v32 = vpop.permute.xlu1 %1155 }
 0xd9f   :  { %v5648_v33 = vmul.f32 %v4982_v11, %v1156_v32 }
 0xda1   :  { %1160 = vrot.lane.b32.xlu0 %v5648_v33, %s5275_s3 }
 0xda2   :  { %v1165_v41 = vpop.permute.xlu1 %1164 }
 0xda5   :  { %617 = vrot.lane.b32.xlu0 %v4988_v34, %s5274_s6 }
 0xda6   :  { %v933_v55 = vpop.permute.xlu1 %932 }
 0xe13   :  { %v1161_v43 = vpop.permute.xlu0 %1160 }
 0xe14   :  { %v1167_v45 = vsel %vm208_vm2, %v1161_v43, %v1165_v41 }
 0xe15   :  { %v1169_v31 = vrot.slane %v1167_v45, 4  ;;  %v1477_v45 = vrot.slane %v5648_v33, 4 }
 0xe17   :  { %v618_v51 = vpop.permute.xlu0 %617  ;;  %4190 = vmatmul.mubr.msk.f32.vlgmr.msra.gmra.mrb[10].mxu0 %vm318_vm3, %v1169_v31 }
 0xe18   :  { %v620_v52 = vmul.f32 %v4992_v50, %v618_v51  ;;  %4701 = vmatpush3.bf16.msra.mxu0 %v5564_v17  ;;  %4227 = vmatprep.mubr.msk.f32.mxu0 %vm5272_vm0, %v5273_v2 }
 0xe19   :  { %4702 = vmatprep.subr.bf16.mxu0 %v5271_v1 }
 0xe1a   :  { %622 = vrot.lane.b32.xlu1 %v620_v52, %s5275_s3 }
 0xe1c   :  { %4704 = vmatpush3.bf16.msra.mxu0 %v5567_v20 }
 0xe1d   :  { %4705 = vmatprep.subr.bf16.mxu0 %v5271_v1 }
 0xe20   :  { %4707 = vmatpush3.bf16.msra.mxu0 %v5573_v23 }
 0xe21   :  { %4708 = vmatprep.subr.bf16.mxu0 %v5271_v1 }
 0xe24   :  { %4710 = vmatpush3.bf16.msra.mxu0 %v5580_v27 }
 0xe25   :  { %4729 = vmatprep.subr.bf16.mxu0 %v5271_v1 }
 0xe8c   :  { %v623_v58 = vpop.permute.xlu1 %622 }
 0xe8d   :  { %v5667_v60 = vadd.f32 %v623_v58, %v615_v59 }
 0xeea   :  { %v1238_v62 = vpop.f32.mrb[10].mxu0 }
 0xeeb   :  { %v1239_v48 = vadd.f32 %v5489_v49, %v1238_v62  ;;  %v4191_v57 = vpop.f32.mrb[11].mxu0 }
 0xeed   :  { %4995 = vtanh.f32 %v1239_v48  ;;  %v3707_v7 = vmul.f32 -1.442695, %v1239_v48 }
 0xeee   :  { %4997 = vrcp.f32 %v926_v56 }
 0xeef   :  { %4999 = vtanh.f32 %v5667_v60 }
 0xef0   :  { %5001 = vpow2.f32 %v3707_v7 }
 0xef7   :  { %v4996_v61 = vpop.eup %4995 }
 0xef8   :  { %1251 = vrot.lane.b32.xlu0 %v4996_v61, %s5274_s6  ;;  %v4998_v63 = vpop.eup %4997 }
 0xef9   :  { %v935_v3 = vmul.f32 %v4998_v63, %v933_v55  ;;  %v5000_v5 = vpop.eup %4999  ;;  %v930_v21 = vmul.f32 %v4998_v63, %v5559_v0 }
 0xefa   :  { %v5002_v8 = vpop.eup %5001 }
 0xefb   :  { %v1245_v11 = vadd.f32 1.0, %v5002_v8 }
 0xefc   :  { %937 = vrot.lane.b32.xlu0 %v935_v3, %s5275_s3 }
 0xefd   :  { %5003 = vrcp.f32 %v1245_v11  ;;  %v1564_v11 = vrot.slane %v5635_v24, 6 }
 0xf00   :  { %628 = vrot.lane.b32.xlu0 %v5000_v5, %s5274_s6 }
 0xf07   :  { %v5004_v12 = vpop.eup %5003 }
 0xf08   :  { %v1249_v28 = vmul.f32 %v5004_v12, %v5605_v47 }
 0xf6a   :  { %v1252_v14 = vpop.permute.xlu0 %1251 }
 0xf6b   :  { %v1254_v19 = vmul.f32 %v5004_v12, %v1252_v14 }
 0xf6d   :  { %1256 = vrot.lane.b32.xlu1 %v1254_v19, %s5275_s3 }
 0xf6e   :  { %v938_v22 = vpop.permute.xlu0 %937 }
 0xf6f   :  { %v5675_v25 = vadd.f32 %v938_v22, %v930_v21 }
 0xf71   :  { %5005 = vtanh.f32 %v5675_v25 }
 0xf72   :  { %v629_v34 = vpop.permute.xlu0 %628 }
 0xf73   :  { %v631_v36 = vmul.f32 %v4992_v50, %v629_v34 }
 0xf7b   :  { %v5006_v26 = vpop.eup %5005 }
 0xf7c   :  { %943 = vrot.lane.b32.xlu1 %v5006_v26, %s5274_s6 }
 0xfdf   :  { %v1257_v29 = vpop.permute.xlu1 %1256 }
 0xfe0   :  { %v5680_v30 = vadd.f32 %v1257_v29, %v1249_v28 }
 0xfe2   :  { %5007 = vtanh.f32 %v5680_v30 }
 0xfec   :  { %v5008_v32 = vpop.eup %5007 }
 0xfed   :  { %1262 = vrot.lane.b32.xlu0 %v5008_v32, %s5274_s6 }
 0xfee   :  { %v944_v0 = vpop.permute.xlu1 %943 }
 0xfef   :  { %v946_v38 = vmul.f32 %v4998_v63, %v944_v0 }
 0xff1   :  { %948 = vrot.lane.b32.xlu1 %v946_v38, %s5275_s3  ;;  %952 = vrot.lane.b32.xlu0 %v631_v36, %s5274_s6 }
 0xff5   :  { %1270 = vrot.lane.b32.xlu0 %v946_v38, %s5274_s6 }
0x105f   :  { %v1263_v39 = vpop.permute.xlu0 %1262 }
0x1060   :  { %v5687_v47 = vmul.f32 %v5004_v12, %v1263_v39 }
0x1062   :  { %1267 = vrot.lane.b32.xlu1 %v5687_v47, %s5275_s3  ;;  %v1587_v22 = vrot.slane %v5687_v47, 2 }
0x1063   :  { %v949_v41 = vpop.permute.xlu1 %948  ;;  %v953_v43 = vpop.permute.xlu0 %952 }
0x1064   :  { %v955_v31 = vsel %vm208_vm2, %v949_v41, %v953_v43 }
0x1065   :  { %4160 = vmatmul.mubr.msk.f32.vlgmr.msra.gmra.mrb[8].mxu1 %vm318_vm3, %v955_v31 }
0x1066   :  { %1478 = vrot.lane.b32.xlu1 %v1477_v45, %s5275_s3  ;;  %4689 = vmatpush3.bf16.msra.mxu1 %v5497_v4 }
0x1067   :  { %4690 = vmatprep.subr.bf16.mxu1 %v5271_v1  ;;  %4208 = vmatprep.mubr.msk.f32.mxu1 %vm5272_vm0, %v5273_v2  ;;  %v1271_v33 = vpop.permute.xlu0 %1270 }
0x106a   :  { %4692 = vmatpush3.bf16.msra.mxu1 %v5500_v6 }
0x106b   :  { %4693 = vmatprep.subr.bf16.mxu1 %v5271_v1 }
0x106e   :  { %4695 = vmatpush3.bf16.msra.mxu1 %v5504_v10 }
0x106f   :  { %4696 = vmatprep.subr.bf16.mxu1 %v5271_v1 }
0x1072   :  { %4698 = vmatpush3.bf16.msra.mxu1 %v5509_v15 }
0x1073   :  { %4711 = vmatprep.subr.bf16.mxu1 %v5271_v1 }
0x10d4   :  { %v1268_v50 = vpop.permute.xlu1 %1267 }
0x10d5   :  { %v1273_v51 = vsel %vm208_vm2, %v1268_v50, %v1271_v33 }
0x10d6   :  { %4209 = vmatmul.mubr.msk.f32.vlgmr.msra.gmra.mrb[10].mxu1 %vm318_vm3, %v1273_v51 }
0x10d7   :  { %4713 = vmatpush3.bf16.msra.mxu1 %v5408_v9  ;;  %4238 = vmatprep.mubr.msk.f32.mxu1 %vm5272_vm0, %v5273_v2 }
0x10d8   :  { %4714 = vmatprep.subr.bf16.mxu1 %v5271_v1  ;;  %v1479_v52 = vpop.permute.xlu1 %1478 }
0x10db   :  { %4716 = vmatpush3.bf16.msra.mxu1 %v5415_v13 }
0x10dc   :  { %4717 = vmatprep.subr.bf16.mxu1 %v5271_v1 }
0x10de   :  { %4239 = vmatmul.mubr.msk.f32.vlgmr.msra.gmra.mrb[12].mxu1 %vm208_vm2, %v1479_v52 }
0x10df   :  { %4719 = vmatpush3.bf16.msra.mxu1 %v5449_v35  ;;  %4257 = vmatprep.mubr.msk.f32.mxu1 %vm5272_vm0, %v5273_v2 }
0x10e0   :  { %4720 = vmatprep.subr.bf16.mxu1 %v5271_v1 }
0x10e3   :  { %4722 = vmatpush3.bf16.msra.mxu1 %v5455_v37 }
0x10e4   :  { %4723 = vmatprep.subr.bf16.mxu1 %v5271_v1 }
0x10e7   :  { %4725 = vmatpush3.bf16.msra.mxu1 %v5465_v40 }
0x10e8   :  { %4726 = vmatprep.subr.bf16.mxu1 %v5271_v1 }
0x10eb   :  { %4728 = vmatpush3.bf16.msra.mxu1 %v5476_v44 }
0x10ec   :  { %4741 = vmatprep.subr.bf16.mxu1 %v5271_v1 }
0x1138   :  { %v1025_v53 = vpop.f32.mrb[8].mxu1 }
0x1139   :  { %v4161_v54 = vpop.f32.mrb[9].mxu1  ;;  %v1026_v24 = vadd.f32 %v5645_v42, %v1025_v53 }
0x113b   :  { %v3703_v34 = vmul.f32 -1.442695, %v1026_v24 }
0x11a9   :  { %v1343_v55 = vpop.f32.mrb[10].mxu1 }
0x11aa   :  { %v4210_v62 = vpop.f32.mrb[11].mxu1 }
0x11b1   :  { %v1548_v56 = vpop.f32.mrb[12].mxu1 }
0x11b2   :  { %v1553_v48 = vrot.slane %v1548_v56, 2  ;;  %v4240_v57 = vpop.f32.mrb[13].mxu1 }
0x11b4   :  { %v1555_v58 = vadd.f32 %v1553_v48, %v5432_v18  ;;  %v1344_v18 = vadd.f32 %v5546_v46, %v1343_v55 }
0x11b6   :  { %5009 = vtanh.f32 %v1555_v58  ;;  %v3713_v61 = vmul.f32 -1.442695, %v1555_v58  ;;  %v3709_v33 = vmul.f32 -1.442695, %v1344_v18 }
0x11b8   :  { %5011 = vpow2.f32 %v3713_v61 }
0x11c0   :  { %v5010_v59 = vpop.eup %5009 }
0x11c1   :  { %1568 = vrot.lane.b32.xlu0 %v5010_v59, %s5274_s6 }
0x11c2   :  { %v5012_v63 = vpop.eup %5011 }
0x11c3   :  { %v1559_v3 = vadd.f32 1.0, %v5012_v63 }
0x11c5   :  { %5013 = vrcp.f32 %v1559_v3 }
0x11cf   :  { %v5014_v5 = vpop.eup %5013 }
0x11d0   :  { %v1566_v12 = vmul.f32 %v5014_v5, %v1564_v11 }
0x1233   :  { %v1569_v7 = vpop.permute.xlu0 %1568 }
0x1234   :  { %v1571_v8 = vmul.f32 %v5014_v5, %v1569_v7 }
0x1236   :  { %1573 = vrot.lane.b32.xlu1 %v1571_v8, %s5275_s3 }
0x12a8   :  { %v1574_v14 = vpop.permute.xlu1 %1573 }
0x12a9   :  { %v5728_v19 = vadd.f32 %v1574_v14, %v1566_v12 }
0x12ab   :  { %5015 = vtanh.f32 %v5728_v19 }
0x12ac   :  { %5017 = vtanh.f32 %v1344_v18 }
0x12ad   :  { %5019 = vtanh.f32 %v1026_v24 }
0x12ae   :  { %5021 = vpow2.f32 %v3703_v34 }
0x12b5   :  { %v5016_v21 = vpop.eup %5015 }
0x12b6   :  { %1579 = vrot.lane.b32.xlu0 %v5016_v21, %s5274_s6  ;;  %v5018_v26 = vpop.eup %5017 }
0x12b7   :  { %v5020_v32 = vpop.eup %5019 }
0x12b8   :  { %v5022_v0 = vpop.eup %5021 }
0x12b9   :  { %v1032_v36 = vadd.f32 1.0, %v5022_v0 }
0x12ba   :  { %1588 = vrot.lane.b32.xlu0 %v1587_v22, %s5274_s6 }
0x12bb   :  { %5023 = vrcp.f32 %v1032_v36 }
0x12bc   :  { %5025 = vpow2.f32 %v3709_v33 }
0x12be   :  { %1356 = vrot.lane.b32.xlu0 %v5018_v26, %s5274_s6 }
0x12c5   :  { %v5024_v43 = vpop.eup %5023 }
0x12c6   :  { %v5026_v50 = vpop.eup %5025  ;;  %v1036_v56 = vmul.f32 %v5024_v43, %v5667_v60 }
0x12c7   :  { %v1350_v53 = vadd.f32 1.0, %v5026_v50 }
0x1328   :  { %v1580_v28 = vpop.permute.xlu0 %1579 }
0x1329   :  { %v5737_v29 = vmul.f32 %v5014_v5, %v1580_v28 }
0x132b   :  { %1584 = vrot.lane.b32.xlu1 %v5737_v29, %s5275_s3 }
0x132c   :  { %v1589_v38 = vpop.permute.xlu0 %1588 }
0x132f   :  { %1038 = vrot.lane.b32.xlu1 %v5020_v32, %s5274_s6 }
0x1330   :  { %v1357_v51 = vpop.permute.xlu0 %1356 }
0x139d   :  { %v1585_v39 = vpop.permute.xlu1 %1584 }
0x139e   :  { %v1591_v47 = vsel %vm208_vm2, %v1585_v39, %v1589_v38  ;;  %v1901_v38 = vrot.slane %v5737_v29, 6 }
0x139f   :  { %v1593_v41 = vrot.slane %v1591_v47, 6 }
0x13a1   :  { %v1039_v45 = vpop.permute.xlu1 %1038  ;;  %4258 = vmatmul.mubr.msk.f32.vlgmr.msra.gmra.mrb[14].mxu1 %vm318_vm3, %v1593_v41 }
0x13a2   :  { %v1041_v31 = vmul.f32 %v5024_v43, %v1039_v45  ;;  %4743 = vmatpush3.bf16.msra.mxu1 %v5564_v17  ;;  %4295 = vmatprep.mubr.msk.f32.mxu1 %vm5272_vm0, %v5273_v2 }
0x13a3   :  { %4744 = vmatprep.subr.bf16.mxu1 %v5271_v1 }
0x13a4   :  { %1043 = vrot.lane.b32.xlu0 %v1041_v31, %s5275_s3 }
0x13a6   :  { %4746 = vmatpush3.bf16.msra.mxu1 %v5567_v20 }
0x13a7   :  { %4747 = vmatprep.subr.bf16.mxu1 %v5271_v1 }
0x13aa   :  { %4749 = vmatpush3.bf16.msra.mxu1 %v5573_v23 }
0x13ab   :  { %4750 = vmatprep.subr.bf16.mxu1 %v5271_v1 }
0x13ae   :  { %4752 = vmatpush3.bf16.msra.mxu1 %v5580_v27 }
0x13af   :  { %4771 = vmatprep.subr.bf16.mxu1 %v5271_v1 }
0x1416   :  { %v1044_v62 = vpop.permute.xlu0 %1043 }
0x1417   :  { %v5757_v48 = vadd.f32 %v1044_v62, %v1036_v56 }
0x1474   :  { %v1662_v52 = vpop.f32.mrb[14].mxu1 }
0x1475   :  { %v1663_v54 = vadd.f32 %v5489_v49, %v1662_v52  ;;  %v4259_v55 = vpop.f32.mrb[15].mxu1 }
0x1477   :  { %5027 = vtanh.f32 %v1663_v54  ;;  %v3715_v49 = vmul.f32 -1.442695, %v1663_v54 }
0x1478   :  { %5029 = vrcp.f32 %v1350_v53 }
0x1479   :  { %5031 = vtanh.f32 %v5757_v48 }
0x147a   :  { %5033 = vpow2.f32 %v3715_v49 }
0x1481   :  { %v5028_v57 = vpop.eup %5027 }
0x1482   :  { %1675 = vrot.lane.b32.xlu1 %v5028_v57, %s5274_s6  ;;  %v5030_v58 = vpop.eup %5029 }
0x1483   :  { %v1359_v59 = vmul.f32 %v5030_v58, %v1357_v51  ;;  %v5032_v61 = vpop.eup %5031  ;;  %v1354_v8 = vmul.f32 %v5030_v58, %v5675_v25 }
0x1484   :  { %v5034_v63 = vpop.eup %5033 }
0x1485   :  { %v1669_v3 = vadd.f32 1.0, %v5034_v63 }
0x1486   :  { %1361 = vrot.lane.b32.xlu1 %v1359_v59, %s5275_s3 }
0x1487   :  { %5035 = vrcp.f32 %v1669_v3 }
0x148a   :  { %1049 = vrot.lane.b32.xlu1 %v5032_v61, %s5274_s6  ;;  %v1985_v61 = vrot.slane %v5728_v19, 6 }
0x1491   :  { %v5036_v60 = vpop.eup %5035 }
0x1492   :  { %v1673_v18 = vmul.f32 %v5036_v60, %v5680_v30 }
0x14f4   :  { %v1676_v5 = vpop.permute.xlu1 %1675 }
0x14f5   :  { %v1678_v7 = vmul.f32 %v5036_v60, %v1676_v5 }
0x14f7   :  { %1680 = vrot.lane.b32.xlu0 %v1678_v7, %s5275_s3 }
0x14f8   :  { %v1362_v11 = vpop.permute.xlu1 %1361 }
0x14f9   :  { %v5765_v12 = vadd.f32 %v1362_v11, %v1354_v8 }
0x14fb   :  { %5037 = vtanh.f32 %v5765_v12 }
0x14fc   :  { %v1050_v24 = vpop.permute.xlu1 %1049 }
0x14fd   :  { %v1052_v28 = vmul.f32 %v5024_v43, %v1050_v24 }
0x1505   :  { %v5038_v14 = vpop.eup %5037 }
0x1506   :  { %1367 = vrot.lane.b32.xlu0 %v5038_v14, %s5274_s6 }
0x1569   :  { %v1681_v21 = vpop.permute.xlu0 %1680 }
0x156a   :  { %v5770_v22 = vadd.f32 %v1681_v21, %v1673_v18 }
0x156c   :  { %5039 = vtanh.f32 %v5770_v22 }
0x1576   :  { %v5040_v26 = vpop.eup %5039 }
0x1577   :  { %1686 = vrot.lane.b32.xlu1 %v5040_v26, %s5274_s6 }
0x1578   :  { %v1368_v25 = vpop.permute.xlu0 %1367 }
0x1579   :  { %v1370_v32 = vmul.f32 %v5030_v58, %v1368_v25 }
0x157b   :  { %1372 = vrot.lane.b32.xlu0 %v1370_v32, %s5275_s3  ;;  %1376 = vrot.lane.b32.xlu1 %v1052_v28, %s5274_s6 }
0x157f   :  { %1694 = vrot.lane.b32.xlu1 %v1370_v32, %s5274_s6 }
0x15e9   :  { %v1687_v34 = vpop.permute.xlu1 %1686 }
0x15ea   :  { %v5777_v30 = vmul.f32 %v5036_v60, %v1687_v34 }
0x15ec   :  { %1691 = vrot.lane.b32.xlu0 %v5777_v30, %s5275_s3 }
0x15ed   :  { %v1373_v0 = vpop.permute.xlu0 %1372  ;;  %v1377_v36 = vpop.permute.xlu1 %1376 }
0x15ee   :  { %v1379_v39 = vsel %vm208_vm2, %v1373_v0, %v1377_v36 }
0x15ef   :  { %4228 = vmatmul.mubr.msk.f32.vlgmr.msra.gmra.mrb[12].mxu0 %vm318_vm3, %v1379_v39 }
0x15f0   :  { %1902 = vrot.lane.b32.xlu0 %v1901_v38, %s5275_s3  ;;  %4731 = vmatpush3.bf16.msra.mxu0 %v5497_v4 }
0x15f1   :  { %4732 = vmatprep.subr.bf16.mxu0 %v5271_v1  ;;  %4276 = vmatprep.mubr.msk.f32.mxu0 %vm5272_vm0, %v5273_v2  ;;  %v1695_v29 = vpop.permute.xlu1 %1694 }
0x15f4   :  { %4734 = vmatpush3.bf16.msra.mxu0 %v5500_v6 }
0x15f5   :  { %4735 = vmatprep.subr.bf16.mxu0 %v5271_v1 }
0x15f8   :  { %4737 = vmatpush3.bf16.msra.mxu0 %v5504_v10 }
0x15f9   :  { %4738 = vmatprep.subr.bf16.mxu0 %v5271_v1 }
0x15fc   :  { %4740 = vmatpush3.bf16.msra.mxu0 %v5509_v15 }
0x15fd   :  { %4753 = vmatprep.subr.bf16.mxu0 %v5271_v1 }
0x165e   :  { %v1692_v47 = vpop.permute.xlu0 %1691 }
0x165f   :  { %v1697_v41 = vsel %vm208_vm2, %v1692_v47, %v1695_v29  ;;  %v5848_v29 = vld [vmem:[%s6199_s5] ss:$0 sm:$0xff] }
0x1660   :  { %4277 = vmatmul.mubr.msk.f32.vlgmr.msra.gmra.mrb[14].mxu0 %vm318_vm3, %v1697_v41 }
0x1661   :  { %4755 = vmatpush3.bf16.msra.mxu0 %v5408_v9  ;;  %4306 = vmatprep.mubr.msk.f32.mxu0 %vm5272_vm0, %v5273_v2 }
0x1662   :  { %4756 = vmatprep.subr.bf16.mxu0 %v5271_v1  ;;  %v1903_v43 = vpop.permute.xlu0 %1902 }
0x1665   :  { %4758 = vmatpush3.bf16.msra.mxu0 %v5415_v13 }
0x1666   :  { %4759 = vmatprep.subr.bf16.mxu0 %v5271_v1 }
0x1668   :  { %4307 = vmatmul.mubr.msk.f32.vlgmr.msra.gmra.mrb[16].mxu0 %vm208_vm2, %v1903_v43 }
0x1669   :  { %4761 = vmatpush3.bf16.msra.mxu0 %v5449_v35  ;;  %4325 = vmatprep.mubr.msk.f32.mxu0 %vm5272_vm0, %v5273_v2 }
0x166a   :  { %4762 = vmatprep.subr.bf16.mxu0 %v5271_v1 }
0x166d   :  { %4764 = vmatpush3.bf16.msra.mxu0 %v5455_v37 }
0x166e   :  { %4765 = vmatprep.subr.bf16.mxu0 %v5271_v1 }
0x1671   :  { %4767 = vmatpush3.bf16.msra.mxu0 %v5465_v40 }
0x1672   :  { %4768 = vmatprep.subr.bf16.mxu0 %v5271_v1 }
0x1675   :  { %4770 = vmatpush3.bf16.msra.mxu0 %v5476_v44 }
0x1676   :  { %4783 = vmatprep.subr.bf16.mxu0 %v5271_v1 }
0x16c2   :  { %v1449_v45 = vpop.f32.mrb[12].mxu0 }
0x16c3   :  { %v4229_v31 = vpop.f32.mrb[13].mxu0  ;;  %v1450_v19 = vadd.f32 %v5645_v42, %v1449_v45 }
0x1733   :  { %v1767_v33 = vpop.f32.mrb[14].mxu0 }
0x1734   :  { %v4278_v50 = vpop.f32.mrb[15].mxu0  ;;  %v1768_v60 = vadd.f32 %v5546_v46, %v1767_v33  ;;  %v3711_v46 = vmul.f32 -1.442695, %v1450_v19 }
0x173b   :  { %v1972_v51 = vpop.f32.mrb[16].mxu0 }
0x173c   :  { %v1976_v52 = vadd.f32 %v1972_v51, %v5430_v16  ;;  %v4308_v53 = vpop.f32.mrb[17].mxu0 }
0x173e   :  { %5041 = vtanh.f32 %v1976_v52  ;;  %v3721_v55 = vmul.f32 -1.442695, %v1976_v52 }
0x1740   :  { %5043 = vpow2.f32 %v3721_v55 }
0x1748   :  { %v5042_v54 = vpop.eup %5041 }
0x1749   :  { %1989 = vrot.lane.b32.xlu1 %v5042_v54, %s5274_s6 }
0x174a   :  { %v5044_v62 = vpop.eup %5043 }
0x174b   :  { %v1980_v56 = vadd.f32 1.0, %v5044_v62 }
0x174d   :  { %5045 = vrcp.f32 %v1980_v56 }
0x1757   :  { %v5046_v57 = vpop.eup %5045 }
0x1758   :  { %v1987_v49 = vmul.f32 %v5046_v57, %v1985_v61 }
0x17bb   :  { %v1990_v58 = vpop.permute.xlu1 %1989 }
0x17bc   :  { %v1992_v59 = vmul.f32 %v5046_v57, %v1990_v58 }
0x17be   :  { %1994 = vrot.lane.b32.xlu0 %v1992_v59, %s5275_s3 }
0x1830   :  { %v1995_v63 = vpop.permute.xlu0 %1994 }
0x1831   :  { %v5818_v3 = vadd.f32 %v1995_v63, %v1987_v49 }
0x1833   :  { %5047 = vtanh.f32 %v5818_v3 }
0x1834   :  { %5049 = vtanh.f32 %v1768_v60 }
0x1835   :  { %5051 = vtanh.f32 %v1450_v19 }
0x1836   :  { %5053 = vpow2.f32 %v3711_v46 }
0x183d   :  { %v5048_v5 = vpop.eup %5047 }
0x183e   :  { %2000 = vrot.lane.b32.xlu1 %v5048_v5, %s5274_s6  ;;  %v5050_v7 = vpop.eup %5049 }
0x183f   :  { %v5052_v14 = vpop.eup %5051 }
0x1840   :  { %v5054_v18 = vpop.eup %5053 }
0x1841   :  { %v1456_v21 = vadd.f32 1.0, %v5054_v18 }
0x1842   :  { %2008 = vrot.lane.b32.xlu1 %v5777_v30, %s5274_s6  ;;  %v3717_v30 = vmul.f32 -1.442695, %v1768_v60 }
0x1843   :  { %5055 = vrcp.f32 %v1456_v21 }
0x1844   :  { %5057 = vpow2.f32 %v3717_v30 }
0x1846   :  { %1780 = vrot.lane.b32.xlu1 %v5050_v7, %s5274_s6 }
0x184d   :  { %v5056_v28 = vpop.eup %5055 }
0x184e   :  { %v5058_v0 = vpop.eup %5057  ;;  %v1460_v45 = vmul.f32 %v5056_v28, %v5757_v48 }
0x184f   :  { %v1774_v39 = vadd.f32 1.0, %v5058_v0 }
0x18b0   :  { %v2001_v8 = vpop.permute.xlu1 %2000 }
0x18b1   :  { %v2003_v11 = vmul.f32 %v5046_v57, %v2001_v8 }
0x18b3   :  { %2005 = vrot.lane.b32.xlu0 %v2003_v11, %s5275_s3 }
0x18b4   :  { %v2009_v26 = vpop.permute.xlu1 %2008 }
0x18b7   :  { %1462 = vrot.lane.b32.xlu0 %v5052_v14, %s5274_s6 }
0x18b8   :  { %v1781_v36 = vpop.permute.xlu1 %1780 }
0x1925   :  { %v5829_v24 = vpop.permute.xlu0 %2005 }
0x1926   :  { %v2011_v25 = vsel %vm208_vm2, %v5829_v24, %v2009_v26 }
0x1927   :  { %4326 = vmatmul.mubr.msk.f32.vlgmr.msra.gmra.mrb[18].mxu0 %vm318_vm3, %v2011_v25 }
0x1928   :  { %4785 = vmatpush3.bf16.msra.mxu0 %v5564_v17  ;;  %4363 = vmatprep.mubr.msk.f32.mxu0 %vm5272_vm0, %v5273_v2 }
0x1929   :  { %v1463_v32 = vpop.permute.xlu0 %1462  ;;  %4786 = vmatprep.subr.bf16.mxu0 %v5271_v1 }
0x192a   :  { %v1465_v34 = vmul.f32 %v5056_v28, %v1463_v32 }
0x192c   :  { %1467 = vrot.lane.b32.xlu1 %v1465_v34, %s5275_s3  ;;  %4788 = vmatpush3.bf16.msra.mxu0 %v5567_v20 }
0x192d   :  { %4789 = vmatprep.subr.bf16.mxu0 %v5271_v1 }
0x1930   :  { %4791 = vmatpush3.bf16.msra.mxu0 %v5573_v23 }
0x1931   :  { %4792 = vmatprep.subr.bf16.mxu0 %v5271_v1 }
0x1934   :  { %4794 = vmatpush3.bf16.msra.mxu0 %v5580_v27 }
0x1935   :  { %4813 = vmatprep.subr.bf16.mxu0 %v5271_v1 }
0x199e   :  { %v1468_v43 = vpop.permute.xlu1 %1467 }
0x199f   :  { %v5852_v31 = vadd.f32 %v1468_v43, %v1460_v45 }
0x19fa   :  { %v2081_v38 = vpop.f32.mrb[18].mxu0 }
0x19fb   :  { %v2082_v47 = vadd.f32 %v5848_v29, %v2081_v38  ;;  %v4327_v41 = vpop.f32.mrb[19].mxu0 }
0x19fd   :  { %5059 = vtanh.f32 %v2082_v47  ;;  %v3723_v53 = vmul.f32 -1.442695, %v2082_v47 }
0x19fe   :  { %5061 = vrcp.f32 %v1774_v39 }
0x19ff   :  { %5063 = vtanh.f32 %v5852_v31 }
0x1a00   :  { %5065 = vpow2.f32 %v3723_v53 }
0x1a07   :  { %v5060_v33 = vpop.eup %5059 }
0x1a08   :  { %2094 = vrot.lane.b32.xlu0 %v5060_v33, %s5274_s6  ;;  %v5062_v50 = vpop.eup %5061 }
0x1a09   :  { %v1783_v51 = vmul.f32 %v5062_v50, %v1781_v36  ;;  %v5064_v52 = vpop.eup %5063  ;;  %v1778_v57 = vmul.f32 %v5062_v50, %v5765_v12 }
0x1a0a   :  { %v5066_v54 = vpop.eup %5065 }
0x1a0b   :  { %v2088_v55 = vadd.f32 1.0, %v5066_v54 }
0x1a0c   :  { %1785 = vrot.lane.b32.xlu0 %v1783_v51, %s5275_s3  ;;  %v2404_v51 = vrot.slane %v5818_v3, 6 }
0x1a0d   :  { %5067 = vrcp.f32 %v2088_v55  ;;  %v5918_v55 = vld [vmem:[%s6201_s7] ss:$0 sm:$0xff] }
0x1a10   :  { %1473 = vrot.lane.b32.xlu0 %v5064_v52, %s5274_s6 }
0x1a17   :  { %v5068_v48 = vpop.eup %5067 }
0x1a18   :  { %v2092_v49 = vmul.f32 %v5068_v48, %v5770_v22 }
0x1a7a   :  { %v2095_v62 = vpop.permute.xlu0 %2094 }
0x1a7b   :  { %v2097_v56 = vmul.f32 %v5068_v48, %v2095_v62 }
0x1a7d   :  { %2099 = vrot.lane.b32.xlu1 %v2097_v56, %s5275_s3 }
0x1a7e   :  { %v1786_v58 = vpop.permute.xlu0 %1785 }
0x1a7f   :  { %v5860_v59 = vadd.f32 %v1786_v58, %v1778_v57 }
0x1a81   :  { %5069 = vtanh.f32 %v5860_v59 }
0x1a82   :  { %v1474_v7 = vpop.permute.xlu0 %1473 }
0x1a83   :  { %v1476_v19 = vmul.f32 %v5056_v28, %v1474_v7 }
0x1a8b   :  { %v5070_v61 = vpop.eup %5069 }
0x1a8c   :  { %1791 = vrot.lane.b32.xlu1 %v5070_v61, %s5274_s6 }
0x1aef   :  { %v2100_v63 = vpop.permute.xlu1 %2099 }
0x1af0   :  { %v5865_v60 = vadd.f32 %v2100_v63, %v2092_v49 }
0x1af2   :  { %5071 = vtanh.f32 %v5865_v60 }
0x1afc   :  { %v5072_v5 = vpop.eup %5071 }
0x1afd   :  { %2105 = vrot.lane.b32.xlu0 %v5072_v5, %s5274_s6 }
0x1afe   :  { %v1792_v12 = vpop.permute.xlu1 %1791 }
0x1aff   :  { %v1794_v8 = vmul.f32 %v5062_v50, %v1792_v12 }
0x1b01   :  { %1796 = vrot.lane.b32.xlu1 %v1794_v8, %s5275_s3  ;;  %1800 = vrot.lane.b32.xlu0 %v1476_v19, %s5274_s6 }
0x1b05   :  { %2113 = vrot.lane.b32.xlu0 %v1794_v8, %s5274_s6 }
0x1b6f   :  { %v2106_v11 = vpop.permute.xlu0 %2105 }
0x1b70   :  { %v5872_v22 = vmul.f32 %v5068_v48, %v2106_v11 }
0x1b72   :  { %2110 = vrot.lane.b32.xlu1 %v5872_v22, %s5275_s3  ;;  %v2427_v56 = vrot.slane %v5872_v22, 6 }
0x1b73   :  { %v1797_v14 = vpop.permute.xlu1 %1796  ;;  %v1801_v46 = vpop.permute.xlu0 %1800 }
0x1b74   :  { %v1803_v18 = vsel %vm208_vm2, %v1797_v14, %v1801_v46 }
0x1b75   :  { %4296 = vmatmul.mubr.msk.f32.vlgmr.msra.gmra.mrb[16].mxu1 %vm318_vm3, %v1803_v18 }
0x1b76   :  { %4773 = vmatpush3.bf16.msra.mxu1 %v5497_v4  ;;  %4344 = vmatprep.mubr.msk.f32.mxu1 %vm5272_vm0, %v5273_v2 }
0x1b77   :  { %4774 = vmatprep.subr.bf16.mxu1 %v5271_v1  ;;  %v2114_v21 = vpop.permute.xlu0 %2113 }
0x1b7a   :  { %4776 = vmatpush3.bf16.msra.mxu1 %v5500_v6 }
0x1b7b   :  { %4777 = vmatprep.subr.bf16.mxu1 %v5271_v1 }
0x1b7e   :  { %4779 = vmatpush3.bf16.msra.mxu1 %v5504_v10 }
0x1b7f   :  { %4780 = vmatprep.subr.bf16.mxu1 %v5271_v1 }
0x1b82   :  { %4782 = vmatpush3.bf16.msra.mxu1 %v5509_v15 }
0x1b83   :  { %4795 = vmatprep.subr.bf16.mxu1 %v5271_v1 }
0x1be4   :  { %v2111_v26 = vpop.permute.xlu1 %2110 }
0x1be5   :  { %v2116_v25 = vsel %vm208_vm2, %v2111_v26, %v2114_v21 }
0x1be6   :  { %4345 = vmatmul.mubr.msk.f32.vlgmr.msra.gmra.mrb[18].mxu1 %vm318_vm3, %v2116_v25 }
0x1be7   :  { %4797 = vmatpush3.bf16.msra.mxu1 %v5408_v9  ;;  %4374 = vmatprep.mubr.msk.f32.mxu1 %vm5272_vm0, %v5273_v2 }
0x1be8   :  { %4798 = vmatprep.subr.bf16.mxu1 %v5271_v1 }
0x1beb   :  { %4800 = vmatpush3.bf16.msra.mxu1 %v5415_v13 }
0x1bec   :  { %4801 = vmatprep.subr.bf16.mxu1 %v5271_v1 }
0x1bee   :  { %4375 = vmatmul.mubr.msk.f32.vlgmr.msra.gmra.mrb[20].mxu1 %vm208_vm2, %v5829_v24 }
0x1bef   :  { %4803 = vmatpush3.bf16.msra.mxu1 %v5449_v35  ;;  %4393 = vmatprep.mubr.msk.f32.mxu1 %vm5272_vm0, %v5273_v2 }
0x1bf0   :  { %4804 = vmatprep.subr.bf16.mxu1 %v5271_v1 }
0x1bf3   :  { %4806 = vmatpush3.bf16.msra.mxu1 %v5455_v37 }
0x1bf4   :  { %4807 = vmatprep.subr.bf16.mxu1 %v5271_v1 }
0x1bf7   :  { %4809 = vmatpush3.bf16.msra.mxu1 %v5465_v40 }
0x1bf8   :  { %4810 = vmatprep.subr.bf16.mxu1 %v5271_v1 }
0x1bfb   :  { %4812 = vmatpush3.bf16.msra.mxu1 %v5476_v44 }
0x1bfc   :  { %4825 = vmatprep.subr.bf16.mxu1 %v5271_v1 }
0x1c48   :  { %v1873_v24 = vpop.f32.mrb[16].mxu1 }
0x1c49   :  { %v4297_v28 = vpop.f32.mrb[17].mxu1  ;;  %v1874_v57 = vadd.f32 %v5645_v42, %v1873_v24 }
0x1c4b   :  { %v3719_v63 = vmul.f32 -1.442695, %v1874_v57 }
0x1cb9   :  { %v2186_v32 = vpop.f32.mrb[18].mxu1 }
0x1cba   :  { %v4346_v34 = vpop.f32.mrb[19].mxu1  ;;  %v2187_v48 = vadd.f32 %v5918_v55, %v2186_v32 }
0x1cbc   :  { %v3725_v46 = vmul.f32 -1.442695, %v2187_v48 }
0x1cc1   :  { %v2388_v30 = vpop.f32.mrb[20].mxu1 }
0x1cc2   :  { %v2393_v0 = vrot.slane %v2388_v30, 6  ;;  %v4376_v36 = vpop.f32.mrb[21].mxu1 }
0x1cc4   :  { %v2395_v38 = vadd.f32 %v2393_v0, %v5430_v16 }
0x1cc6   :  { %5073 = vtanh.f32 %v2395_v38  ;;  %v3729_v47 = vmul.f32 -1.442695, %v2395_v38 }
0x1cc8   :  { %5075 = vpow2.f32 %v3729_v47 }
0x1cd0   :  { %v5074_v39 = vpop.eup %5073 }
0x1cd1   :  { %2408 = vrot.lane.b32.xlu1 %v5074_v39, %s5274_s6 }
0x1cd2   :  { %v5076_v41 = vpop.eup %5075 }
0x1cd3   :  { %v2399_v43 = vadd.f32 1.0, %v5076_v41 }
0x1cd5   :  { %5077 = vrcp.f32 %v2399_v43 }
0x1cdf   :  { %v5078_v45 = vpop.eup %5077 }
0x1ce0   :  { %v2406_v52 = vmul.f32 %v5078_v45, %v2404_v51 }
0x1d43   :  { %v2409_v33 = vpop.permute.xlu1 %2408 }
0x1d44   :  { %v2411_v50 = vmul.f32 %v5078_v45, %v2409_v33 }
0x1d46   :  { %2413 = vrot.lane.b32.xlu0 %v2411_v50, %s5275_s3 }
0x1db8   :  { %v2414_v53 = vpop.permute.xlu0 %2413 }
0x1db9   :  { %v5912_v54 = vadd.f32 %v2414_v53, %v2406_v52 }
0x1dbb   :  { %5079 = vtanh.f32 %v5912_v54 }
0x1dbc   :  { %5081 = vtanh.f32 %v2187_v48 }
0x1dbd   :  { %5083 = vtanh.f32 %v1874_v57 }
0x1dbe   :  { %5085 = vpow2.f32 %v3719_v63 }
0x1dc5   :  { %v5080_v62 = vpop.eup %5079 }
0x1dc6   :  { %2419 = vrot.lane.b32.xlu1 %v5080_v62, %s5274_s6  ;;  %v5082_v3 = vpop.eup %5081 }
0x1dc7   :  { %v5084_v49 = vpop.eup %5083 }
0x1dc8   :  { %v5086_v5 = vpop.eup %5085 }
0x1dc9   :  { %v1880_v7 = vadd.f32 1.0, %v5086_v5 }
0x1dca   :  { %2428 = vrot.lane.b32.xlu1 %v2427_v56, %s5274_s6 }
0x1dcb   :  { %5087 = vrcp.f32 %v1880_v7 }
0x1dcc   :  { %5089 = vpow2.f32 %v3725_v46 }
0x1dce   :  { %2199 = vrot.lane.b32.xlu1 %v5082_v3, %s5274_s6 }
0x1dd5   :  { %v5088_v11 = vpop.eup %5087 }
0x1dd6   :  { %v5090_v18 = vpop.eup %5089  ;;  %v1884_v34 = vmul.f32 %v5088_v11, %v5852_v31 }
0x1dd7   :  { %v2193_v25 = vadd.f32 1.0, %v5090_v18 }
0x1e38   :  { %v2420_v58 = vpop.permute.xlu1 %2419 }
0x1e39   :  { %v5926_v61 = vmul.f32 %v5078_v45, %v2420_v58 }
0x1e3b   :  { %2424 = vrot.lane.b32.xlu0 %v5926_v61, %s5275_s3 }
0x1e3c   :  { %v2429_v12 = vpop.permute.xlu1 %2428 }
0x1e3f   :  { %1886 = vrot.lane.b32.xlu0 %v5084_v49, %s5274_s6 }
0x1e40   :  { %v2200_v21 = vpop.permute.xlu1 %2199 }
0x1ead   :  { %v2425_v19 = vpop.permute.xlu0 %2424 }
0x1eae   :  { %v2431_v8 = vsel %vm208_vm2, %v2425_v19, %v2429_v12  ;;  %v2741_v12 = vrot.slane %v5926_v61, 2 }
0x1eaf   :  { %v2433_v42 = vrot.slane %v2431_v8, 2 }
0x1eb1   :  { %v1887_v22 = vpop.permute.xlu0 %1886  ;;  %4394 = vmatmul.mubr.msk.f32.vlgmr.msra.gmra.mrb[22].mxu1 %vm318_vm3, %v2433_v42 }
0x1eb2   :  { %v1889_v14 = vmul.f32 %v5088_v11, %v1887_v22  ;;  %4827 = vmatpush3.bf16.msra.mxu1 %v5564_v17  ;;  %4431 = vmatprep.mubr.msk.f32.mxu1 %vm5272_vm0, %v5273_v2 }
0x1eb3   :  { %4828 = vmatprep.subr.bf16.mxu1 %v5271_v1 }
0x1eb4   :  { %1891 = vrot.lane.b32.xlu1 %v1889_v14, %s5275_s3 }
0x1eb6   :  { %4830 = vmatpush3.bf16.msra.mxu1 %v5567_v20 }
0x1eb7   :  { %4831 = vmatprep.subr.bf16.mxu1 %v5271_v1 }
0x1eba   :  { %4833 = vmatpush3.bf16.msra.mxu1 %v5573_v23 }
0x1ebb   :  { %4834 = vmatprep.subr.bf16.mxu1 %v5271_v1 }
0x1ebe   :  { %4836 = vmatpush3.bf16.msra.mxu1 %v5580_v27 }
0x1ebf   :  { %4855 = vmatprep.subr.bf16.mxu1 %v5271_v1 }
0x1f26   :  { %v1892_v32 = vpop.permute.xlu1 %1891 }
0x1f27   :  { %v5946_v30 = vadd.f32 %v1892_v32, %v1884_v34 }
0x1f84   :  { %v2502_v26 = vpop.f32.mrb[22].mxu1 }
0x1f85   :  { %v2503_v24 = vadd.f32 %v5848_v29, %v2502_v26  ;;  %v4395_v28 = vpop.f32.mrb[23].mxu1 }
0x1f87   :  { %5091 = vtanh.f32 %v2503_v24  ;;  %v3731_v47 = vmul.f32 -1.442695, %v2503_v24 }
0x1f88   :  { %5093 = vrcp.f32 %v2193_v25 }
0x1f89   :  { %5095 = vtanh.f32 %v5946_v30 }
0x1f8a   :  { %5097 = vpow2.f32 %v3731_v47  ;;  %v2828_v47 = vrot.slane %v5912_v54, 6  ;;  %v6018_v54 = vld [vmem:[%s6203_s9] ss:$0 sm:$0xff] }
0x1f91   :  { %v5092_v0 = vpop.eup %5091 }
0x1f92   :  { %2515 = vrot.lane.b32.xlu0 %v5092_v0, %s5274_s6  ;;  %v5094_v36 = vpop.eup %5093 }
0x1f93   :  { %v2202_v38 = vmul.f32 %v5094_v36, %v2200_v21  ;;  %v5096_v39 = vpop.eup %5095  ;;  %v2197_v50 = vmul.f32 %v5094_v36, %v5860_v59 }
0x1f94   :  { %v5098_v41 = vpop.eup %5097 }
0x1f95   :  { %v2509_v43 = vadd.f32 1.0, %v5098_v41 }
0x1f96   :  { %2204 = vrot.lane.b32.xlu0 %v2202_v38, %s5275_s3 }
0x1f97   :  { %5099 = vrcp.f32 %v2509_v43 }
0x1f9a   :  { %1897 = vrot.lane.b32.xlu0 %v5096_v39, %s5274_s6 }
0x1fa1   :  { %v5100_v31 = vpop.eup %5099 }
0x1fa2   :  { %v2513_v48 = vmul.f32 %v5100_v31, %v5865_v60 }
0x2004   :  { %v2516_v45 = vpop.permute.xlu0 %2515 }
0x2005   :  { %v2518_v33 = vmul.f32 %v5100_v31, %v2516_v45 }
0x2007   :  { %2520 = vrot.lane.b32.xlu1 %v2518_v33, %s5275_s3 }
0x2008   :  { %v2205_v51 = vpop.permute.xlu0 %2204 }
0x2009   :  { %v5954_v52 = vadd.f32 %v2205_v51, %v2197_v50 }
0x200b   :  { %5101 = vtanh.f32 %v5954_v52 }
0x200c   :  { %v1898_v57 = vpop.permute.xlu0 %1897 }
0x200d   :  { %v1900_v58 = vmul.f32 %v5088_v11, %v1898_v57 }
0x2015   :  { %v5102_v53 = vpop.eup %5101 }
0x2016   :  { %2210 = vrot.lane.b32.xlu1 %v5102_v53, %s5274_s6 }
0x2079   :  { %v2521_v62 = vpop.permute.xlu1 %2520 }
0x207a   :  { %v5959_v56 = vadd.f32 %v2521_v62, %v2513_v48 }
0x207c   :  { %5103 = vtanh.f32 %v5959_v56 }
0x2086   :  { %v5104_v3 = vpop.eup %5103 }
0x2087   :  { %2526 = vrot.lane.b32.xlu0 %v5104_v3, %s5274_s6 }
0x2088   :  { %v2211_v59 = vpop.permute.xlu1 %2210 }
0x2089   :  { %v2213_v49 = vmul.f32 %v5094_v36, %v2211_v59 }
0x208b   :  { %2215 = vrot.lane.b32.xlu1 %v2213_v49, %s5275_s3  ;;  %2219 = vrot.lane.b32.xlu0 %v1900_v58, %s5274_s6 }
0x208f   :  { %2534 = vrot.lane.b32.xlu0 %v2213_v49, %s5274_s6 }
0x20f9   :  { %v2527_v63 = vpop.permute.xlu0 %2526 }
0x20fa   :  { %v5966_v60 = vmul.f32 %v5100_v31, %v2527_v63 }
0x20fc   :  { %2531 = vrot.lane.b32.xlu1 %v5966_v60, %s5275_s3  ;;  %v2851_v50 = vrot.slane %v5966_v60, 4 }
0x20fd   :  { %v2216_v5 = vpop.permute.xlu1 %2215  ;;  %v2220_v7 = vpop.permute.xlu0 %2219 }
0x20fe   :  { %v2222_v19 = vsel %vm208_vm2, %v2216_v5, %v2220_v7 }
0x20ff   :  { %4364 = vmatmul.mubr.msk.f32.vlgmr.msra.gmra.mrb[20].mxu0 %vm318_vm3, %v2222_v19 }
0x2100   :  { %2742 = vrot.lane.b32.xlu1 %v2741_v12, %s5275_s3  ;;  %4815 = vmatpush3.bf16.msra.mxu0 %v5497_v4 }
0x2101   :  { %4816 = vmatprep.subr.bf16.mxu0 %v5271_v1  ;;  %4412 = vmatprep.mubr.msk.f32.mxu0 %vm5272_vm0, %v5273_v2  ;;  %v2535_v61 = vpop.permute.xlu0 %2534 }
0x2104   :  { %4818 = vmatpush3.bf16.msra.mxu0 %v5500_v6 }
0x2105   :  { %4819 = vmatprep.subr.bf16.mxu0 %v5271_v1 }
0x2108   :  { %4821 = vmatpush3.bf16.msra.mxu0 %v5504_v10 }
0x2109   :  { %4822 = vmatprep.subr.bf16.mxu0 %v5271_v1 }
0x210c   :  { %4824 = vmatpush3.bf16.msra.mxu0 %v5509_v15 }
0x210d   :  { %4837 = vmatprep.subr.bf16.mxu0 %v5271_v1 }
0x216e   :  { %v2532_v8 = vpop.permute.xlu1 %2531 }
0x216f   :  { %v2537_v42 = vsel %vm208_vm2, %v2532_v8, %v2535_v61 }
0x2170   :  { %4413 = vmatmul.mubr.msk.f32.vlgmr.msra.gmra.mrb[22].mxu0 %vm318_vm3, %v2537_v42 }
0x2171   :  { %4839 = vmatpush3.bf16.msra.mxu0 %v5408_v9  ;;  %4442 = vmatprep.mubr.msk.f32.mxu0 %vm5272_vm0, %v5273_v2 }
0x2172   :  { %4840 = vmatprep.subr.bf16.mxu0 %v5271_v1  ;;  %v2743_v11 = vpop.permute.xlu1 %2742 }
0x2175   :  { %4842 = vmatpush3.bf16.msra.mxu0 %v5415_v13 }
0x2176   :  { %4843 = vmatprep.subr.bf16.mxu0 %v5271_v1 }
0x2178   :  { %4443 = vmatmul.mubr.msk.f32.vlgmr.msra.gmra.mrb[24].mxu0 %vm208_vm2, %v2743_v11 }
0x2179   :  { %4845 = vmatpush3.bf16.msra.mxu0 %v5449_v35  ;;  %4461 = vmatprep.mubr.msk.f32.mxu0 %vm5272_vm0, %v5273_v2 }
0x217a   :  { %4846 = vmatprep.subr.bf16.mxu0 %v5271_v1 }
0x217d   :  { %4848 = vmatpush3.bf16.msra.mxu0 %v5455_v37 }
0x217e   :  { %4849 = vmatprep.subr.bf16.mxu0 %v5271_v1 }
0x2181   :  { %4851 = vmatpush3.bf16.msra.mxu0 %v5465_v40 }
0x2182   :  { %4852 = vmatprep.subr.bf16.mxu0 %v5271_v1 }
0x2185   :  { %4854 = vmatpush3.bf16.msra.mxu0 %v5476_v44 }
0x2186   :  { %4867 = vmatprep.subr.bf16.mxu0 %v5271_v1 }
0x21d2   :  { %v2292_v22 = vpop.f32.mrb[20].mxu0 }
0x21d3   :  { %v4365_v14 = vpop.f32.mrb[21].mxu0  ;;  %v2293_v53 = vadd.f32 %v6018_v54, %v2292_v22 }
0x21d5   :  { %v3727_v57 = vmul.f32 -1.442695, %v2293_v53 }
0x2243   :  { %v2607_v46 = vpop.f32.mrb[22].mxu0 }
0x2244   :  { %v4414_v18 = vpop.f32.mrb[23].mxu0  ;;  %v2608_v45 = vadd.f32 %v5918_v55, %v2607_v46 }
0x2246   :  { %v3733_v61 = vmul.f32 -1.442695, %v2608_v45 }
0x224b   :  { %v2812_v21 = vpop.f32.mrb[24].mxu0 }
0x224c   :  { %v2817_v26 = vrot.slane %v2812_v21, 4  ;;  %v4444_v25 = vpop.f32.mrb[25].mxu0 }
0x224e   :  { %v2819_v24 = vadd.f32 %v2817_v26, %v5430_v16 }
0x2250   :  { %5105 = vtanh.f32 %v2819_v24  ;;  %v3737_v32 = vmul.f32 -1.442695, %v2819_v24 }
0x2252   :  { %5107 = vpow2.f32 %v3737_v32 }
0x225a   :  { %v5106_v28 = vpop.eup %5105 }
0x225b   :  { %2832 = vrot.lane.b32.xlu0 %v5106_v28, %s5274_s6 }
0x225c   :  { %v5108_v34 = vpop.eup %5107 }
0x225d   :  { %v2823_v0 = vadd.f32 1.0, %v5108_v34 }
0x225f   :  { %5109 = vrcp.f32 %v2823_v0 }
0x2269   :  { %v5110_v36 = vpop.eup %5109 }
0x226a   :  { %v2830_v41 = vmul.f32 %v5110_v36, %v2828_v47 }
0x22cd   :  { %v2833_v38 = vpop.permute.xlu0 %2832 }
0x22ce   :  { %v2835_v39 = vmul.f32 %v5110_v36, %v2833_v38 }
0x22d0   :  { %2837 = vrot.lane.b32.xlu1 %v2835_v39, %s5275_s3 }
0x2342   :  { %v2838_v43 = vpop.permute.xlu1 %2837 }
0x2343   :  { %v6007_v31 = vadd.f32 %v2838_v43, %v2830_v41 }
0x2345   :  { %5111 = vtanh.f32 %v6007_v31 }
0x2346   :  { %5113 = vtanh.f32 %v2608_v45 }
0x2347   :  { %5115 = vtanh.f32 %v2293_v53 }
0x2348   :  { %5117 = vpow2.f32 %v3727_v57 }
0x234f   :  { %v5112_v33 = vpop.eup %5111 }
0x2350   :  { %2843 = vrot.lane.b32.xlu0 %v5112_v33, %s5274_s6  ;;  %v5114_v51 = vpop.eup %5113 }
0x2351   :  { %v5116_v3 = vpop.eup %5115 }
0x2352   :  { %v5118_v59 = vpop.eup %5117 }
0x2353   :  { %v2299_v58 = vadd.f32 1.0, %v5118_v59 }
0x2354   :  { %2852 = vrot.lane.b32.xlu0 %v2851_v50, %s5274_s6 }
0x2355   :  { %5119 = vrcp.f32 %v2299_v58 }
0x2356   :  { %5121 = vpow2.f32 %v3733_v61 }
0x2358   :  { %2620 = vrot.lane.b32.xlu0 %v5114_v51, %s5274_s6 }
0x235f   :  { %v5120_v7 = vpop.eup %5119 }
0x2360   :  { %v5122_v8 = vpop.eup %5121  ;;  %v2303_v21 = vmul.f32 %v5120_v7, %v5946_v30 }
0x2361   :  { %v2614_v22 = vadd.f32 1.0, %v5122_v8 }
0x23c2   :  { %v2844_v48 = vpop.permute.xlu0 %2843 }
0x23c3   :  { %v6021_v62 = vmul.f32 %v5110_v36, %v2844_v48 }
0x23c5   :  { %2848 = vrot.lane.b32.xlu1 %v6021_v62, %s5275_s3 }
0x23c6   :  { %v2853_v49 = vpop.permute.xlu0 %2852 }
0x23c9   :  { %2305 = vrot.lane.b32.xlu1 %v5116_v3, %s5274_s6 }
0x23ca   :  { %v2621_v42 = vpop.permute.xlu0 %2620 }
0x2437   :  { %v2849_v63 = vpop.permute.xlu1 %2848 }
0x2438   :  { %v2855_v60 = vsel %vm208_vm2, %v2849_v63, %v2853_v49  ;;  %v3165_v63 = vrot.slane %v6021_v62, 4 }
0x2439   :  { %v2857_v5 = vrot.slane %v2855_v60, 4 }
0x243b   :  { %v2306_v12 = vpop.permute.xlu1 %2305  ;;  %4462 = vmatmul.mubr.msk.f32.vlgmr.msra.gmra.mrb[26].mxu0 %vm318_vm3, %v2857_v5 }
0x243c   :  { %v2308_v19 = vmul.f32 %v5120_v7, %v2306_v12  ;;  %4869 = vmatpush3.bf16.msra.mxu0 %v5564_v17  ;;  %4499 = vmatprep.mubr.msk.f32.mxu0 %vm5272_vm0, %v5273_v2 }
0x243d   :  { %4870 = vmatprep.subr.bf16.mxu0 %v5271_v1 }
0x243e   :  { %2310 = vrot.lane.b32.xlu0 %v2308_v19, %s5275_s3 }
0x2440   :  { %4872 = vmatpush3.bf16.msra.mxu0 %v5567_v20 }
0x2441   :  { %4873 = vmatprep.subr.bf16.mxu0 %v5271_v1 }
0x2444   :  { %4875 = vmatpush3.bf16.msra.mxu0 %v5573_v23 }
0x2445   :  { %4876 = vmatprep.subr.bf16.mxu0 %v5271_v1 }
0x2448   :  { %4878 = vmatpush3.bf16.msra.mxu0 %v5580_v27 }
0x2449   :  { %4897 = vmatprep.subr.bf16.mxu0 %v5271_v1 }
0x24b0   :  { %v2311_v18 = vpop.permute.xlu0 %2310 }
0x24b1   :  { %v6041_v26 = vadd.f32 %v2311_v18, %v2303_v21  ;;  %v3252_v21 = vrot.slane %v6007_v31, 6 }
0x250e   :  { %v2926_v11 = vpop.f32.mrb[26].mxu0 }
0x250f   :  { %v2927_v14 = vadd.f32 %v5848_v29, %v2926_v11  ;;  %v4463_v46 = vpop.f32.mrb[27].mxu0 }
0x2511   :  { %5123 = vtanh.f32 %v2927_v14  ;;  %v3739_v34 = vmul.f32 -1.442695, %v2927_v14 }
0x2512   :  { %5125 = vrcp.f32 %v2614_v22 }
0x2513   :  { %5127 = vtanh.f32 %v6041_v26 }
0x2514   :  { %5129 = vpow2.f32 %v3739_v34 }
0x251b   :  { %v5124_v25 = vpop.eup %5123 }
0x251c   :  { %2939 = vrot.lane.b32.xlu1 %v5124_v25, %s5274_s6  ;;  %v5126_v24 = vpop.eup %5125 }
0x251d   :  { %v2623_v28 = vmul.f32 %v5126_v24, %v2621_v42  ;;  %v5128_v32 = vpop.eup %5127  ;;  %v2618_v47 = vmul.f32 %v5126_v24, %v5954_v52 }
0x251e   :  { %v5130_v0 = vpop.eup %5129 }
0x251f   :  { %v2933_v36 = vadd.f32 1.0, %v5130_v0 }
0x2520   :  { %2625 = vrot.lane.b32.xlu1 %v2623_v28, %s5275_s3 }
0x2521   :  { %5131 = vrcp.f32 %v2933_v36 }
0x2524   :  { %2316 = vrot.lane.b32.xlu1 %v5128_v32, %s5274_s6 }
0x252b   :  { %v5132_v30 = vpop.eup %5131 }
0x252c   :  { %v2937_v33 = vmul.f32 %v5132_v30, %v5959_v56 }
0x258e   :  { %v2940_v38 = vpop.permute.xlu1 %2939 }
0x258f   :  { %v2942_v39 = vmul.f32 %v5132_v30, %v2940_v38 }
0x2591   :  { %2944 = vrot.lane.b32.xlu0 %v2942_v39, %s5275_s3 }
0x2592   :  { %v2626_v41 = vpop.permute.xlu1 %2625 }
0x2593   :  { %v6049_v43 = vadd.f32 %v2626_v41, %v2618_v47 }
0x2595   :  { %5133 = vtanh.f32 %v6049_v43 }
0x2596   :  { %v2317_v48 = vpop.permute.xlu1 %2316 }
0x2597   :  { %v2319_v3 = vmul.f32 %v5120_v7, %v2317_v48 }
0x259f   :  { %v5134_v45 = vpop.eup %5133 }
0x25a0   :  { %2631 = vrot.lane.b32.xlu0 %v5134_v45, %s5274_s6 }
0x2603   :  { %v2945_v50 = vpop.permute.xlu0 %2944 }
0x2604   :  { %v6054_v51 = vadd.f32 %v2945_v50, %v2937_v33 }
0x2606   :  { %5135 = vtanh.f32 %v6054_v51 }
0x2610   :  { %v5136_v53 = vpop.eup %5135 }
0x2611   :  { %2950 = vrot.lane.b32.xlu1 %v5136_v53, %s5274_s6 }
0x2612   :  { %v2632_v52 = vpop.permute.xlu0 %2631 }
0x2613   :  { %v2634_v57 = vmul.f32 %v5126_v24, %v2632_v52 }
0x2615   :  { %2636 = vrot.lane.b32.xlu0 %v2634_v57, %s5275_s3  ;;  %2640 = vrot.lane.b32.xlu1 %v2319_v3, %s5274_s6 }
0x2619   :  { %2958 = vrot.lane.b32.xlu1 %v2634_v57, %s5274_s6 }
0x2683   :  { %v2951_v59 = vpop.permute.xlu1 %2950 }
0x2684   :  { %v6061_v56 = vmul.f32 %v5132_v30, %v2951_v59 }
0x2686   :  { %2955 = vrot.lane.b32.xlu0 %v6061_v56, %s5275_s3  ;;  %v3275_v34 = vrot.slane %v6061_v56, 2 }
0x2687   :  { %v2637_v58 = vpop.permute.xlu0 %2636  ;;  %v2641_v49 = vpop.permute.xlu1 %2640 }
0x2688   :  { %v2643_v60 = vsel %vm208_vm2, %v2637_v58, %v2641_v49 }
0x2689   :  { %4432 = vmatmul.mubr.msk.f32.vlgmr.msra.gmra.mrb[24].mxu1 %vm318_vm3, %v2643_v60 }
0x268a   :  { %3166 = vrot.lane.b32.xlu0 %v3165_v63, %s5275_s3  ;;  %4857 = vmatpush3.bf16.msra.mxu1 %v5497_v4 }
0x268b   :  { %4858 = vmatprep.subr.bf16.mxu1 %v5271_v1  ;;  %4480 = vmatprep.mubr.msk.f32.mxu1 %vm5272_vm0, %v5273_v2  ;;  %v2959_v62 = vpop.permute.xlu1 %2958 }
0x268e   :  { %4860 = vmatpush3.bf16.msra.mxu1 %v5500_v6 }
0x268f   :  { %4861 = vmatprep.subr.bf16.mxu1 %v5271_v1 }
0x2692   :  { %4863 = vmatpush3.bf16.msra.mxu1 %v5504_v10 }
0x2693   :  { %4864 = vmatprep.subr.bf16.mxu1 %v5271_v1 }
0x2696   :  { %4866 = vmatpush3.bf16.msra.mxu1 %v5509_v15 }
0x2697   :  { %4879 = vmatprep.subr.bf16.mxu1 %v5271_v1 }
0x26f8   :  { %v2956_v5 = vpop.permute.xlu0 %2955 }
0x26f9   :  { %v2961_v7 = vsel %vm208_vm2, %v2956_v5, %v2959_v62 }
0x26fa   :  { %4481 = vmatmul.mubr.msk.f32.vlgmr.msra.gmra.mrb[26].mxu1 %vm318_vm3, %v2961_v7 }
0x26fb   :  { %4881 = vmatpush3.bf16.msra.mxu1 %v5408_v9  ;;  %4510 = vmatprep.mubr.msk.f32.mxu1 %vm5272_vm0, %v5273_v2 }
0x26fc   :  { %4882 = vmatprep.subr.bf16.mxu1 %v5271_v1  ;;  %v3167_v12 = vpop.permute.xlu0 %3166 }
0x26ff   :  { %4884 = vmatpush3.bf16.msra.mxu1 %v5415_v13 }
0x2700   :  { %4885 = vmatprep.subr.bf16.mxu1 %v5271_v1 }
0x2702   :  { %4511 = vmatmul.mubr.msk.f32.vlgmr.msra.gmra.mrb[28].mxu1 %vm208_vm2, %v3167_v12 }
0x2703   :  { %4887 = vmatpush3.bf16.msra.mxu1 %v5449_v35  ;;  %4529 = vmatprep.mubr.msk.f32.mxu1 %vm5272_vm0, %v5273_v2 }
0x2704   :  { %4888 = vmatprep.subr.bf16.mxu1 %v5271_v1 }
0x2707   :  { %4890 = vmatpush3.bf16.msra.mxu1 %v5455_v37 }
0x2708   :  { %4891 = vmatprep.subr.bf16.mxu1 %v5271_v1 }
0x270b   :  { %4893 = vmatpush3.bf16.msra.mxu1 %v5465_v40 }
0x270c   :  { %4894 = vmatprep.subr.bf16.mxu1 %v5271_v1 }
0x270f   :  { %4896 = vmatpush3.bf16.msra.mxu1 %v5476_v44 }
0x2710   :  { %4909 = vmatprep.subr.bf16.mxu1 %v5271_v1 }
0x275c   :  { %v2713_v9 = vpop.f32.mrb[24].mxu1 }
0x275d   :  { %v4433_v13 = vpop.f32.mrb[25].mxu1  ;;  %v2714_v36 = vadd.f32 %v6018_v54, %v2713_v9 }
0x275f   :  { %v3735_v39 = vmul.f32 -1.442695, %v2714_v36 }
0x27cd   :  { %v3031_v35 = vpop.f32.mrb[26].mxu1 }
0x27ce   :  { %v4482_v19 = vpop.f32.mrb[27].mxu1 }
0x27d5   :  { %v3236_v61 = vpop.f32.mrb[28].mxu1 }
0x27d6   :  { %v3241_v8 = vrot.slane %v3236_v61, 2  ;;  %v4512_v42 = vpop.f32.mrb[29].mxu1 }
0x27d8   :  { %v3243_v11 = vadd.f32 %v3241_v8, %v5430_v16  ;;  %v3032_v16 = vadd.f32 %v5918_v55, %v3031_v35 }
0x27da   :  { %5137 = vtanh.f32 %v3243_v11  ;;  %v3745_v40 = vmul.f32 -1.442695, %v3243_v11  ;;  %v3741_v57 = vmul.f32 -1.442695, %v3032_v16 }
0x27dc   :  { %5139 = vpow2.f32 %v3745_v40 }
0x27e4   :  { %v5138_v37 = vpop.eup %5137 }
0x27e5   :  { %3256 = vrot.lane.b32.xlu1 %v5138_v37, %s5274_s6 }
0x27e6   :  { %v5140_v22 = vpop.eup %5139 }
0x27e7   :  { %v3247_v14 = vadd.f32 1.0, %v5140_v22 }
0x27e9   :  { %5141 = vrcp.f32 %v3247_v14 }
0x27f3   :  { %v5142_v44 = vpop.eup %5141 }
0x27f4   :  { %v3254_v25 = vmul.f32 %v5142_v44, %v3252_v21 }
0x2857   :  { %v3257_v46 = vpop.permute.xlu1 %3256 }
0x2858   :  { %v3259_v18 = vmul.f32 %v5142_v44, %v3257_v46 }
0x285a   :  { %3261 = vrot.lane.b32.xlu0 %v3259_v18, %s5275_s3 }
0x28cc   :  { %v3262_v24 = vpop.permute.xlu0 %3261 }
0x28cd   :  { %v3264_v28 = vadd.f32 %v3262_v24, %v3254_v25 }
0x28cf   :  { %5143 = vtanh.f32 %v3264_v28 }
0x28d0   :  { %5145 = vtanh.f32 %v3032_v16 }
0x28d1   :  { %5147 = vtanh.f32 %v2714_v36 }
0x28d2   :  { %5149 = vpow2.f32 %v3735_v39 }
0x28d9   :  { %v5144_v32 = vpop.eup %5143 }
0x28da   :  { %3267 = vrot.lane.b32.xlu1 %v5144_v32, %s5274_s6  ;;  %v5146_v0 = vpop.eup %5145 }
0x28db   :  { %v5148_v38 = vpop.eup %5147 }
0x28dc   :  { %v5150_v47 = vpop.eup %5149 }
0x28dd   :  { %v2720_v41 = vadd.f32 1.0, %v5150_v47 }
0x28de   :  { %3276 = vrot.lane.b32.xlu1 %v3275_v34, %s5274_s6 }
0x28df   :  { %5151 = vrcp.f32 %v2720_v41 }
0x28e0   :  { %5153 = vpow2.f32 %v3741_v57 }
0x28e2   :  { %3044 = vrot.lane.b32.xlu1 %v5146_v0, %s5274_s6 }
0x28e9   :  { %v5152_v48 = vpop.eup %5151 }
0x294c   :  { %v3268_v31 = vpop.permute.xlu1 %3267 }
0x294d   :  { %v3270_v30 = vmul.f32 %v5142_v44, %v3268_v31 }
0x294f   :  { %3272 = vrot.lane.b32.xlu0 %v3270_v30, %s5275_s3 }
0x2950   :  { %v3277_v45 = vpop.permute.xlu1 %3276 }
0x2953   :  { %2726 = vrot.lane.b32.xlu0 %v5148_v38, %s5274_s6 }
0x2954   :  { %v3045_v59 = vpop.permute.xlu1 %3044 }
0x29c1   :  { %v3273_v33 = vpop.permute.xlu0 %3272 }
0x29c2   :  { %v3279_v50 = vsel %vm208_vm2, %v3273_v33, %v3277_v45 }
0x29c3   :  { %v3281_v53 = vrot.slane %v3279_v50, 6 }
0x29c5   :  { %v2727_v52 = vpop.permute.xlu0 %2726  ;;  %4530 = vmatmul.mubr.msk.f32.vlgmr.msra.gmra.mrb[30].mxu1 %vm318_vm3, %v3281_v53 }
0x29c6   :  { %v2729_v3 = vmul.f32 %v5152_v48, %v2727_v52  ;;  %4911 = vmatpush3.bf16.msra.mxu1 %v5564_v17  ;;  %4567 = vmatprep.mubr.msk.f32.mxu1 %vm5272_vm0, %v5273_v2  ;;  %v5154_v17 = vpop.eup %5153 }
0x29c7   :  { %4912 = vmatprep.subr.bf16.mxu1 %v5271_v1  ;;  %v3038_v58 = vadd.f32 1.0, %v5154_v17 }
0x29c8   :  { %2731 = vrot.lane.b32.xlu1 %v2729_v3, %s5275_s3 }
0x29ca   :  { %4914 = vmatpush3.bf16.msra.mxu1 %v5567_v20  ;;  %v2724_v20 = vmul.f32 %v5152_v48, %v6041_v26 }
0x29cb   :  { %4915 = vmatprep.subr.bf16.mxu1 %v5271_v1 }
0x29ce   :  { %4917 = vmatpush3.bf16.msra.mxu1 %v5573_v23 }
0x29cf   :  { %4918 = vmatprep.subr.bf16.mxu1 %v5271_v1 }
0x29d2   :  { %4920 = vmatpush3.bf16.msra.mxu1 %v5580_v27 }
0x2a3a   :  { %v2732_v60 = vpop.permute.xlu1 %2731 }
0x2a3b   :  { %v6124_v62 = vadd.f32 %v2732_v60, %v2724_v20 }
0x2a98   :  { %v3350_v56 = vpop.f32.mrb[30].mxu1 }
0x2a99   :  { %v3351_v49 = vadd.f32 %v5848_v29, %v3350_v56  ;;  %v4531_v63 = vpop.f32.mrb[31].mxu1 }
0x2a9b   :  { %5155 = vtanh.f32 %v3351_v49  ;;  %v3747_v29 = vmul.f32 -1.442695, %v3351_v49 }
0x2a9c   :  { %5157 = vrcp.f32 %v3038_v58 }
0x2a9d   :  { %5159 = vtanh.f32 %v6124_v62 }
0x2a9e   :  { %5161 = vpow2.f32 %v3747_v29 }
0x2aa5   :  { %v5156_v23 = vpop.eup %5155 }
0x2aa6   :  { %3363 = vrot.lane.b32.xlu0 %v5156_v23, %s5274_s6  ;;  %v5158_v27 = vpop.eup %5157 }
0x2aa7   :  { %v3047_v5 = vmul.f32 %v5158_v27, %v3045_v59  ;;  %v5160_v7 = vpop.eup %5159  ;;  %v3042_v19 = vmul.f32 %v5158_v27, %v6049_v43 }
0x2aa8   :  { %v5162_v12 = vpop.eup %5161 }
0x2aa9   :  { %v3357_v9 = vadd.f32 1.0, %v5162_v12 }
0x2aaa   :  { %3049 = vrot.lane.b32.xlu0 %v3047_v5, %s5275_s3 }
0x2aab   :  { %5163 = vrcp.f32 %v3357_v9 }
0x2aae   :  { %2737 = vrot.lane.b32.xlu0 %v5160_v7, %s5274_s6 }
0x2ab5   :  { %v5164_v26 = vpop.eup %5163 }
0x2ab6   :  { %v3361_v11 = vmul.f32 %v5164_v26, %v6054_v51 }
0x2b18   :  { %v3364_v13 = vpop.permute.xlu0 %3363 }
0x2b19   :  { %v3366_v35 = vmul.f32 %v5164_v26, %v3364_v13 }
0x2b1b   :  { %3368 = vrot.lane.b32.xlu1 %v3366_v35, %s5275_s3 }
0x2b1c   :  { %v3050_v61 = vpop.permute.xlu0 %3049 }
0x2b1d   :  { %v6132_v8 = vadd.f32 %v3050_v61, %v3042_v19 }
0x2b1f   :  { %5165 = vtanh.f32 %v6132_v8 }
0x2b20   :  { %v2738_v14 = vpop.permute.xlu0 %2737 }
0x2b21   :  { %v2740_v46 = vmul.f32 %v5152_v48, %v2738_v14 }
0x2b29   :  { %v5166_v42 = vpop.eup %5165 }
0x2b2a   :  { %3055 = vrot.lane.b32.xlu1 %v5166_v42, %s5274_s6 }
0x2b8d   :  { %v3369_v37 = vpop.permute.xlu1 %3368 }
0x2b8e   :  { %v3371_v40 = vadd.f32 %v3369_v37, %v3361_v11 }
0x2b90   :  { %5167 = vtanh.f32 %v3371_v40  ;;  %v3590_v40 = vld [vmem:[%s6204_s10 + $0x8] sm:$0xff] }
0x2b9a   :  { %v5168_v22 = vpop.eup %5167 }
0x2b9b   :  { %3374 = vrot.lane.b32.xlu0 %v5168_v22, %s5274_s6  ;;  %v3591_v22 = vld [vmem:[%s6204_s10 + $0x10] sm:$0xff] }
0x2b9c   :  { %v3056_v44 = vpop.permute.xlu1 %3055 }
0x2b9d   :  { %v3058_v43 = vmul.f32 %v5158_v27, %v3056_v44  ;;  %v3592_v44 = vld [vmem:[%s6204_s10 + $0x18] sm:$0xff] }
0x2b9f   :  { %3060 = vrot.lane.b32.xlu1 %v3058_v43, %s5275_s3  ;;  %3064 = vrot.lane.b32.xlu0 %v2740_v46, %s5274_s6  ;;  %v4925_v46 = vpack.c.bf16 %v3592_v44, %v3591_v22 }
0x2ba3   :  { %3382 = vrot.lane.b32.xlu0 %v3058_v43, %s5274_s6 }
0x2c0d   :  { %v3375_v18 = vpop.permute.xlu0 %3374 }
0x2c0e   :  { %v3377_v21 = vmul.f32 %v5164_v26, %v3375_v18 }
0x2c10   :  { %3379 = vrot.lane.b32.xlu1 %v3377_v21, %s5275_s3 }
0x2c11   :  { %v3061_v51 = vpop.permute.xlu1 %3060  ;;  %v3065_v25 = vpop.permute.xlu0 %3064 }
0x2c12   :  { %v3067_v24 = vsel %vm208_vm2, %v3061_v51, %v3065_v25  ;;  %v3752_v25 = vld [vmem:[#allocation2] ss:$0 sm:$0xff] }
0x2c13   :  { %4500 = vmatmul.mubr.msk.f32.vlgmr.msra.gmra.mrb[28].mxu0 %vm318_vm3, %v3067_v24 }
0x2c14   :  { %4899 = vmatpush3.bf16.msra.mxu0 %v5497_v4  ;;  %4548 = vmatprep.mubr.msk.f32.mxu0 %vm5272_vm0, %v5273_v2 }
0x2c15   :  { %4900 = vmatprep.subr.bf16.mxu0 %v5271_v1  ;;  %v3383_v28 = vpop.permute.xlu0 %3382 }
0x2c18   :  { %4902 = vmatpush3.bf16.msra.mxu0 %v5500_v6 }
0x2c19   :  { %4903 = vmatprep.subr.bf16.mxu0 %v5271_v1 }
0x2c1c   :  { %4905 = vmatpush3.bf16.msra.mxu0 %v5504_v10 }
0x2c1d   :  { %4906 = vmatprep.subr.bf16.mxu0 %v5271_v1 }
0x2c20   :  { %4908 = vmatpush3.bf16.msra.mxu0 %v5509_v15 }
0x2c21   :  { %4921 = vmatprep.subr.bf16.mxu0 %v5271_v1 }
0x2c82   :  { %v3380_v16 = vpop.permute.xlu1 %3379 }
0x2c83   :  { %v3385_v4 = vsel %vm208_vm2, %v3380_v16, %v3383_v28 }
0x2c84   :  { %4549 = vmatmul.mubr.msk.f32.vlgmr.msra.gmra.mrb[30].mxu0 %vm318_vm3, %v3385_v4 }
0x2c85   :  { %4578 = vmatprep.mubr.msk.f32.mxu0 %vm5272_vm0, %v5273_v2 }
0x2ce6   :  { %v3137_v6 = vpop.f32.mrb[28].mxu0 }
0x2ce7   :  { %v3138_v32 = vadd.f32 %v6018_v54, %v3137_v6  ;;  %v4501_v34 = vpop.f32.mrb[29].mxu0 }
0x2ce9   :  { %5169 = vtanh.f32 %v3138_v32  ;;  %v3743_v15 = vmul.f32 -1.442695, %v3138_v32 }
0x2ceb   :  { %5171 = vpow2.f32 %v3743_v15 }
0x2cf3   :  { %v5170_v10 = vpop.eup %5169 }
0x2cf4   :  { %3150 = vrot.lane.b32.xlu1 %v5170_v10, %s5274_s6 }
0x2cf5   :  { %v5172_v0 = vpop.eup %5171 }
0x2cf6   :  { %v3144_v31 = vadd.f32 1.0, %v5172_v0 }
0x2d57   :  { %v3455_v36 = vpop.f32.mrb[30].mxu0 }
0x2d58   :  { %v3456_v30 = vadd.f32 %v5918_v55, %v3455_v36  ;;  %v4550_v38 = vpop.f32.mrb[31].mxu0 }
0x2d5a   :  { %5173 = vtanh.f32 %v3456_v30  ;;  %v3749_v45 = vmul.f32 -1.442695, %v3456_v30 }
0x2d5b   :  { %5175 = vrcp.f32 %v3144_v31 }
0x2d5c   :  { %5177 = vpow2.f32 %v3749_v45 }
0x2d64   :  { %v5174_v39 = vpop.eup %5173 }
0x2d65   :  { %3468 = vrot.lane.b32.xlu0 %v5174_v39, %s5274_s6  ;;  %v5176_v2 = vpop.eup %5175 }
0x2d66   :  { %v3151_v47 = vpop.permute.xlu1 %3150  ;;  %v5178_v33 = vpop.eup %5177  ;;  %v3148_v55 = vmul.f32 %v5176_v2, %v6124_v62 }
0x2d67   :  { %v3153_v41 = vmul.f32 %v5176_v2, %v3151_v47  ;;  %v3462_v50 = vadd.f32 1.0, %v5178_v33 }
0x2d69   :  { %3155 = vrot.lane.b32.xlu1 %v3153_v41, %s5275_s3  ;;  %5179 = vrcp.f32 %v3462_v50 }
0x2d73   :  { %v5180_v53 = vpop.eup %5179 }
0x2d74   :  { %v3466_v59 = vmul.f32 %v5180_v53, %v6132_v8 }
0x2dd7   :  { %v3469_v48 = vpop.permute.xlu0 %3468 }
0x2dd8   :  { %v3471_v52 = vmul.f32 %v5180_v53, %v3469_v48 }
0x2dda   :  { %3473 = vrot.lane.b32.xlu0 %v3471_v52, %s5275_s3 }
0x2ddb   :  { %v3156_v3 = vpop.permute.xlu1 %3155 }
0x2ddc   :  { %v3158_v57 = vadd.f32 %v3156_v3, %v3148_v55 }
0x2dde   :  { %5181 = vtanh.f32 %v3158_v57 }
0x2de8   :  { %v5182_v17 = vpop.eup %5181 }
0x2de9   :  { %3161 = vrot.lane.b32.xlu1 %v5182_v17, %s5274_s6 }
0x2e4c   :  { %v3474_v56 = vpop.permute.xlu0 %3473 }
0x2e4d   :  { %v3476_v58 = vadd.f32 %v3474_v56, %v3466_v59 }
0x2e4f   :  { %5183 = vtanh.f32 %v3476_v58 }
0x2e59   :  { %v5184_v49 = vpop.eup %5183 }
0x2e5a   :  { %3479 = vrot.lane.b32.xlu0 %v5184_v49, %s5274_s6 }
0x2e5b   :  { %v3162_v63 = vpop.permute.xlu1 %3161 }
0x2e5c   :  { %v3164_v60 = vmul.f32 %v5176_v2, %v3162_v63 }
0x2e5e   :  { %3488 = vrot.lane.b32.xlu0 %v3164_v60, %s5274_s6 }
0x2ecc   :  { %v3480_v20 = vpop.permute.xlu0 %3479 }
0x2ecd   :  { %v3482_v62 = vmul.f32 %v5180_v53, %v3480_v20 }
0x2ecf   :  { %3484 = vrot.lane.b32.xlu1 %v3482_v62, %s5275_s3 }
0x2ed0   :  { %v3489_v23 = vpop.permute.xlu0 %3488 }
0x2f41   :  { %v3485_v27 = vpop.permute.xlu1 %3484 }
0x2f42   :  { %v3491_v5 = vsel %vm208_vm2, %v3485_v27, %v3489_v23 }
0x2f43   :  { %4568 = vmatmul.mubr.msk.f32.vlgmr.msra.gmra.mrb[32].mxu1 %vm318_vm3, %v3491_v5 }
0x3016   :  { %v3561_v7 = vpop.f32.mrb[32].mxu1 }
0x3017   :  { %v3562_v29 = vadd.f32 %v6018_v54, %v3561_v7  ;;  %v4569_v12 = vpop.f32.mrb[33].mxu1  ;;  %v3589_v54 = vld [vmem:[%s6204_s10] sm:$0xff] }
0x3018   :  { %v4922_v14 = vpack.c.bf16 %v3590_v40, %v3589_v54 }
0x3019   :  { %5185 = vtanh.f32 %v3562_v29  ;;  %v3751_v26 = vmul.f32 -1.442695, %v3562_v29 }
0x301a   :  { %4923 = vmatpush3.bf16.msra.mxu0 %v4922_v14 }
0x301b   :  { %5187 = vpow2.f32 %v3751_v26  ;;  %4924 = vmatprep.subr.bf16.mxu0 %v5271_v1 }
0x301e   :  { %4926 = vmatpush3.bf16.msra.mxu0 %v4925_v46 }
0x3023   :  { %v5186_v9 = vpop.eup %5185 }
0x3024   :  { %3574 = vrot.lane.b32.xlu1 %v5186_v9, %s5274_s6 }
0x3025   :  { %v5188_v13 = vpop.eup %5187 }
0x3026   :  { %v3568_v35 = vadd.f32 1.0, %v5188_v13 }
0x3028   :  { %5189 = vrcp.f32 %v3568_v35 }
0x3032   :  { %v5190_v19 = vpop.eup %5189 }
0x3033   :  { %v3572_v42 = vmul.f32 %v5190_v19, %v3158_v57 }
0x3096   :  { %v3575_v61 = vpop.permute.xlu1 %3574 }
0x3097   :  { %v3577_v8 = vmul.f32 %v5190_v19, %v3575_v61 }
0x3099   :  { %3579 = vrot.lane.b32.xlu0 %v3577_v8, %s5275_s3 }
0x310b   :  { %v3580_v11 = vpop.permute.xlu0 %3579 }
0x310c   :  { %v3582_v37 = vadd.f32 %v3580_v11, %v3572_v42 }
0x310e   :  { %5191 = vtanh.f32 %v3582_v37 }
0x3118   :  { %v5192_v43 = vpop.eup %5191 }
0x3119   :  { %3585 = vrot.lane.b32.xlu1 %v5192_v43, %s5274_s6 }
0x318b   :  { %v3586_v18 = vpop.permute.xlu1 %3585 }
0x318c   :  { %v3588_v21 = vmul.f32 %v5190_v19, %v3586_v18 }
0x318e   :  { %3601 = vrot.lane.b32.xlu0 %v3588_v21, %s5275_s3 }
0x3200   :  { %v3602_v51 = vpop.permute.xlu0 %3601 }
0x3201   :  { %4579 = vmatmul.mubr.msk.f32.vlgmr.msra.gmra.mrb[32].mxu0 %vm208_vm2, %v3602_v51 }
0x32d4   :  { %v3671_v24 = vpop.f32.mrb[32].mxu0 }
0x32d5   :  { %v3672_v28 = vadd.f32 %v3752_v25, %v3671_v24  ;;  %v4580_v16 = vpop.f32.mrb[33].mxu0 }
0x32d7   :  { %3676 = vst.msk [vmem:[%s6206_s12] sm:$0x3] %vm3675_vm4, %v3672_v28 }
0x32d8   :  { %3681 = vsyncpa [#allocation4], 1 }
0x32d9   :  { %3682 = vsyncpa [#allocation6], 1 }

</bundles_post_ra>
